<compile_context>
chip_gen: v6e
topology: v6e:2x2x1
jax: 0.10.0
libtpu: 0.0.40
codegen_flags: <defaults>
</compile_context>

<pallas_src>
import numpy as np
import jax
import jax.numpy as jnp
from jax import lax
from jax.experimental import pallas as pl
from jax.experimental.pallas import tpu as pltpu


# ---------------------------------------------------------------------------
# Fused conv stage:  conv1+ReLU+pool -> conv2+ReLU+pool        [grid over B]
#
# conv1:  X_rows (56,300) = 5 row-shifted slices of the 60x60 input,
#         conv1_all (56,336) = X_rows @ T1   with T1[dy*60+p, c*56+j] = w1[c,dy,p-j]
#         (column blocks of 56 = output channels).
# pool1:  row even/odd selection (28,56) matmuls + max, then per-channel
#         column even/odd selection (336,168) matmuls + max  -> P1 (28,168),
#         P1[i', c*28+j'] = pool1[c, i', j'].
# conv2:  P_stack (24,840) = 5 row-shifted slices of P1,
#         conv2_all (24,384) = P_stack @ G2  with
#         G2[dy*168 + c*28 + m, o*24+x] = w2[o,c,dy,m-x]
#         (column blocks of 24 = output channels).
# pool2:  same even/odd selection trick -> P2 (12,192), P2[y', o*12+x'].
# ---------------------------------------------------------------------------
def _conv_stages_kernel(x_ref, t1_ref, b1_ref, g2_ref, b2_ref,
                        re1_ref, ro1_ref, ce1_ref, co1_ref,
                        re2_ref, ro2_ref, ce2_ref, co2_ref, out_ref):
    x = x_ref[0, :, :]                                                # (60, 60)

    # ---- conv1 as one MXU matmul -------------------------------------------
    x_rows = jnp.concatenate([x[dy:dy + 56, :] for dy in range(5)],
                             axis=1)                                  # (56, 300)
    c1 = jnp.dot(x_rows, t1_ref[...],
                 preferred_element_type=jnp.float32)                 # (56, 336)
    c1 = jnp.maximum(c1 + b1_ref[...], 0.0)

    # ---- maxpool 2x2 (rows then columns, selection matmuls) ----------------
    rowm = jnp.maximum(
        jnp.dot(re1_ref[...], c1, preferred_element_type=jnp.float32),
        jnp.dot(ro1_ref[...], c1, preferred_element_type=jnp.float32))   # (28, 336)
    p1 = jnp.maximum(
        jnp.dot(rowm, ce1_ref[...], preferred_element_type=jnp.float32),
        jnp.dot(rowm, co1_ref[...], preferred_element_type=jnp.float32))  # (28, 168)

    # ---- conv2 as one MXU matmul -------------------------------------------
    p_stack = jnp.concatenate([p1[dy:dy + 24, :] for dy in range(5)],
                              axis=1)                                 # (24, 840)
    c2 = jnp.dot(p_stack, g2_ref[...],
                 preferred_element_type=jnp.float32)                  # (24, 384)
    c2 = jnp.maximum(c2 + b2_ref[...], 0.0)

    # ---- maxpool 2x2 --------------------------------------------------------
    rowm2 = jnp.maximum(
        jnp.dot(re2_ref[...], c2, preferred_element_type=jnp.float32),
        jnp.dot(ro2_ref[...], c2, preferred_element_type=jnp.float32))   # (12, 384)
    p2 = jnp.maximum(
        jnp.dot(rowm2, ce2_ref[...], preferred_element_type=jnp.float32),
        jnp.dot(rowm2, co2_ref[...], preferred_element_type=jnp.float32))  # (12, 192)

    out_ref[0, :, :] = p2


def conv_stages(x2d, t1, b1_row, g2, b2_row, selectors):
    B = x2d.shape[0]
    re1, ro1, ce1, co1, re2, ro2, ce2, co2 = selectors
    full = lambda shape: pl.BlockSpec(shape, lambda b: tuple(0 for _ in shape))
    return pl.pallas_call(
        _conv_stages_kernel,
        grid=(B,),
        in_specs=[
            pl.BlockSpec((1, 60, 60), lambda b: (b, 0, 0)),
            full((300, 336)),
            full((1, 336)),
            full((840, 384)),
            full((1, 384)),
            full((28, 56)), full((28, 56)),
            full((336, 168)), full((336, 168)),
            full((12, 24)), full((12, 24)),
            full((384, 192)), full((384, 192)),
        ],
        out_specs=pl.BlockSpec((1, 12, 192), lambda b: (b, 0, 0)),
        out_shape=jax.ShapeDtypeStruct((B, 12, 192), jnp.float32),
        compiler_params=pltpu.CompilerParams(
            dimension_semantics=("parallel",)),
    )(x2d, t1, b1_row, g2, b2_row, re1, ro1, ce1, co1, re2, ro2, ce2, co2)


# ---------------------------------------------------------------------------
# MLP head:  fc1 + ReLU -> fc2 + ReLU -> fc3   (whole batch, one invocation)
# ---------------------------------------------------------------------------
def _mlp_kernel(x_ref, w1_ref, b1_ref, w2_ref, b2_ref, w3_ref, b3_ref, out_ref):
    h = jnp.maximum(
        jnp.dot(x_ref[...], w1_ref[...], preferred_element_type=jnp.float32)
        + b1_ref[...], 0.0)
    h = jnp.maximum(
        jnp.dot(h, w2_ref[...], preferred_element_type=jnp.float32)
        + b2_ref[...], 0.0)
    out_ref[...] = (jnp.dot(h, w3_ref[...], preferred_element_type=jnp.float32)
                    + b3_ref[...])


def mlp_head(xf, wf1, bf1, wf2, bf2, wf3, bf3):
    B = xf.shape[0]
    return pl.pallas_call(
        _mlp_kernel,
        in_specs=[pl.BlockSpec(memory_space=pltpu.MemorySpace.VMEM)] * 7,
        out_specs=pl.BlockSpec(memory_space=pltpu.MemorySpace.VMEM),
        out_shape=jax.ShapeDtypeStruct((B, 2), jnp.float32),
    )(xf, wf1, bf1, wf2, bf2, wf3, bf3)


# ---------------------------------------------------------------------------
# Constant pooling selectors (0/1 matrices) and weight-absorbed conv operators
# ---------------------------------------------------------------------------
def _pool_selectors():
    re1 = np.zeros((28, 56), np.float32); re1[np.arange(28), 2 * np.arange(28)] = 1.0
    ro1 = np.zeros((28, 56), np.float32); ro1[np.arange(28), 2 * np.arange(28) + 1] = 1.0
    c = np.repeat(np.arange(6), 28); k = np.tile(np.arange(28), 6)
    ce1 = np.zeros((336, 168), np.float32); ce1[c * 56 + 2 * k, c * 28 + k] = 1.0
    co1 = np.zeros((336, 168), np.float32); co1[c * 56 + 2 * k + 1, c * 28 + k] = 1.0
    re2 = np.zeros((12, 24), np.float32); re2[np.arange(12), 2 * np.arange(12)] = 1.0
    ro2 = np.zeros((12, 24), np.float32); ro2[np.arange(12), 2 * np.arange(12) + 1] = 1.0
    o = np.repeat(np.arange(16), 12); t = np.tile(np.arange(12), 16)
    ce2 = np.zeros((384, 192), np.float32); ce2[o * 24 + 2 * t, o * 12 + t] = 1.0
    co2 = np.zeros((384, 192), np.float32); co2[o * 24 + 2 * t + 1, o * 12 + t] = 1.0
    return tuple(jnp.asarray(a) for a in (re1, ro1, ce1, co1, re2, ro2, ce2, co2))


def _conv_operators(w1, w2):
    # T1[dy*60 + p, c*56 + j] = w1[c, 0, dy, p - j]  for 0 <= p - j < 5, else 0.
    s1 = np.stack([np.eye(60, 56, k=-dx) for dx in range(5)]).astype(np.float32)
    t1 = jnp.einsum('xpj,cdx->dpcj', s1, w1[:, 0]).reshape(300, 336)
    # G2[dy*168 + c*28 + m, o*24 + x] = w2[o, c, dy, m - x]  for 0 <= m - x < 5.
    s2 = np.stack([np.eye(28, 24, k=-dx) for dx in range(5)]).astype(np.float32)
    g2 = jnp.einsum('xmt,ocdx->dcmot', s2, w2).reshape(840, 384)
    return t1, g2


# ---------------------------------------------------------------------------
# Full forward (Pallas) and pure-JAX reference.
# ---------------------------------------------------------------------------
def cnn_forward(x, w1, b1, w2, b2, wf1, bf1, wf2, bf2, wf3, bf3):
    B = x.shape[0]
    t1, g2 = _conv_operators(w1, w2)
    b1_row = jnp.repeat(b1, 56)[None, :]            # (1, 336)
    b2_row = jnp.repeat(b2, 24)[None, :]            # (1, 384)
    selectors = _pool_selectors()

    p2 = conv_stages(x.reshape(B, 60, 60), t1, b1_row, g2, b2_row,
                     selectors)                      # (B, 12, 192): [y', o*12+x']
    feats = p2.reshape(B, 16 * 144)                  # row-major reinterpret

    # Fold the torch.flatten (o, y', x') ordering into fc1's weight rows so the
    # activation flatten above needs no transpose.
    wf1_perm = wf1.reshape(16, 12, 12, 120).transpose(1, 0, 2, 3).reshape(2304, 120)
    return mlp_head(feats, wf1_perm, bf1.reshape(1, 120), wf2, bf2.reshape(1, 84),
                    wf3, bf3.reshape(1, 2))


def reference_forward(x, w1, b1, w2, b2, wf1, bf1, wf2, bf2, wf3, bf3):
    dn = ('NCHW', 'OIHW', 'NCHW')
    y = lax.conv_general_dilated(x, w1, (1, 1), 'VALID', dimension_numbers=dn,
                                 precision=lax.Precision.HIGHEST)
    y = jnp.maximum(y + b1.reshape(1, 6, 1, 1), 0.0)
    y = lax.reduce_window(y, -jnp.inf, lax.max, (1, 1, 2, 2), (1, 1, 2, 2), 'VALID')
    y = lax.conv_general_dilated(y, w2, (1, 1), 'VALID', dimension_numbers=dn,
                                 precision=lax.Precision.HIGHEST)
    y = jnp.maximum(y + b2.reshape(1, 16, 1, 1), 0.0)
    y = lax.reduce_window(y, -jnp.inf, lax.max, (1, 1, 2, 2), (1, 1, 2, 2), 'VALID')
    y = y.reshape(y.shape[0], -1)
    y = jnp.maximum(jnp.dot(y, wf1, precision=lax.Precision.HIGHEST) + bf1, 0.0)
    y = jnp.maximum(jnp.dot(y, wf2, precision=lax.Precision.HIGHEST) + bf2, 0.0)
    return jnp.dot(y, wf3, precision=lax.Precision.HIGHEST) + bf3


if __name__ == "__main__":
    # Input spatial size 60x60 is implied by fc1 = Linear(16*12*12, 120).
    B = 2
    key = jax.random.PRNGKey(0)
    ks = jax.random.split(key, 11)

    def u(k, shape, fan_in):
        bound = 1.0 / float(np.sqrt(fan_in))
        return jax.random.uniform(k, shape, jnp.float32, -bound, bound)

    x = jax.random.normal(ks[0], (B, 1, 60, 60), dtype=jnp.float32)
    w1 = u(ks[1], (6, 1, 5, 5), 25)
    b1 = u(ks[2], (6,), 25)
    w2 = u(ks[3], (16, 6, 5, 5), 150)
    b2 = u(ks[4], (16,), 150)
    wf1 = u(ks[5], (2304, 120), 2304)   # stored (in, out)
    bf1 = u(ks[6], (120,), 2304)
    wf2 = u(ks[7], (120, 84), 120)
    bf2 = u(ks[8], (84,), 120)
    wf3 = u(ks[9], (84, 2), 84)
    bf3 = u(ks[10], (2,), 84)

    out = cnn_forward(x, w1, b1, w2, b2, wf1, bf1, wf2, bf2, wf3, bf3)
    out = jax.block_until_ready(out)
    assert out.shape == (B, 2), out.shape

    ref = jax.block_until_ready(
        reference_forward(x, w1, b1, w2, b2, wf1, bf1, wf2, bf2, wf3, bf3))
    assert jnp.allclose(out, ref, rtol=2e-2, atol=2e-2), (
        float(jnp.max(jnp.abs(out - ref))))

    print("KERNEL_OK")
</pallas_src>

<mosaic_0001>
module attributes {stable_mosaic.version = 11 : i64} {
  func.func @_conv_stages_kernel(%arg0: i32, %arg1: memref<1x60x60xf32, #tpu.memory_space<vmem>>, %arg2: memref<300x336xf32, #tpu.memory_space<vmem>>, %arg3: memref<1x336xf32, #tpu.memory_space<vmem>>, %arg4: memref<840x384xf32, #tpu.memory_space<vmem>>, %arg5: memref<1x384xf32, #tpu.memory_space<vmem>>, %arg6: memref<28x56xf32, #tpu.memory_space<vmem>>, %arg7: memref<28x56xf32, #tpu.memory_space<vmem>>, %arg8: memref<336x168xf32, #tpu.memory_space<vmem>>, %arg9: memref<336x168xf32, #tpu.memory_space<vmem>>, %arg10: memref<12x24xf32, #tpu.memory_space<vmem>>, %arg11: memref<12x24xf32, #tpu.memory_space<vmem>>, %arg12: memref<384x192xf32, #tpu.memory_space<vmem>>, %arg13: memref<384x192xf32, #tpu.memory_space<vmem>>, %arg14: memref<1x12x192xf32, #tpu.memory_space<vmem>>) attributes {dimension_semantics = [#tpu.dimension_semantics<parallel>], iteration_bounds = array<i64: 2>, scalar_prefetch = 0 : i64, scratch_operands = 0 : i64, tpu.core_type = #tpu.core_type<tc>, window_params = [{transform_indices = @transform_0, window_bounds = array<i64: 1, 60, 60>}, {pipeline_mode = #tpu.pipeline_mode<synchronous>, transform_indices = @transform_1, window_bounds = array<i64: 300, 336>}, {pipeline_mode = #tpu.pipeline_mode<synchronous>, transform_indices = @transform_2, window_bounds = array<i64: 1, 336>}, {pipeline_mode = #tpu.pipeline_mode<synchronous>, transform_indices = @transform_3, window_bounds = array<i64: 840, 384>}, {pipeline_mode = #tpu.pipeline_mode<synchronous>, transform_indices = @transform_4, window_bounds = array<i64: 1, 384>}, {pipeline_mode = #tpu.pipeline_mode<synchronous>, transform_indices = @transform_5, window_bounds = array<i64: 28, 56>}, {pipeline_mode = #tpu.pipeline_mode<synchronous>, transform_indices = @transform_6, window_bounds = array<i64: 28, 56>}, {pipeline_mode = #tpu.pipeline_mode<synchronous>, transform_indices = @transform_7, window_bounds = array<i64: 336, 168>}, {pipeline_mode = #tpu.pipeline_mode<synchronous>, transform_indices = @transform_8, window_bounds = array<i64: 336, 168>}, {pipeline_mode = #tpu.pipeline_mode<synchronous>, transform_indices = @transform_9, window_bounds = array<i64: 12, 24>}, {pipeline_mode = #tpu.pipeline_mode<synchronous>, transform_indices = @transform_10, window_bounds = array<i64: 12, 24>}, {pipeline_mode = #tpu.pipeline_mode<synchronous>, transform_indices = @transform_11, window_bounds = array<i64: 384, 192>}, {pipeline_mode = #tpu.pipeline_mode<synchronous>, transform_indices = @transform_12, window_bounds = array<i64: 384, 192>}, {transform_indices = @transform_13, window_bounds = array<i64: 1, 12, 192>}]} {
    %c0 = arith.constant 0 : index
    %c0_0 = arith.constant 0 : index
    %c0_1 = arith.constant 0 : index
    %0 = vector.load %arg1[%c0, %c0_0, %c0_1] : memref<1x60x60xf32, #tpu.memory_space<vmem>>, vector<1x60x60xf32>
    %1 = vector.shape_cast %0 : vector<1x60x60xf32> to vector<60x60xf32>
    %2 = vector.extract_strided_slice %1 {offsets = [0, 0], sizes = [56, 60], strides = [1, 1]} : vector<60x60xf32> to vector<56x60xf32>
    %3 = vector.extract_strided_slice %1 {offsets = [1, 0], sizes = [56, 60], strides = [1, 1]} : vector<60x60xf32> to vector<56x60xf32>
    %4 = vector.extract_strided_slice %1 {offsets = [2, 0], sizes = [56, 60], strides = [1, 1]} : vector<60x60xf32> to vector<56x60xf32>
    %5 = vector.extract_strided_slice %1 {offsets = [3, 0], sizes = [56, 60], strides = [1, 1]} : vector<60x60xf32> to vector<56x60xf32>
    %6 = vector.extract_strided_slice %1 {offsets = [4, 0], sizes = [56, 60], strides = [1, 1]} : vector<60x60xf32> to vector<56x60xf32>
    %7 = tpu.concatenate %2, %3, %4, %5, %6 in 1 : vector<56x60xf32>, vector<56x60xf32>, vector<56x60xf32>, vector<56x60xf32>, vector<56x60xf32> -> vector<56x300xf32>
    %c0_2 = arith.constant 0 : index
    %c0_3 = arith.constant 0 : index
    %8 = vector.load %arg2[%c0_2, %c0_3] : memref<300x336xf32, #tpu.memory_space<vmem>>, vector<300x336xf32>
    %cst = arith.constant dense<0.000000e+00> : vector<56x336xf32>
    %9 = tpu.matmul %7, %8, %cst {dimension_numbers = #tpu.dot_dimension_numbers<[1], [0], [0], [1], [0, 0, 1, 1], [], []>} : vector<56x300xf32>, vector<300x336xf32>, vector<56x336xf32> -> vector<56x336xf32>
    %c0_4 = arith.constant 0 : index
    %c0_5 = arith.constant 0 : index
    %10 = vector.load %arg3[%c0_4, %c0_5] : memref<1x336xf32, #tpu.memory_space<vmem>>, vector<1x336xf32>
    %11 = vector.broadcast %10 : vector<1x336xf32> to vector<56x336xf32>
    %12 = arith.addf %9, %11 : vector<56x336xf32>
    %cst_6 = arith.constant 0.000000e+00 : f32
    %13 = vector.broadcast %cst_6 : f32 to vector<56x336xf32>
    %14 = arith.maximumf %12, %13 : vector<56x336xf32>
    %c0_7 = arith.constant 0 : index
    %c0_8 = arith.constant 0 : index
    %15 = vector.load %arg6[%c0_7, %c0_8] : memref<28x56xf32, #tpu.memory_space<vmem>>, vector<28x56xf32>
    %cst_9 = arith.constant dense<0.000000e+00> : vector<28x336xf32>
    %16 = tpu.matmul %15, %14, %cst_9 {dimension_numbers = #tpu.dot_dimension_numbers<[1], [0], [0], [1], [0, 0, 1, 1], [], []>} : vector<28x56xf32>, vector<56x336xf32>, vector<28x336xf32> -> vector<28x336xf32>
    %c0_10 = arith.constant 0 : index
    %c0_11 = arith.constant 0 : index
    %17 = vector.load %arg7[%c0_10, %c0_11] : memref<28x56xf32, #tpu.memory_space<vmem>>, vector<28x56xf32>
    %cst_12 = arith.constant dense<0.000000e+00> : vector<28x336xf32>
    %18 = tpu.matmul %17, %14, %cst_12 {dimension_numbers = #tpu.dot_dimension_numbers<[1], [0], [0], [1], [0, 0, 1, 1], [], []>} : vector<28x56xf32>, vector<56x336xf32>, vector<28x336xf32> -> vector<28x336xf32>
    %19 = arith.maximumf %16, %18 : vector<28x336xf32>
    %c0_13 = arith.constant 0 : index
    %c0_14 = arith.constant 0 : index
    %20 = vector.load %arg8[%c0_13, %c0_14] : memref<336x168xf32, #tpu.memory_space<vmem>>, vector<336x168xf32>
    %cst_15 = arith.constant dense<0.000000e+00> : vector<28x168xf32>
    %21 = tpu.matmul %19, %20, %cst_15 {dimension_numbers = #tpu.dot_dimension_numbers<[1], [0], [0], [1], [0, 0, 1, 1], [], []>} : vector<28x336xf32>, vector<336x168xf32>, vector<28x168xf32> -> vector<28x168xf32>
    %c0_16 = arith.constant 0 : index
    %c0_17 = arith.constant 0 : index
    %22 = vector.load %arg9[%c0_16, %c0_17] : memref<336x168xf32, #tpu.memory_space<vmem>>, vector<336x168xf32>
    %cst_18 = arith.constant dense<0.000000e+00> : vector<28x168xf32>
    %23 = tpu.matmul %19, %22, %cst_18 {dimension_numbers = #tpu.dot_dimension_numbers<[1], [0], [0], [1], [0, 0, 1, 1], [], []>} : vector<28x336xf32>, vector<336x168xf32>, vector<28x168xf32> -> vector<28x168xf32>
    %24 = arith.maximumf %21, %23 : vector<28x168xf32>
    %25 = vector.extract_strided_slice %24 {offsets = [0, 0], sizes = [24, 168], strides = [1, 1]} : vector<28x168xf32> to vector<24x168xf32>
    %26 = vector.extract_strided_slice %24 {offsets = [1, 0], sizes = [24, 168], strides = [1, 1]} : vector<28x168xf32> to vector<24x168xf32>
    %27 = vector.extract_strided_slice %24 {offsets = [2, 0], sizes = [24, 168], strides = [1, 1]} : vector<28x168xf32> to vector<24x168xf32>
    %28 = vector.extract_strided_slice %24 {offsets = [3, 0], sizes = [24, 168], strides = [1, 1]} : vector<28x168xf32> to vector<24x168xf32>
    %29 = vector.extract_strided_slice %24 {offsets = [4, 0], sizes = [24, 168], strides = [1, 1]} : vector<28x168xf32> to vector<24x168xf32>
    %30 = tpu.concatenate %25, %26, %27, %28, %29 in 1 : vector<24x168xf32>, vector<24x168xf32>, vector<24x168xf32>, vector<24x168xf32>, vector<24x168xf32> -> vector<24x840xf32>
    %c0_19 = arith.constant 0 : index
    %c0_20 = arith.constant 0 : index
    %31 = vector.load %arg4[%c0_19, %c0_20] : memref<840x384xf32, #tpu.memory_space<vmem>>, vector<840x384xf32>
    %cst_21 = arith.constant dense<0.000000e+00> : vector<24x384xf32>
    %32 = tpu.matmul %30, %31, %cst_21 {dimension_numbers = #tpu.dot_dimension_numbers<[1], [0], [0], [1], [0, 0, 1, 1], [], []>} : vector<24x840xf32>, vector<840x384xf32>, vector<24x384xf32> -> vector<24x384xf32>
    %c0_22 = arith.constant 0 : index
    %c0_23 = arith.constant 0 : index
    %33 = vector.load %arg5[%c0_22, %c0_23] : memref<1x384xf32, #tpu.memory_space<vmem>>, vector<1x384xf32>
    %34 = vector.broadcast %33 : vector<1x384xf32> to vector<24x384xf32>
    %35 = arith.addf %32, %34 : vector<24x384xf32>
    %cst_24 = arith.constant 0.000000e+00 : f32
    %36 = vector.broadcast %cst_24 : f32 to vector<24x384xf32>
    %37 = arith.maximumf %35, %36 : vector<24x384xf32>
    %c0_25 = arith.constant 0 : index
    %c0_26 = arith.constant 0 : index
    %38 = vector.load %arg10[%c0_25, %c0_26] : memref<12x24xf32, #tpu.memory_space<vmem>>, vector<12x24xf32>
    %cst_27 = arith.constant dense<0.000000e+00> : vector<12x384xf32>
    %39 = tpu.matmul %38, %37, %cst_27 {dimension_numbers = #tpu.dot_dimension_numbers<[1], [0], [0], [1], [0, 0, 1, 1], [], []>} : vector<12x24xf32>, vector<24x384xf32>, vector<12x384xf32> -> vector<12x384xf32>
    %c0_28 = arith.constant 0 : index
    %c0_29 = arith.constant 0 : index
    %40 = vector.load %arg11[%c0_28, %c0_29] : memref<12x24xf32, #tpu.memory_space<vmem>>, vector<12x24xf32>
    %cst_30 = arith.constant dense<0.000000e+00> : vector<12x384xf32>
    %41 = tpu.matmul %40, %37, %cst_30 {dimension_numbers = #tpu.dot_dimension_numbers<[1], [0], [0], [1], [0, 0, 1, 1], [], []>} : vector<12x24xf32>, vector<24x384xf32>, vector<12x384xf32> -> vector<12x384xf32>
    %42 = arith.maximumf %39, %41 : vector<12x384xf32>
    %c0_31 = arith.constant 0 : index
    %c0_32 = arith.constant 0 : index
    %43 = vector.load %arg12[%c0_31, %c0_32] : memref<384x192xf32, #tpu.memory_space<vmem>>, vector<384x192xf32>
    %cst_33 = arith.constant dense<0.000000e+00> : vector<12x192xf32>
    %44 = tpu.matmul %42, %43, %cst_33 {dimension_numbers = #tpu.dot_dimension_numbers<[1], [0], [0], [1], [0, 0, 1, 1], [], []>} : vector<12x384xf32>, vector<384x192xf32>, vector<12x192xf32> -> vector<12x192xf32>
    %c0_34 = arith.constant 0 : index
    %c0_35 = arith.constant 0 : index
    %45 = vector.load %arg13[%c0_34, %c0_35] : memref<384x192xf32, #tpu.memory_space<vmem>>, vector<384x192xf32>
    %cst_36 = arith.constant dense<0.000000e+00> : vector<12x192xf32>
    %46 = tpu.matmul %42, %45, %cst_36 {dimension_numbers = #tpu.dot_dimension_numbers<[1], [0], [0], [1], [0, 0, 1, 1], [], []>} : vector<12x384xf32>, vector<384x192xf32>, vector<12x192xf32> -> vector<12x192xf32>
    %47 = arith.maximumf %44, %46 : vector<12x192xf32>
    %c0_37 = arith.constant 0 : index
    %c0_38 = arith.constant 0 : index
    %c0_39 = arith.constant 0 : index
    %48 = vector.load %arg14[%c0_37, %c0_38, %c0_39] : memref<1x12x192xf32, #tpu.memory_space<vmem>>, vector<1x12x192xf32>
    %49 = vector.shape_cast %48 : vector<1x12x192xf32> to vector<12x192xf32>
    %50 = vector.shape_cast %47 : vector<12x192xf32> to vector<1x12x192xf32>
    tpu.vector_store %arg14[%c0_37, %c0_38, %c0_39], %50 {strides = array<i32>} : memref<1x12x192xf32, #tpu.memory_space<vmem>>, vector<1x12x192xf32>,
    return
  }
  func.func @transform_0(%arg0: i32) -> (i32, i32, i32) {
    %c0_i32 = arith.constant 0 : i32
    %c0_i32_0 = arith.constant 0 : i32
    %c0_i32_1 = arith.constant 0 : i32
    return %arg0, %c0_i32, %c0_i32_0 : i32, i32, i32
  }
  func.func @transform_1(%arg0: i32) -> (i32, i32) {
    %c0_i32 = arith.constant 0 : i32
    %c0_i32_0 = arith.constant 0 : i32
    %c0_i32_1 = arith.constant 0 : i32
    return %c0_i32, %c0_i32_0 : i32, i32
  }
  func.func @transform_2(%arg0: i32) -> (i32, i32) {
    %c0_i32 = arith.constant 0 : i32
    %c0_i32_0 = arith.constant 0 : i32
    %c0_i32_1 = arith.constant 0 : i32
    return %c0_i32, %c0_i32_0 : i32, i32
  }
  func.func @transform_3(%arg0: i32) -> (i32, i32) {
    %c0_i32 = arith.constant 0 : i32
    %c0_i32_0 = arith.constant 0 : i32
    %c0_i32_1 = arith.constant 0 : i32
    return %c0_i32, %c0_i32_0 : i32, i32
  }
  func.func @transform_4(%arg0: i32) -> (i32, i32) {
    %c0_i32 = arith.constant 0 : i32
    %c0_i32_0 = arith.constant 0 : i32
    %c0_i32_1 = arith.constant 0 : i32
    return %c0_i32, %c0_i32_0 : i32, i32
  }
  func.func @transform_5(%arg0: i32) -> (i32, i32) {
    %c0_i32 = arith.constant 0 : i32
    %c0_i32_0 = arith.constant 0 : i32
    %c0_i32_1 = arith.constant 0 : i32
    return %c0_i32, %c0_i32_0 : i32, i32
  }
  func.func @transform_6(%arg0: i32) -> (i32, i32) {
    %c0_i32 = arith.constant 0 : i32
    %c0_i32_0 = arith.constant 0 : i32
    %c0_i32_1 = arith.constant 0 : i32
    return %c0_i32, %c0_i32_0 : i32, i32
  }
  func.func @transform_7(%arg0: i32) -> (i32, i32) {
    %c0_i32 = arith.constant 0 : i32
    %c0_i32_0 = arith.constant 0 : i32
    %c0_i32_1 = arith.constant 0 : i32
    return %c0_i32, %c0_i32_0 : i32, i32
  }
  func.func @transform_8(%arg0: i32) -> (i32, i32) {
    %c0_i32 = arith.constant 0 : i32
    %c0_i32_0 = arith.constant 0 : i32
    %c0_i32_1 = arith.constant 0 : i32
    return %c0_i32, %c0_i32_0 : i32, i32
  }
  func.func @transform_9(%arg0: i32) -> (i32, i32) {
    %c0_i32 = arith.constant 0 : i32
    %c0_i32_0 = arith.constant 0 : i32
    %c0_i32_1 = arith.constant 0 : i32
    return %c0_i32, %c0_i32_0 : i32, i32
  }
  func.func @transform_10(%arg0: i32) -> (i32, i32) {
    %c0_i32 = arith.constant 0 : i32
    %c0_i32_0 = arith.constant 0 : i32
    %c0_i32_1 = arith.constant 0 : i32
    return %c0_i32, %c0_i32_0 : i32, i32
  }
  func.func @transform_11(%arg0: i32) -> (i32, i32) {
    %c0_i32 = arith.constant 0 : i32
    %c0_i32_0 = arith.constant 0 : i32
    %c0_i32_1 = arith.constant 0 : i32
    return %c0_i32, %c0_i32_0 : i32, i32
  }
  func.func @transform_12(%arg0: i32) -> (i32, i32) {
    %c0_i32 = arith.constant 0 : i32
    %c0_i32_0 = arith.constant 0 : i32
    %c0_i32_1 = arith.constant 0 : i32
    return %c0_i32, %c0_i32_0 : i32, i32
  }
  func.func @transform_13(%arg0: i32) -> (i32, i32, i32) {
    %c0_i32 = arith.constant 0 : i32
    %c0_i32_0 = arith.constant 0 : i32
    %c0_i32_1 = arith.constant 0 : i32
    return %arg0, %c0_i32, %c0_i32_0 : i32, i32, i32
  }
}

</mosaic_0001>

<bundles_post_ra>
// kernel: tpu_custom_call.1
= control target key start
LH: loop header
LB: loop body
LE: loop exit
PB: predicated region body
PF: predicated region fallthrough
CT: control target
= control target key end

     0   :  { %s4812_s25 = smov 0   ;;  %s8030_s0 = inlined_call_operand.vmem [shape: f32[2,60,60], index: 0, kind: input, shape index: {}]   ;;  %s8031_s1 = inlined_call_operand.vmem [shape: f32[300,336], index: 1, kind: input, shape index: {}]   ;;  %s8032_s2 = inlined_call_operand.vmem [shape: f32[1,336], index: 2, kind: input, shape index: {}]   ;;  %s8033_s3 = inlined_call_operand.vmem [shape: f32[840,384], index: 3, kind: input, shape index: {}]   ;;  %s8034_s4 = inlined_call_operand.vmem [shape: f32[1,384], index: 4, kind: input, shape index: {}]   ;;  %s8035_s5 = inlined_call_operand.vmem [shape: f32[28,56], index: 5, kind: input, shape index: {}]   ;;  %s8036_s6 = inlined_call_operand.vmem [shape: f32[28,56], index: 6, kind: input, shape index: {}]   ;;  %s8037_s7 = inlined_call_operand.vmem [shape: f32[336,168], index: 7, kind: input, shape index: {}]   ;;  %s8038_s8 = inlined_call_operand.vmem [shape: f32[336,168], index: 8, kind: input, shape index: {}]   ;;  %s8039_s9 = inlined_call_operand.vmem [shape: f32[12,24], index: 9, kind: input, shape index: {}]   ;;  %s8040_s10 = inlined_call_operand.vmem [shape: f32[12,24], index: 10, kind: input, shape index: {}]   ;;  %s8041_s11 = inlined_call_operand.vmem [shape: f32[384,192], index: 11, kind: input, shape index: {}]   ;;  %s8042_s12 = inlined_call_operand.vmem [shape: f32[384,192], index: 12, kind: input, shape index: {}]   ;;  %s8043_s13 = inlined_call_operand.vmem [shape: f32[2,12,192], index: 13, kind: output, shape index: {}]  }
   0x1 LB: > { %s4219_s26 = sadd.s32 4294967295, %s4731_s25   ;;  %p4223_p0 = scmp.ge.s32.totalorder %s4731_s25, 1  ;;  %s4731_s25 = sphi %s4812_s25, %s23_s25  }
   0x2   : > { %p387_p1 = scmp.lt.s32.totalorder %s4731_s25, 3 }
   0x4   : > { %p388_p2 = pnand %p4223_p0, %p387_p1 }
   0x5   : > { %p431_p3 = scmp.lt.s32.totalorder (!%p388_p2), %s4219_s26, 1  ;;  %s4734_s19 = smov (!%p388_p2), 112  }
   0x6   : > { %391 = sbr.rel (%p388_p2) target bundleno = 1833 (0x729), region = 72  ;;  %s4735_s22 = smov (!%p388_p2), 120  }
   0x7   : > { %s4737_s29 = smov (!%p388_p2), 52   ;;  %s4739_s30 = smov (!%p388_p2), 80  }
   0x8   : > { %s4740_s14 = smov (!%p388_p2), 40  }
   0xb   : > { %v683_v0 = vld [vmem:[%s8031_s1 + $0x170] sm:$0xff]  ;;  %v682_v1 = vld [vmem:[%s8031_s1 + $0x168] sm:$0xff]  ;;  %v680_v2 = vld [vmem:[%s8031_s1 + $0x158] sm:$0xff]  ;;  %s8045_s26 = smov (!%p431_p3, %s4219_s26), 1  ;;  %v4733_v4 = vmov 0.0   ;;  %vm568_vm0 = vcmask 1043456  }
   0xc   : > { %792 = vmatprep.subr.mxu0 %v683_v0  ;;  %v679_v3 = vld [vmem:[%s8031_s1 + $0x150] sm:$0xff]  ;;  %963 = vmatprep.mubr.f32.mxu1 %v4733_v4  ;;  %v677_v5 = vld [vmem:[%s8031_s1 + $0x140] sm:$0xff]  ;;  %s4285_s20 = sshll.u32 %s8045_s26, 6  ;;  %v676_v6 = vld [vmem:[%s8031_s1 + $0x138] sm:$0xff]  ;;  %vm494_vm1 = vcmask 1045504   ;;  %vm531_vm2 = vcmask 1044480  }
   0xd   : > { %793 = vmatpush1.msra.mxu0 %v682_v1  ;;  %s4845_s27 = scalar_lea.vmem %s8030_s0, %s4285_s20  ;;  %v674_v7 = vld [vmem:[%s8031_s1 + $0x128] sm:$0xff]  ;;  %v673_v8 = vld [vmem:[%s8031_s1 + $0x120] sm:$0xff]  ;;  %v671_v21 = vld [vmem:[%s8031_s1 + $0x110] sm:$0xff]  ;;  %vm457_vm3 = vcmask 1046528   ;;  %s4736_s20 = smov 60   ;;  %vm768_vm4 = vcmask 359424  }
   0xe   : > { %794 = vmatprep.subr.mxu0 %v680_v2  ;;  %v4854_v9 = vld [vmem:[%s4845_s27 + $0x10] sm:$0xff]  ;;  %v4857_v10 = vld [vmem:[%s4845_s27 + $0x18] sm:$0xff]  ;;  %v4860_v11 = vld [vmem:[%s4845_s27] sm:$0xff]  ;;  %vm605_vm5 = vcmask 490496   ;;  %vm621_vm6 = vcmask 424960   ;;  %vm613_vm7 = vcmask 982016  }
   0xf   : > { %795 = vmatpush1.msra.mxu0 %v679_v3  ;;  %v572_v12 = vrot.slane %v4854_v9, 4  ;;  %v574_v13 = vrot.slane %v4857_v10, 4  ;;  %v4865_v14 = vld [vmem:[%s4845_s27 + $0x8] sm:$0xff]  ;;  %v569_v15 = vrot.slane %v4860_v11, 4  ;;  %v4869_v16 = vld [vmem:[%s4845_s27 + $0x20] sm:$0xff]  ;;  %v4877_v20 = vld [vmem:[%s4845_s27 + $0x30] sm:$0xff] }
  0x10   : > { %796 = vmatprep.subr.mxu0 %v677_v5  ;;  %v4872_v17 = vld [vmem:[%s4845_s27 + $0x28] sm:$0xff]  ;;  %v570_v18 = vrot.slane %v4865_v14, 4  ;;  %v576_v19 = vrot.slane %v4869_v16, 4  ;;  %v580_v24 = vrot.slane %v4877_v20, 4  ;;  %v668_v27 = vld [vmem:[%s8031_s1 + $0xf8] sm:$0xff]  ;;  %v495_v29 = vrot.slane %v4860_v11, 2 }
  0x11   : > { %797 = vmatpush1.msra.mxu0 %v676_v6  ;;  %v575_v22 = vsel %vm568_vm0, %v572_v12, %v574_v13  ;;  %v578_v23 = vrot.slane %v4872_v17, 4  ;;  %v670_v25 = vld [vmem:[%s8031_s1 + $0x108] sm:$0xff]  ;;  %v496_v30 = vrot.slane %v4865_v14, 2  ;;  %v498_v31 = vrot.slane %v4854_v9, 2  ;;  %v667_v32 = vld [vmem:[%s8031_s1 + $0xf0] sm:$0xff]  ;;  %v665_v34 = vld [vmem:[%s8031_s1 + $0xe0] sm:$0xff] }
  0x12   : > { %798 = vmatprep.subr.mxu0 %v674_v7  ;;  %588 = vrot.lane.b32.xlu1 %v575_v22, %s4734_s19  ;;  %v571_v26 = vsel %vm568_vm0, %v569_v15, %v570_v18  ;;  %v577_v28 = vsel %vm568_vm0, %v574_v13, %v576_v19  ;;  %v573_v33 = vsel %vm568_vm0, %v570_v18, %v572_v12  ;;  %v4907_v36 = vld [vmem:[%s4845_s27 + $0x38] sm:$0xf]  ;;  %v662_v38 = vld [vmem:[%s8031_s1 + $0xc8] sm:$0xff]  ;;  %v532_v39 = vrot.slane %v4860_v11, 3  ;;  %v749_v43 = vld [vmem:[%s8031_s1 + $0x380] sm:$0xf] }
  0x13   : > { %799 = vmatpush1.msra.mxu0 %v673_v8  ;;  %584 = vrot.lane.b32.xlu0 %v571_v26, %s4734_s19  ;;  %v581_v35 = vsel %vm568_vm0, %v578_v23, %v580_v24  ;;  %v664_v37 = vld [vmem:[%s8031_s1 + $0xd8] sm:$0xff]  ;;  %v533_v40 = vrot.slane %v4865_v14, 3  ;;  %v535_v41 = vrot.slane %v4854_v9, 3  ;;  %v458_v42 = vrot.slane %v4860_v11, 1  ;;  %v661_v48 = vld [vmem:[%s8031_s1 + $0xc0] sm:$0xff]  ;;  %v659_v52 = vld [vmem:[%s8031_s1 + $0xb0] sm:$0xff] }
  0x14   : > { %800 = vmatprep.subr.mxu0 %v671_v21  ;;  %v497_v44 = vsel %vm494_vm1, %v495_v29, %v496_v30  ;;  %v499_v45 = vsel %vm494_vm1, %v496_v30, %v498_v31  ;;  %v459_v46 = vrot.slane %v4865_v14, 1  ;;  %v461_v47 = vrot.slane %v4854_v9, 1  ;;  %v748_v49 = vld [vmem:[%s8031_s1 + $0x378] sm:$0xf]  ;;  %4228 = vmatprep.subr.msk.mxu1 %vm568_vm0, %v749_v43  ;;  %v746_v53 = vld [vmem:[%s8031_s1 + $0x368] sm:$0xff]  ;;  %v745_v58 = vld [vmem:[%s8031_s1 + $0x360] sm:$0xff] }
  0x15   : > { %801 = vmatpush1.msra.mxu0 %v670_v25  ;;  %v579_v50 = vsel %vm568_vm0, %v576_v19, %v578_v23  ;;  %v582_v51 = vrot.slane %v4907_v36, 4  ;;  %4229 = vmatpush1.msk.msra.mxu1 %vm568_vm0, %v748_v49  ;;  %v4655_v54 = vpack.i.bf16 %v499_v45, %v497_v44  ;;  %v534_v55 = vsel %vm531_vm2, %v532_v39, %v533_v40  ;;  %v658_v57 = vld [vmem:[%s8031_s1 + $0xa8] sm:$0xff]  ;;  %v656_v63 = vld [vmem:[%s8031_s1 + $0x98] sm:$0xff]  ;;  %v655_v3 = vld [vmem:[%s8031_s1 + $0x90] sm:$0xff] }
  0x16   : > { %802 = vmatprep.subr.mxu0 %v668_v27  ;;  %590 = vrot.lane.b32.xlu1 %v577_v28, %s4734_s19  ;;  %v536_v56 = vsel %vm531_vm2, %v533_v40, %v535_v41  ;;  %v460_v59 = vsel %vm457_vm3, %v458_v42, %v459_v46  ;;  %v462_v60 = vsel %vm457_vm3, %v459_v46, %v461_v47  ;;  %v537_v61 = vrot.slane %v4857_v10, 3  ;;  %v743_v5 = vld [vmem:[%s8031_s1 + $0x350] sm:$0xff]  ;;  %v653_v8 = vld [vmem:[%s8031_s1 + $0x80] sm:$0xff]  ;;  %v742_v12 = vld [vmem:[%s8031_s1 + $0x348] sm:$0xff] }
  0x17   : > { %803 = vmatpush1.msra.mxu0 %v667_v32  ;;  %586 = vrot.lane.b32.xlu0 %v573_v33, %s4734_s19  ;;  %v539_v62 = vrot.slane %v4869_v16, 3  ;;  %v583_v0 = vsel %vm568_vm0, %v580_v24, %v582_v51  ;;  %v500_v1 = vrot.slane %v4857_v10, 2  ;;  %v502_v2 = vrot.slane %v4869_v16, 2  ;;  %v652_v21 = vld [vmem:[%s8031_s1 + $0x78] sm:$0xff]  ;;  %v650_v26 = vld [vmem:[%s8031_s1 + $0x68] sm:$0xff]  ;;  %v649_v27 = vld [vmem:[%s8031_s1 + $0x60] sm:$0xff] }
  0x18   : > { %804 = vmatprep.subr.mxu0 %v665_v34  ;;  %921 = vmatprep.subr.mxu1 %v746_v53  ;;  %v4660_v6 = vpack.i.bf16 %v536_v56, %v534_v55  ;;  %v4665_v7 = vpack.i.bf16 %v462_v60, %v460_v59  ;;  %v538_v13 = vsel %vm531_vm2, %v535_v41, %v537_v61  ;;  %v504_v18 = vrot.slane %v4872_v17, 2  ;;  %v740_v28 = vld [vmem:[%s8031_s1 + $0x338] sm:$0xff]  ;;  %v647_v30 = vld [vmem:[%s8031_s1 + $0x50] sm:$0xff]  ;;  %v737_v43 = vld [vmem:[%s8031_s1 + $0x320] sm:$0xff] }
  0x19   : > { %805 = vmatpush1.msra.mxu0 %v664_v37  ;;  %922 = vmatpush1.msra.mxu1 %v745_v58  ;;  %v540_v15 = vsel %vm531_vm2, %v537_v61, %v539_v62  ;;  %v506_v19 = vrot.slane %v4877_v20, 2  ;;  %v501_v22 = vsel %vm494_vm1, %v498_v31, %v500_v1  ;;  %v503_v23 = vsel %vm494_vm1, %v500_v1, %v502_v2  ;;  %v739_v31 = vld [vmem:[%s8031_s1 + $0x330] sm:$0xff]  ;;  %v644_v41 = vld [vmem:[%s8031_s1 + $0x38] sm:$0xff]  ;;  %v641_v45 = vld [vmem:[%s8031_s1 + $0x20] sm:$0xff] }
  0x1a   : > { %806 = vmatprep.subr.mxu0 %v662_v38  ;;  %594 = vrot.lane.b32.xlu1 %v581_v35, %s4734_s19  ;;  %v463_v24 = vrot.slane %v4857_v10, 1  ;;  %v465_v25 = vrot.slane %v4869_v16, 1  ;;  %v4675_v29 = vpack.i.bf16 %v540_v15, %v538_v13  ;;  %v4670_v32 = vpack.i.bf16 %v503_v23, %v501_v22  ;;  %v646_v35 = vld [vmem:[%s8031_s1 + $0x48] sm:$0xff]  ;;  %v643_v42 = vld [vmem:[%s8031_s1 + $0x30] sm:$0xff]  ;;  %v736_v46 = vld [vmem:[%s8031_s1 + $0x318] sm:$0xff] }
  0x1b   : > { %807 = vmatpush1.msra.mxu0 %v661_v48  ;;  %592 = vrot.lane.b32.xlu0 %v579_v50, %s4734_s19  ;;  %v505_v33 = vsel %vm494_vm1, %v502_v2, %v504_v18  ;;  %v507_v34 = vsel %vm494_vm1, %v504_v18, %v506_v19  ;;  %v541_v39 = vrot.slane %v4872_v17, 3  ;;  %v543_v40 = vrot.slane %v4877_v20, 3  ;;  %v640_v49 = vld [vmem:[%s8031_s1 + $0x18] sm:$0xff]  ;;  %v637_v53 = vld [vmem:[%s8031_s1] sm:$0xff]  ;;  %v731_v55 = vld [vmem:[%s8031_s1 + $0x2f0] sm:$0xff] }
  0x1c   : > { %808 = vmatprep.subr.mxu0 %v659_v52  ;;  %923 = vmatprep.subr.mxu1 %v743_v5  ;;  %v464_v37 = vsel %vm457_vm3, %v461_v47, %v463_v24  ;;  %v466_v38 = vsel %vm457_vm3, %v463_v24, %v465_v25  ;;  %v4685_v44 = vpack.i.bf16 %v507_v34, %v505_v33  ;;  %v467_v48 = vrot.slane %v4872_v17, 1  ;;  %v638_v52 = vld [vmem:[%s8031_s1 + $0x8] sm:$0xff]  ;;  %v733_v56 = vld [vmem:[%s8031_s1 + $0x300] sm:$0xff]  ;;  %v724_v5 = vld [vmem:[%s8031_s1 + $0x2b8] sm:$0xff] }
  0x1d   : > { %809 = vmatpush1.msra.mxu0 %v658_v57  ;;  %924 = vmatpush1.msra.mxu1 %v742_v12  ;;  %v4680_v47 = vpack.i.bf16 %v466_v38, %v464_v37  ;;  %v542_v50 = vsel %vm531_vm2, %v539_v62, %v541_v39  ;;  %v544_v51 = vsel %vm531_vm2, %v541_v39, %v543_v40  ;;  %v508_v59 = vrot.slane %v4907_v36, 2  ;;  %v730_v60 = vld [vmem:[%s8031_s1 + $0x2e8] sm:$0xff]  ;;  %v728_v62 = vld [vmem:[%s8031_s1 + $0x2d8] sm:$0xff]  ;;  %v725_v1 = vld [vmem:[%s8031_s1 + $0x2c0] sm:$0xff] }
  0x1e   : > { %4656 = vrot.lane.b32.xlu1 %v4655_v54, %s4735_s22  ;;  %810 = vmatprep.subr.mxu0 %v656_v63  ;;  %v734_v54 = vld [vmem:[%s8031_s1 + $0x308] sm:$0xff]  ;;  %v4690_v57 = vpack.i.bf16 %v544_v51, %v542_v50  ;;  %v468_v58 = vsel %vm457_vm3, %v465_v25, %v467_v48  ;;  %v469_v61 = vrot.slane %v4877_v20, 1  ;;  %v727_v63 = vld [vmem:[%s8031_s1 + $0x2d0] sm:$0xff]  ;;  %v721_v12 = vld [vmem:[%s8031_s1 + $0x2a0] sm:$0xff]  ;;  %vm629_vm8 = vcmask 916480  }
  0x1f   : > { %596 = vrot.lane.b32.xlu0 %v583_v0, %s4734_s19  ;;  %811 = vmatpush1.msra.mxu0 %v655_v3  ;;  %v732_v0 = vld [vmem:[%s8031_s1 + $0x2f8] sm:$0xff]  ;;  %v509_v2 = vsel %vm494_vm1, %v506_v19, %v508_v59  ;;  %v471_v3 = vrot.slane %v4907_v36, 1  ;;  %v719_v13 = vld [vmem:[%s8031_s1 + $0x290] sm:$0xff]  ;;  %v718_v15 = vld [vmem:[%s8031_s1 + $0x288] sm:$0xff]  ;;  %vm4738_vm9 = vmmov 0   ;;  %vm1231_vm10 = vcmask 457728  }
  0x20   : > { %812 = vmatprep.subr.mxu0 %v653_v8  ;;  %925 = vmatprep.subr.mxu1 %v740_v28  ;;  %v722_v8 = vld [vmem:[%s8031_s1 + $0x2a8] sm:$0xff]  ;;  %v716_v19 = vld [vmem:[%s8031_s1 + $0x278] sm:$0xff]  ;;  %v713_v22 = vld [vmem:[%s8031_s1 + $0x260] sm:$0xff]  ;;  %vm1704_vm11 = vcmask 654336   ;;  %s4741_s19 = smov 32   ;;  %vm2199_vm12 = vcmask 326656  }
  0x21   : > { %813 = vmatpush1.msra.mxu0 %v652_v21  ;;  %926 = vmatpush1.msra.mxu1 %v739_v31  ;;  %v715_v21 = vld [vmem:[%s8031_s1 + $0x270] sm:$0xff]  ;;  %v712_v23 = vld [vmem:[%s8031_s1 + $0x258] sm:$0xff]  ;;  %v710_v24 = vld [vmem:[%s8031_s1 + $0x248] sm:$0xff]  ;;  %vm2308_vm13 = vcmask 261120   ;;  %vm2659_vm14 = vcmask 588800   ;;  %vm3329_vm15 = vcmask 195584  }
  0x22   : > { %4666 = vrot.lane.b32.xlu1 %v4665_v7, %s4736_s20  ;;  %814 = vmatprep.subr.mxu0 %v650_v26  ;;  %v545_v7 = vrot.slane %v4907_v36, 3  ;;  %v472_v36 = vsel %vm457_vm3, %v469_v61, %v471_v3  ;;  %v709_v25 = vld [vmem:[%s8031_s1 + $0x240] sm:$0xff]  ;;  %v707_v26 = vld [vmem:[%s8031_s1 + $0x230] sm:$0xff]  ;;  %v704_v28 = vld [vmem:[%s8031_s1 + $0x218] sm:$0xff] }
  0x23   : > { %4661 = vrot.lane.b32.xlu0 %v4660_v6, %s4737_s29  ;;  %815 = vmatpush1.msra.mxu0 %v649_v27  ;;  %v470_v6 = vsel %vm457_vm3, %v467_v48, %v469_v61  ;;  %v706_v27 = vld [vmem:[%s8031_s1 + $0x228] sm:$0xff]  ;;  %v700_v31 = vld [vmem:[%s8031_s1 + $0x1f8] sm:$0xff]  ;;  %v697_v33 = vld [vmem:[%s8031_s1 + $0x1e0] sm:$0xff] }
  0x24   : > { %816 = vmatprep.subr.mxu0 %v647_v30  ;;  %927 = vmatprep.subr.mxu1 %v737_v43  ;;  %v546_v18 = vsel %vm531_vm2, %v543_v40, %v545_v7  ;;  %v701_v30 = vld [vmem:[%s8031_s1 + $0x200] sm:$0xff]  ;;  %v695_v34 = vld [vmem:[%s8031_s1 + $0x1d0] sm:$0xff]  ;;  %v692_v37 = vld [vmem:[%s8031_s1 + $0x1b8] sm:$0xff] }
  0x25   : > { %817 = vmatpush1.msra.mxu0 %v646_v35  ;;  %928 = vmatpush1.msra.mxu1 %v736_v46  ;;  %v694_v35 = vld [vmem:[%s8031_s1 + $0x1c8] sm:$0xff]  ;;  %v691_v38 = vld [vmem:[%s8031_s1 + $0x1b0] sm:$0xff]  ;;  %v689_v39 = vld [vmem:[%s8031_s1 + $0x1a0] sm:$0xff] }
  0x26   : > { %4676 = vrot.lane.b32.xlu1 %v4675_v29, %s4737_s29  ;;  %818 = vmatprep.subr.mxu0 %v644_v41  ;;  %v703_v29 = vld [vmem:[%s8031_s1 + $0x210] sm:$0xff]  ;;  %v688_v40 = vld [vmem:[%s8031_s1 + $0x198] sm:$0xff]  ;;  %v686_v41 = vld [vmem:[%s8031_s1 + $0x188] sm:$0xff] }
  0x27   : > { %4671 = vrot.lane.b32.xlu0 %v4670_v32, %s4735_s22  ;;  %819 = vmatpush1.msra.mxu0 %v643_v42  ;;  %v698_v32 = vld [vmem:[%s8031_s1 + $0x1e8] sm:$0xff]  ;;  %v685_v42 = vld [vmem:[%s8031_s1 + $0x180] sm:$0xff]  ;;  %v660_v7 = vld [vmem:[%s8031_s1 + $0xb8] sm:$0xff] }
  0x28   : > { %820 = vmatprep.subr.mxu0 %v641_v45  ;;  %929 = vmatprep.subr.mxu1 %v734_v54  ;;  %v729_v46 = vld [vmem:[%s8031_s1 + $0x2e0] sm:$0xff]  ;;  %v726_v48 = vld [vmem:[%s8031_s1 + $0x2c8] sm:$0xff]  ;;  %v720_v54 = vld [vmem:[%s8031_s1 + $0x298] sm:$0xff] }
  0x29   : > { %821 = vmatpush1.msra.mxu0 %v640_v49  ;;  %930 = vmatpush1.msra.mxu1 %v733_v56  ;;  %v678_v50 = vld [vmem:[%s8031_s1 + $0x148] sm:$0xff]  ;;  %v672_v56 = vld [vmem:[%s8031_s1 + $0x118] sm:$0xff]  ;;  %v669_v59 = vld [vmem:[%s8031_s1 + $0x100] sm:$0xff] }
  0x2a   : > { %4686 = vrot.lane.b32.xlu1 %v4685_v44, %s4735_s22  ;;  %822 = vmatprep.subr.mxu0 %v638_v52  ;;  %v684_v44 = vld [vmem:[%s8031_s1 + $0x178] sm:$0xff]  ;;  %v723_v52 = vld [vmem:[%s8031_s1 + $0x2b0] sm:$0xff] }
  0x2b   : > { %4681 = vrot.lane.b32.xlu0 %v4680_v47, %s4736_s20  ;;  %823 = vmatpush1.msra.mxu0 %v637_v53  ;;  %v681_v47 = vld [vmem:[%s8031_s1 + $0x160] sm:$0xff]  ;;  %v675_v53 = vld [vmem:[%s8031_s1 + $0x130] sm:$0xff] }
  0x2c   : > { %824 = vmatprep.subr.mxu0 %v731_v55  ;;  %4287 = vmatprep.subr.mxu1 %v732_v0  ;;  %v711_v0 = vld [vmem:[%s8031_s1 + $0x250] sm:$0xff] }
  0x2d   : > { %825 = vmatpush2.msra.mxu0 %v730_v60  ;;  %v714_v60 = vld [vmem:[%s8031_s1 + $0x268] sm:$0xff] }
  0x2e   : > { %481 = vrot.lane.b32.xlu1 %v468_v58, %s4736_s20  ;;  %826 = vmatprep.subr.mxu0 %v728_v62  ;;  %v717_v58 = vld [vmem:[%s8031_s1 + $0x280] sm:$0xff]  ;;  %v666_v62 = vld [vmem:[%s8031_s1 + $0xe8] sm:$0xff] }
  0x2f   : > { %4691 = vrot.lane.b32.xlu0 %v4690_v57, %s4737_s29  ;;  %827 = vmatpush2.msra.mxu0 %v727_v63 }
  0x30   : > { %828 = vmatprep.subr.mxu0 %v725_v1  ;;  %v663_v1 = vld [vmem:[%s8031_s1 + $0xd0] sm:$0xff] }
  0x31   : > { %829 = vmatpush2.msra.mxu0 %v724_v5 }
  0x32   : > { %522 = vrot.lane.b32.xlu1 %v509_v2, %s4735_s22  ;;  %830 = vmatprep.subr.mxu0 %v722_v8  ;;  %v708_v2 = vld [vmem:[%s8031_s1 + $0x238] sm:$0xff] }
  0x33   : > { %483 = vrot.lane.b32.xlu0 %v470_v6, %s4736_s20  ;;  %831 = vmatpush2.msra.mxu0 %v721_v12 }
  0x34   : > { %832 = vmatprep.subr.mxu0 %v719_v13  ;;  %v705_v13 = vld [vmem:[%s8031_s1 + $0x220] sm:$0xff] }
  0x35   : > { %833 = vmatpush2.msra.mxu0 %v718_v15 }
  0x36   : > { %485 = vrot.lane.b32.xlu1 %v472_v36, %s4736_s20  ;;  %834 = vmatprep.subr.mxu0 %v716_v19  ;;  %v657_v19 = vld [vmem:[%s8031_s1 + $0xa0] sm:$0xff] }
  0x37   : > { %559 = vrot.lane.b32.xlu0 %v546_v18, %s4737_s29  ;;  %835 = vmatpush2.msra.mxu0 %v715_v21  ;;  %v702_v21 = vld [vmem:[%s8031_s1 + $0x208] sm:$0xff] }
  0x38   : > { %836 = vmatprep.subr.mxu0 %v713_v22 }
  0x39   : > { %837 = vmatpush2.msra.mxu0 %v712_v23 }
  0x3a   : > { %838 = vmatprep.subr.mxu0 %v710_v24 }
  0x3b   : > { %839 = vmatpush2.msra.mxu0 %v709_v25 }
  0x3c   : > { %840 = vmatprep.subr.mxu0 %v707_v26 }
  0x3d   : > { %841 = vmatpush2.msra.mxu0 %v706_v27 }
  0x3e   : > { %842 = vmatprep.subr.mxu0 %v704_v28 }
  0x3f   : > { %843 = vmatpush2.msra.mxu0 %v703_v29  ;;  %v654_v29 = vld [vmem:[%s8031_s1 + $0x88] sm:$0xff] }
  0x40   : > { %844 = vmatprep.subr.mxu0 %v701_v30 }
  0x41   : > { %845 = vmatpush2.msra.mxu0 %v700_v31  ;;  %v699_v31 = vld [vmem:[%s8031_s1 + $0x1f0] sm:$0xff] }
  0x42   : > { %846 = vmatprep.subr.mxu0 %v698_v32 }
  0x43   : > { %847 = vmatpush2.msra.mxu0 %v697_v33 }
  0x44   : > { %848 = vmatprep.subr.mxu0 %v695_v34  ;;  %v651_v34 = vld [vmem:[%s8031_s1 + $0x70] sm:$0xff] }
  0x45   : > { %849 = vmatpush2.msra.mxu0 %v694_v35  ;;  %v696_v35 = vld [vmem:[%s8031_s1 + $0x1d8] sm:$0xff] }
  0x46   : > { %850 = vmatprep.subr.mxu0 %v692_v37 }
  0x47   : > { %851 = vmatpush2.msra.mxu0 %v691_v38 }
  0x48   : > { %852 = vmatprep.subr.mxu0 %v689_v39 }
  0x49   : > { %853 = vmatpush2.msra.mxu0 %v688_v40  ;;  %v648_v40 = vld [vmem:[%s8031_s1 + $0x58] sm:$0xff] }
  0x4a   : > { %854 = vmatprep.subr.mxu0 %v686_v41 }
  0x4b   : > { %855 = vmatpush2.msra.mxu0 %v685_v42 }
  0x84   : > { %v5186_v43 = vpop.permute.xlu1 %588 }
  0x85   : > { %v5191_v45 = vpop.permute.xlu0 %584 }
  0x86   : > { %4230 = vmatmul.mubr.msk.f32.vlgmr.msra.gmra.mxu1 %vm768_vm4, %v5191_v45 }
  0x87   : > { %4288 = vmatpush3.msra.mxu1 %v684_v44  ;;  %969 = vmatprep.mubr.f32.mxu1 %v4733_v4 }
  0x88   : > { %4289 = vmatprep.subr.mxu1 %v729_v46  ;;  %v5205_v49 = vpop.permute.xlu1 %590  ;;  %v693_v46 = vld [vmem:[%s8031_s1 + $0x1c0] sm:$0xff] }
  0x89   : > { %4290 = vmatpush3.msra.mxu1 %v681_v47  ;;  %v5210_v51 = vpop.permute.xlu0 %586 }
  0x8a   : > { %4291 = vmatprep.subr.mxu1 %v726_v48  ;;  %4231 = vmatmul.mubr.msk.f32.gmra.mxu1 %vm768_vm4, %v5210_v51  ;;  %v645_v48 = vld [vmem:[%s8031_s1 + $0x40] sm:$0xff] }
  0x8b   : > { %4292 = vmatpush3.msra.mxu1 %v678_v50  ;;  %975 = vmatprep.mubr.f32.mxu1 %v4733_v4  ;;  %v690_v50 = vld [vmem:[%s8031_s1 + $0x1a8] sm:$0xff] }
  0x8c   : > { %4293 = vmatprep.subr.mxu1 %v723_v52  ;;  %v5224_v55 = vpop.permute.xlu1 %594 }
  0x8d   : > { %4294 = vmatpush3.msra.mxu1 %v675_v53  ;;  %v5229_v57 = vpop.permute.xlu0 %592 }
  0x8e   : > { %4295 = vmatprep.subr.mxu1 %v720_v54  ;;  %4232 = vmatmul.mubr.msk.f32.gmra.mxu1 %vm768_vm4, %v5186_v43 }
  0x8f   : > { %4296 = vmatpush3.msra.mxu1 %v672_v56  ;;  %981 = vmatprep.mubr.f32.mxu1 %v4733_v4 }
  0x90   : > { %4297 = vmatprep.subr.mxu1 %v717_v58  ;;  %v5243_v61 = vpop.permute.xlu1 %4656  ;;  %v642_v58 = vld [vmem:[%s8031_s1 + $0x28] sm:$0xff] }
  0x91   : > { %4298 = vmatpush3.msra.mxu1 %v669_v59  ;;  %v5248_v63 = vpop.permute.xlu0 %596  ;;  %v4659_v3 = vunpack.i.h.bf16 %v5243_v61  ;;  %v4658_v5 = vunpack.i.l.bf16 %v5243_v61 }
  0x92   : > { %4299 = vmatprep.subr.mxu1 %v714_v60  ;;  %4233 = vmatmul.mubr.msk.f32.gmra.mxu1 %vm768_vm4, %v5205_v49 }
  0x93   : > { %4300 = vmatpush3.msra.mxu1 %v666_v62  ;;  %987 = vmatprep.mubr.f32.mxu1 %v4733_v4  ;;  %v687_v62 = vld [vmem:[%s8031_s1 + $0x190] sm:$0xff] }
  0x94   : > { %4301 = vmatprep.subr.mxu1 %v711_v0  ;;  %v4667_v6 = vpop.permute.xlu1 %4666 }
  0x95   : > { %4302 = vmatpush3.msra.mxu1 %v663_v1  ;;  %v4662_v8 = vpop.permute.xlu0 %4661  ;;  %v4668_v12 = vunpack.i.l.bf16 %v4667_v6  ;;  %v4669_v18 = vunpack.i.h.bf16 %v4667_v6  ;;  %v639_v1 = vld [vmem:[%s8031_s1 + $0x10] sm:$0xff] }
  0x96   : > { %4303 = vmatprep.subr.mxu1 %v708_v2  ;;  %v4664_v36 = vunpack.i.h.bf16 %v4662_v8  ;;  %v4663_v15 = vunpack.i.l.bf16 %v4662_v8  ;;  %4234 = vmatmul.mubr.msk.f32.gmra.mxu1 %vm768_vm4, %v5229_v57 }
  0x97   : > { %4304 = vmatpush3.msra.mxu1 %v660_v7  ;;  %993 = vmatprep.mubr.f32.mxu1 %v4733_v4  ;;  %v606_v22 = vsel %vm605_vm5, %v4860_v11, %v4668_v12  ;;  %v607_v32 = vsel %vm605_vm5, %v4865_v14, %v4669_v18  ;;  %v750_v12 = vld [vmem:[%s8031_s1 + $0x388] sm:$0xf] }
  0x98   : > { %4305 = vmatprep.subr.mxu1 %v705_v13  ;;  %v4677_v23 = vpop.permute.xlu1 %4676  ;;  %v622_v24 = vsel %vm621_vm6, %v4658_v5, %v4663_v15  ;;  %v5283_v25 = vsel %vm613_vm7, %v606_v22, %v4658_v5  ;;  %v623_v26 = vsel %vm621_vm6, %v4659_v3, %v4664_v36  ;;  %v615_v41 = vsel %vm613_vm7, %v607_v32, %v4659_v3 }
  0x99   : > { %4306 = vmatpush3.msra.mxu1 %v657_v19  ;;  %v4672_v27 = vpop.permute.xlu0 %4671  ;;  %v630_v28 = vsel %vm629_vm8, %v622_v24, %v5191_v45  ;;  %v4678_v30 = vunpack.i.l.bf16 %v4677_v23  ;;  %v631_v33 = vsel %vm629_vm8, %v623_v26, %v5210_v51  ;;  %v4679_v38 = vunpack.i.h.bf16 %v4677_v23  ;;  %v744_v26 = vld [vmem:[%s8031_s1 + $0x358] sm:$0xff] }
  0x9a   : > { %4307 = vmatprep.subr.mxu1 %v702_v21  ;;  %v4673_v11 = vunpack.i.l.bf16 %v4672_v27  ;;  %856 = vmatprep.mubr.f32.mxu0 %v630_v28  ;;  %v4674_v14 = vunpack.i.h.bf16 %v4672_v27  ;;  %v747_v21 = vld [vmem:[%s8031_s1 + $0x370] sm:$0xff] }
  0x9b   : > { %4235 = vmatmul.mubr.msk.f32.gmra.mxu1 %vm768_vm4, %v5224_v55  ;;  %857 = vmatmul.mubr.f32.vlgmr.msra.gmra.mxu0 %v5283_v25 }
  0x9c   : > { %4308 = vmatpush3.msra.mxu1 %v654_v29  ;;  %862 = vmatprep.mubr.f32.mxu0 %v631_v33  ;;  %v5307_v37 = vpop.permute.xlu1 %4686  ;;  %v624_v47 = vsel %vm621_vm6, %v4673_v11, %v4678_v30  ;;  %v625_v60 = vsel %vm621_vm6, %v4674_v14, %v4679_v38  ;;  %v738_v29 = vld [vmem:[%s8031_s1 + $0x328] sm:$0xff] }
  0x9d   : > { %4309 = vmatprep.subr.mxu1 %v699_v31  ;;  %999 = vmatprep.mubr.f32.mxu1 %v4733_v4  ;;  %v4682_v39 = vpop.permute.xlu0 %4681  ;;  %v632_v53 = vsel %vm629_vm8, %v624_v47, %v5186_v43  ;;  %v4688_v56 = vunpack.i.l.bf16 %v5307_v37  ;;  %v633_v2 = vsel %vm629_vm8, %v625_v60, %v5205_v49  ;;  %v4689_v5 = vunpack.i.h.bf16 %v5307_v37 }
  0x9e   : > { %4310 = vmatpush3.msra.mxu1 %v651_v34  ;;  %v4684_v42 = vunpack.i.h.bf16 %v4682_v39  ;;  %v4683_v44 = vunpack.i.l.bf16 %v4682_v39 }
  0x9f   : > { %4311 = vmatprep.subr.mxu1 %v696_v35  ;;  %4236 = vmatmul.mubr.msk.f32.gmra.mxu1 %vm768_vm4, %v5248_v63 }
  0xa0   : > { %4312 = vmatpush3.msra.mxu1 %v648_v40  ;;  %863 = vmatmul.mubr.f32.gmra.mxu0 %v615_v41  ;;  %v608_v52 = vsel %vm605_vm5, %v4854_v9, %v4683_v44  ;;  %v482_v61 = vpop.permute.xlu1 %481  ;;  %v609_v0 = vsel %vm605_vm5, %v4857_v10, %v4684_v42 }
  0xa1   : > { %4313 = vmatprep.subr.mxu1 %v693_v46  ;;  %1070 = vmatprep.mubr.f32.mxu1 %v630_v28  ;;  %v4692_v54 = vpop.permute.xlu0 %4691  ;;  %v616_v59 = vsel %vm613_vm7, %v608_v52, %v4673_v11  ;;  %v617_v7 = vsel %vm613_vm7, %v609_v0, %v4674_v14  ;;  %v610_v8 = vsel %vm605_vm5, %v4869_v16, %v482_v61  ;;  %v735_v11 = vld [vmem:[%s8031_s1 + $0x310] sm:$0xff]  ;;  %v753_v46 = vlaneseq }
  0xa2   : > { %868 = vmatprep.mubr.f32.mxu0 %v632_v53  ;;  %4314 = vmatpush3.msra.mxu1 %v645_v48  ;;  %v4693_v9 = vunpack.i.l.bf16 %v4692_v54  ;;  %v4694_v3 = vunpack.i.h.bf16 %v4692_v54  ;;  %v618_v15 = vsel %vm613_vm7, %v610_v8, %v4688_v56 }
  0xa3   : > { %4315 = vmatprep.subr.mxu1 %v690_v50 }
  0xa4   : > { %4316 = vmatpush3.msra.mxu1 %v642_v58  ;;  %869 = vmatmul.mubr.f32.gmra.mxu0 %v616_v59  ;;  %v626_v10 = vsel %vm621_vm6, %v4688_v56, %v4693_v9  ;;  %v523_v13 = vpop.permute.xlu1 %522  ;;  %v627_v18 = vsel %vm621_vm6, %v4689_v5, %v4694_v3 }
  0xa5   : > { %4317 = vmatprep.subr.mxu1 %v687_v62  ;;  %874 = vmatprep.mubr.f32.mxu0 %v633_v2  ;;  %v484_v6 = vpop.permute.xlu0 %483  ;;  %v634_v36 = vsel %vm629_vm8, %v626_v10, %v5229_v57  ;;  %v635_v23 = vsel %vm629_vm8, %v627_v18, %v5224_v55  ;;  %v5461_v62 = vld [vmem:[%s8032_s2] sm:$0x7] }
  0xa6   : > { %4318 = vmatpush3.msra.mxu1 %v639_v1  ;;  %v611_v16 = vsel %vm605_vm5, %v4872_v17, %v484_v6 }
  0xa7   : > { %1071 = vmatmul.mubr.f32.vlgmr.msra.gmra.mxu1 %v5283_v25  ;;  %4520 = vmatprep.subr.mxu1 %v4733_v4  ;;  %v619_v25 = vsel %vm613_vm7, %v611_v16, %v4689_v5 }
  0xa8   : > { %1075 = vmatprep.mubr.f32.mxu1 %v631_v33  ;;  %875 = vmatmul.mubr.f32.gmra.mxu0 %v617_v7  ;;  %v486_v22 = vpop.permute.xlu1 %485 }
  0xa9   : > { %880 = vmatprep.mubr.f32.mxu0 %v634_v36  ;;  %4521 = vmatpush3.msk.msra.mxu1 %vm568_vm0, %v750_v12  ;;  %v560_v19 = vpop.permute.xlu0 %559  ;;  %v612_v17 = vsel %vm605_vm5, %v4877_v20, %v486_v22  ;;  %v741_v20 = vld [vmem:[%s8031_s1 + $0x340] sm:$0xff] }
  0xaa   : > { %4522 = vmatprep.subr.mxu1 %v4733_v4  ;;  %v628_v24 = vsel %vm621_vm6, %v523_v13, %v560_v19  ;;  %v620_v28 = vsel %vm613_vm7, %v612_v17, %v523_v13 }
  0xab   : > { %1076 = vmatmul.mubr.f32.gmra.mxu1 %v615_v41  ;;  %v636_v27 = vsel %vm629_vm8, %v628_v24, %v5248_v63 }
  0xac   : > { %1080 = vmatprep.mubr.f32.mxu1 %v632_v53  ;;  %881 = vmatmul.mubr.f32.gmra.mxu0 %v618_v15  ;;  %v5448_v53 = vshrl.u32 %v753_v46, 7 }
  0xad   : > { %886 = vmatprep.mubr.f32.mxu0 %v635_v23  ;;  %4523 = vmatpush3.msra.mxu1 %v747_v21 }
  0xae   : > { %4524 = vmatprep.subr.mxu1 %v4733_v4  ;;  %v755_v60 = vsub.s32 0, %v5448_v53  ;;  %v759_v61 = vsub.s32 1, %v5448_v53 }
  0xaf   : > { %1081 = vmatmul.mubr.f32.gmra.mxu1 %v616_v59 }
  0xb0   : > { %1085 = vmatprep.mubr.f32.mxu1 %v633_v2  ;;  %887 = vmatmul.mubr.f32.gmra.mxu0 %v619_v25  ;;  %v756_v3 = vrot.slane %v5461_v62, %v755_v60  ;;  %v760_v5 = vrot.slane %v5461_v62, %v759_v61 }
  0xb1   : > { %892 = vmatprep.mubr.f32.mxu0 %v636_v27  ;;  %4525 = vmatpush3.msra.mxu1 %v744_v26 }
  0xb2   : > { %4526 = vmatprep.subr.mxu1 %v4733_v4 }
  0xb3   : > { %1086 = vmatmul.mubr.f32.gmra.mxu1 %v617_v7 }
  0xb4   : > { %1090 = vmatprep.mubr.f32.mxu1 %v634_v36  ;;  %893 = vmatmul.mubr.f32.gmra.mxu0 %v620_v28 }
  0xb5   : > { %4527 = vmatpush3.msra.mxu1 %v741_v20  ;;  %1308 = vmatprep.mubr.f32.mxu0 %v4733_v4 }
  0xb6   : > { %4528 = vmatprep.subr.mxu1 %v4733_v4 }
  0xb7   : > { %1091 = vmatmul.mubr.f32.gmra.mxu1 %v618_v15 }
  0xb8   : > { %1095 = vmatprep.mubr.f32.mxu1 %v635_v23  ;;  %4529 = vmatpush3.msra.mxu1 %v738_v29 }
  0xb9   : > { %4530 = vmatprep.subr.mxu1 %v4733_v4 }
  0xba   : > { %4531 = vmatpush3.msra.mxu1 %v735_v11 }
  0xbb   : > { %1096 = vmatmul.mubr.f32.gmra.mxu1 %v619_v25 }
  0xbc   : > { %1100 = vmatprep.mubr.f32.mxu1 %v636_v27 }
  0xbf   : > { %1101 = vmatmul.mubr.f32.gmra.mxu1 %v620_v28 }
  0xc0   : > { %4532 = vmatprep.mubr.msk.f32.mxu1 %vm4738_vm9, %v4733_v4 }
  0xc3   : > { %4533 = vmatmul.mubr.msk.f32.vlgmr.msra.gmra.mxu1 %vm768_vm4, %v5191_v45 }
  0xc4   : > { %4535 = vmatprep.mubr.msk.f32.mxu1 %vm4738_vm9, %v4733_v4 }
  0xc7   : > { %4536 = vmatmul.mubr.msk.f32.gmra.mxu1 %vm768_vm4, %v5210_v51 }
  0xc8   : > { %4538 = vmatprep.mubr.msk.f32.mxu1 %vm4738_vm9, %v4733_v4 }
  0xcb   : > { %4539 = vmatmul.mubr.msk.f32.gmra.mxu1 %vm768_vm4, %v5186_v43  ;;  %v5424_v43 = vld [vmem:[%s8035_s5] sm:$0xff] }
  0xcc   : > { %4541 = vmatprep.mubr.msk.f32.mxu1 %vm4738_vm9, %v4733_v4 }
  0xcf   : > { %4542 = vmatmul.mubr.msk.f32.gmra.mxu1 %vm768_vm4, %v5205_v49 }
  0xd0   : > { %4544 = vmatprep.mubr.msk.f32.mxu1 %vm4738_vm9, %v4733_v4 }
  0xd3   : > { %4545 = vmatmul.mubr.msk.f32.gmra.mxu1 %vm768_vm4, %v5229_v57 }
  0xd4   : > { %4547 = vmatprep.mubr.msk.f32.mxu1 %vm4738_vm9, %v4733_v4 }
  0xd7   : > { %4548 = vmatmul.mubr.msk.f32.gmra.mxu1 %vm768_vm4, %v5224_v55 }
  0xd8   : > { %4550 = vmatprep.mubr.msk.f32.mxu1 %vm4738_vm9, %v4733_v4 }
  0xdb   : > { %4551 = vmatmul.mubr.msk.f32.gmra.mxu1 %vm768_vm4, %v5248_v63 }
  0xdc   : > { %4567 = vmatprep.mubr.msk.f32.mxu1 %vm1231_vm10, %v5424_v43 }
 0x146   : > { %v5428_v45 = vpop.f32.mrf.mxu1 }
 0x148   : > { %v5430_v49 = vpop.f32.mrf.mxu1 }
 0x14a   : > { %v5432_v51 = vpop.f32.mrf.mxu1 }
 0x14c   : > { %v5434_v55 = vpop.f32.mrf.mxu1 }
 0x14e   : > { %v5436_v57 = vpop.f32.mrf.mxu1 }
 0x150   : > { %v5438_v63 = vpop.f32.mrf.mxu1 }
 0x152   : > { %v5440_v30 = vpop.f32.mrf.mxu1 }
 0x154   : > { %v985_v31 = vpop.f32.mrf.mxu1 }
 0x156   : > { %v989_v32 = vpop.f32.mrf.mxu1 }
 0x158   : > { %v991_v33 = vpop.f32.mrf.mxu1 }
 0x15b   : > { %v995_v34 = vpop.f32.mrf.mxu1  ;;  %v5442_v35 = vpop.f32.mrf.mxu0 }
 0x15d   : > { %v997_v37 = vpop.f32.mrf.mxu1  ;;  %v860_v14 = vpop.f32.mrf.mxu0 }
 0x15f   : > { %v1001_v39 = vpop.f32.mrf.mxu1 }
 0x160   : > { %v864_v38 = vpop.f32.mrf.mxu0 }
 0x161   : > { %v1003_v42 = vpop.f32.mrf.mxu1 }
 0x162   : > { %v866_v40 = vpop.f32.mrf.mxu0 }
 0x164   : > { %v870_v41 = vpop.f32.mrf.mxu0 }
 0x165   : > { %v871_v11 = vadd.f32 %v870_v41, %v756_v3 }
 0x166   : > { %v872_v44 = vpop.f32.mrf.mxu0 }
 0x167   : > { %v5444_v47 = vpop.f32.mrf.mxu1  ;;  %v873_v27 = vadd.f32 %v872_v44, %v760_v5 }
 0x168   : > { %v876_v48 = vpop.f32.mrf.mxu0 }
 0x169   : > { %v5446_v50 = vpop.f32.mrf.mxu1  ;;  %v877_v17 = vadd.f32 %v876_v48, %v756_v3 }
 0x16a   : > { %v878_v52 = vpop.f32.mrf.mxu0 }
 0x16b   : > { %v5450_v54 = vpop.f32.mrf.mxu1  ;;  %v879_v22 = vadd.f32 %v878_v52, %v760_v5 }
 0x16c   : > { %v882_v56 = vpop.f32.mrf.mxu0 }
 0x16d   : > { %v5452_v58 = vpop.f32.mrf.mxu1  ;;  %v883_v19 = vadd.f32 %v882_v56, %v756_v3 }
 0x16e   : > { %v884_v59 = vpop.f32.mrf.mxu0 }
 0x16f   : > { %v5456_v9 = vpop.f32.mrf.mxu1  ;;  %v885_v15 = vadd.f32 %v884_v59, %v760_v5  ;;  %v990_v46 = vadd.f32 %v989_v32, %v883_v19  ;;  %v859_v32 = vadd.f32 %v5442_v35, %v756_v3 }
 0x170   : > { %v888_v0 = vpop.f32.mrf.mxu0 }
 0x171   : > { %v5463_v1 = vpop.f32.mrf.mxu1  ;;  %v889_v13 = vadd.f32 %v888_v0, %v756_v3  ;;  %v992_v28 = vadd.f32 %v991_v33, %v885_v15  ;;  %v867_v0 = vadd.f32 %v866_v40, %v760_v5  ;;  %v980_v33 = vadd.f32 %v5438_v63, %v873_v27 }
 0x172   : > { %v890_v2 = vpop.f32.mrf.mxu0  ;;  %v1218_v40 = vmax.f32 %v990_v46, 0.0  ;;  %v966_v35 = vadd.f32 %v5428_v45, %v859_v32  ;;  %v5506_v45 = vld [vmem:[%s8035_s5 + $0x8] sm:$0xff]  ;;  %v1646_v32 = vld [vmem:[%s8037_s7 + $0xd0] sm:$0xff] }
 0x173   : > { %v5471_v6 = vpop.f32.mrf.mxu1  ;;  %v891_v10 = vadd.f32 %v890_v2, %v760_v5  ;;  %v996_v26 = vadd.f32 %v995_v34, %v889_v13  ;;  %v986_v2 = vadd.f32 %v985_v31, %v879_v22  ;;  %v861_v34 = vadd.f32 %v860_v14, %v760_v5 }
 0x174   : > { %v894_v7 = vpop.f32.mrf.mxu0  ;;  %v1219_v44 = vmax.f32 %v992_v28, 0.0  ;;  %v978_v31 = vadd.f32 %v5436_v57, %v871_v11  ;;  %v974_v41 = vadd.f32 %v5434_v55, %v867_v0  ;;  %v1213_v14 = vmax.f32 %v980_v33, 0.0  ;;  %v1651_v28 = vld [vmem:[%s8037_s7 + $0xf8] sm:$0xff]  ;;  %v1650_v0 = vld [vmem:[%s8037_s7 + $0xf0] sm:$0xff] }
 0x175   : > { %v895_v8 = vadd.f32 %v894_v7, %v756_v3  ;;  %v5473_v12 = vpop.f32.mrf.mxu1  ;;  %v5477_v23 = vadd.f32 %v997_v37, %v891_v10  ;;  %v865_v37 = vadd.f32 %v864_v38, %v756_v3  ;;  %v1221_v48 = vmax.f32 %v996_v26, 0.0 }
 0x176   : > { %v896_v36 = vpop.f32.mrf.mxu0  ;;  %v1216_v7 = vmax.f32 %v986_v2, 0.0  ;;  %v968_v63 = vadd.f32 %v5430_v49, %v861_v34  ;;  %v1212_v57 = vmax.f32 %v978_v31, 0.0  ;;  %v1210_v3 = vmax.f32 %v974_v41, 0.0  ;;  %v1645_v31 = vld [vmem:[%s8037_s7 + $0xc8] sm:$0xff] }
 0x177   : > { %v897_v18 = vadd.f32 %v896_v36, %v760_v5  ;;  %v5475_v16 = vpop.f32.mrf.mxu1  ;;  %v1002_v21 = vadd.f32 %v1001_v39, %v895_v8  ;;  %v1222_v39 = vmax.f32 %v5477_v23, 0.0  ;;  %v763_v23 = vsub.s32 2, %v5448_v53 }
 0x178   : > { %v1207_v13 = vmax.f32 %v968_v63, 0.0  ;;  %v4324_v34 = vadd.f32 %v5452_v58, %v5450_v54 }
 0x179   : > { %v1004_v24 = vadd.f32 %v1003_v42, %v897_v18  ;;  %v5479_v25 = vpop.f32.mrf.mxu1  ;;  %v1224_v59 = vmax.f32 %v1002_v21, 0.0  ;;  %v984_v42 = vadd.f32 %v5440_v30, %v877_v17  ;;  %v972_v30 = vadd.f32 %v5432_v51, %v865_v37  ;;  %v1648_v37 = vld [vmem:[%s8037_s7 + $0xe0] sm:$0xff] }
 0x17a   : > { %v1206_v51 = vmax.f32 %v966_v35, 0.0  ;;  %v4333_v11 = vadd.f32 %v5479_v25, %v5475_v16  ;;  %v764_v46 = vrot.slane %v5461_v62, %v763_v23  ;;  %v4330_v16 = vadd.f32 %v5473_v12, %v5471_v6  ;;  %v1649_v62 = vld [vmem:[%s8037_s7 + $0xe8] sm:$0xff] }
 0x17b   : > { %v1225_v20 = vmax.f32 %v1004_v24, 0.0  ;;  %v5481_v29 = vpop.f32.mrf.mxu1  ;;  %v1215_v10 = vmax.f32 %v984_v42, 0.0  ;;  %v1209_v55 = vmax.f32 %v972_v30, 0.0  ;;  %v5523_v24 = vld [vmem:[%s8035_s5 + $0x18] sm:$0xf]  ;;  %v5562_v12 = vld [vmem:[%s8036_s6 + $0x8] sm:$0xff] }
 0x17c   : > { %v1093_v42 = vadd.f32 %v4333_v11, %v764_v46  ;;  %v1088_v33 = vadd.f32 %v4330_v16, %v764_v46  ;;  %v1625_v11 = vld [vmem:[%s8037_s7 + $0x28] sm:$0xff]  ;;  %v1620_v16 = vld [vmem:[%s8037_s7] sm:$0xff] }
 0x17d   : > { %v5484_v52 = vpop.f32.mrf.mxu1  ;;  %1262 = vmatprep.subr.mxu0 %v1225_v20 }
 0x17e   : > { %1263 = vmatpush1.msra.mxu0 %v1224_v59  ;;  %v4336_v26 = vadd.f32 %v5484_v52, %v5481_v29  ;;  %v5541_v29 = vld [vmem:[%s8036_s6] sm:$0xff] }
 0x17f   : > { %v4337_v56 = vpop.f32.mrf.mxu1  ;;  %1264 = vmatprep.subr.mxu0 %v1222_v39 }
 0x180   : > { %1265 = vmatpush1.msra.mxu0 %v1221_v48  ;;  %v1098_v25 = vadd.f32 %v4336_v26, %v764_v46  ;;  %v1629_v26 = vld [vmem:[%s8037_s7 + $0x48] sm:$0xff] }
 0x181   : > { %v4338_v38 = vpop.f32.mrf.mxu1  ;;  %1266 = vmatprep.subr.mxu0 %v1219_v44 }
 0x182   : > { %1267 = vmatpush1.msra.mxu0 %v1218_v40  ;;  %v4339_v27 = vadd.f32 %v4338_v38, %v4337_v56  ;;  %v1078_v38 = vadd.f32 %v4324_v34, %v764_v46  ;;  %v1671_v34 = vld [vmem:[%s8037_s7 + $0x198] sm:$0xff] }
 0x183   : > { %v5493_v5 = vpop.f32.mrf.mxu1  ;;  %1268 = vmatprep.subr.mxu0 %v1216_v7 }
 0x184   : > { %1269 = vmatpush1.msra.mxu0 %v1215_v10  ;;  %v1103_v2 = vadd.f32 %v4339_v27, %v764_v46  ;;  %v1628_v27 = vld [vmem:[%s8037_s7 + $0x40] sm:$0xff] }
 0x185   : > { %v4534_v8 = vpop.f32.mrf.mxu1  ;;  %1270 = vmatprep.subr.mxu0 %v1213_v14 }
 0x186   : > { %1271 = vmatpush1.msra.mxu0 %v1212_v57 }
 0x187   : > { %v5496_v36 = vpop.f32.mrf.mxu1  ;;  %1272 = vmatprep.subr.mxu0 %v1210_v3 }
 0x188   : > { %1273 = vmatpush1.msra.mxu0 %v1209_v55 }
 0x189   : > { %v4537_v49 = vpop.f32.mrf.mxu1  ;;  %1274 = vmatprep.subr.mxu0 %v1207_v13 }
 0x18a   : > { %1275 = vmatpush1.msra.mxu0 %v1206_v51  ;;  %v1638_v49 = vld [vmem:[%s8037_s7 + $0x90] sm:$0xff] }
 0x18b   : > { %v5498_v15 = vpop.f32.mrf.mxu1  ;;  %1452 = vmatprep.subr.mxu0 %v1225_v20  ;;  %4245 = vmatmul.mubr.msk.f32.vlgmr.msra.gmra.mxu0 %vm1231_vm10, %v5424_v43  ;;  %v5514_v43 = vld [vmem:[%s8035_s5 + $0x10] sm:$0xff] }
 0x18c   : > { %1453 = vmatpush1.msra.mxu0 %v1224_v59  ;;  %1314 = vmatprep.mubr.f32.mxu0 %v4733_v4 }
 0x18d   : > { %v4540_v18 = vpop.f32.mrf.mxu1  ;;  %1454 = vmatprep.subr.mxu0 %v1222_v39  ;;  %v4327_v39 = vadd.f32 %v5463_v1, %v5456_v9  ;;  %v1647_v9 = vld [vmem:[%s8037_s7 + $0xd8] sm:$0xff] }
 0x18e   : > { %1455 = vmatpush1.msra.mxu0 %v1221_v48  ;;  %v1637_v18 = vld [vmem:[%s8037_s7 + $0x88] sm:$0xff] }
 0x18f   : > { %v1187_v19 = vpop.f32.mrf.mxu1  ;;  %1456 = vmatprep.subr.mxu0 %v1219_v44  ;;  %4246 = vmatmul.mubr.msk.f32.gmra.mxu0 %vm1231_vm10, %v5506_v45  ;;  %v1083_v54 = vadd.f32 %v4327_v39, %v764_v46  ;;  %v1680_v39 = vld [vmem:[%s8037_s7 + $0x1e0] sm:$0xff] }
 0x190   : > { %1457 = vmatpush1.msra.mxu0 %v1218_v40  ;;  %1320 = vmatprep.mubr.f32.mxu0 %v4733_v4  ;;  %v4321_v40 = vadd.f32 %v5446_v50, %v5444_v47  ;;  %v1188_v58 = vadd.f32 %v1187_v19, %v1088_v33  ;;  %v1644_v47 = vld [vmem:[%s8037_s7 + $0xc0] sm:$0xff]  ;;  %v1643_v50 = vld [vmem:[%s8037_s7 + $0xb8] sm:$0xff]  ;;  %v1670_v33 = vld [vmem:[%s8037_s7 + $0x190] sm:$0xff] }
 0x191   : > { %v4543_v21 = vpop.f32.mrf.mxu1  ;;  %1458 = vmatprep.subr.mxu0 %v1216_v7  ;;  %v5583_v7 = vld [vmem:[%s8036_s6 + $0x10] sm:$0xff]  ;;  %v1183_v30 = vadd.f32 %v5498_v15, %v1083_v54  ;;  %v1636_v19 = vld [vmem:[%s8037_s7 + $0x80] sm:$0xff] }
 0x192   : > { %1459 = vmatpush1.msra.mxu0 %v1215_v10  ;;  %v1073_v63 = vadd.f32 %v4321_v40, %v764_v46  ;;  %v1217_v35 = vmax.f32 %v1188_v58, 0.0  ;;  %v1635_v21 = vld [vmem:[%s8037_s7 + $0x78] sm:$0xff]  ;;  %v1624_v46 = vld [vmem:[%s8037_s7 + $0x20] sm:$0xff]  ;;  %v1665_v40 = vld [vmem:[%s8037_s7 + $0x168] sm:$0xff] }
 0x193   : > { %v1192_v22 = vpop.f32.mrf.mxu1  ;;  %1460 = vmatprep.subr.mxu0 %v1213_v14  ;;  %4247 = vmatmul.mubr.msk.f32.gmra.mxu0 %vm1231_vm10, %v5514_v43  ;;  %v1178_v14 = vadd.f32 %v5496_v36, %v1078_v38  ;;  %v1640_v36 = vld [vmem:[%s8037_s7 + $0xa0] sm:$0xff]  ;;  %v1663_v58 = vld [vmem:[%s8037_s7 + $0x158] sm:$0xff] }
 0x194   : > { %1461 = vmatpush1.msra.mxu0 %v1212_v57  ;;  %1326 = vmatprep.mubr.f32.mxu0 %v4733_v4  ;;  %v1193_v44 = vadd.f32 %v1192_v22, %v1093_v42  ;;  %v5599_v57 = vld [vmem:[%s8036_s6 + $0x18] sm:$0xf]  ;;  %v1173_v8 = vadd.f32 %v5493_v5, %v1073_v63  ;;  %v1634_v22 = vld [vmem:[%s8037_s7 + $0x70] sm:$0xff]  ;;  %v1677_v42 = vld [vmem:[%s8037_s7 + $0x1c8] sm:$0xff] }
 0x195   : > { %v4546_v17 = vpop.f32.mrf.mxu1  ;;  %1462 = vmatprep.subr.mxu0 %v1210_v3  ;;  %v1642_v3 = vld [vmem:[%s8037_s7 + $0xb0] sm:$0xff]  ;;  %v1639_v5 = vld [vmem:[%s8037_s7 + $0x98] sm:$0xff]  ;;  %v1664_v54 = vld [vmem:[%s8037_s7 + $0x160] sm:$0xff] }
 0x196   : > { %1463 = vmatpush1.msra.mxu0 %v1209_v55  ;;  %v1220_v10 = vmax.f32 %v1193_v44, 0.0  ;;  %v1214_v55 = vmax.f32 %v1183_v30, 0.0  ;;  %v1208_v15 = vmax.f32 %v1173_v8, 0.0  ;;  %v1631_v17 = vld [vmem:[%s8037_s7 + $0x58] sm:$0xff]  ;;  %v1669_v44 = vld [vmem:[%s8037_s7 + $0x188] sm:$0xff]  ;;  %v1660_v38 = vld [vmem:[%s8037_s7 + $0x140] sm:$0xff] }
 0x197   : > { %v1197_v20 = vpop.f32.mrf.mxu1  ;;  %1464 = vmatprep.subr.mxu0 %v1207_v13  ;;  %4248 = vmatmul.mubr.msk.f32.gmra.mxu0 %vm1231_vm10, %v5523_v24  ;;  %v1641_v13 = vld [vmem:[%s8037_s7 + $0xa8] sm:$0xff]  ;;  %v1659_v30 = vld [vmem:[%s8037_s7 + $0x138] sm:$0xff]  ;;  %v1702_v8 = vld [vmem:[%s8037_s7 + $0x290] sm:$0xff] }
 0x198   : > { %1465 = vmatpush1.msra.mxu0 %v1206_v51  ;;  %1498 = vmatprep.mubr.f32.mxu0 %v4733_v4  ;;  %v1198_v48 = vadd.f32 %v1197_v20, %v1098_v25  ;;  %v1211_v51 = vmax.f32 %v1178_v14, 0.0  ;;  %v1626_v20 = vld [vmem:[%s8037_s7 + $0x30] sm:$0xff]  ;;  %v1683_v25 = vld [vmem:[%s8037_s7 + $0x1f8] sm:$0xff] }
 0x199   : > { %v4549_v59 = vpop.f32.mrf.mxu1  ;;  %1717 = vmatprep.subr.mxu0 %v1651_v28  ;;  %v1627_v28 = vld [vmem:[%s8037_s7 + $0x38] sm:$0xff]  ;;  %v1654_v14 = vld [vmem:[%s8037_s7 + $0x110] sm:$0xff] }
 0x19a   : > { %v1223_v41 = vmax.f32 %v1198_v48, 0.0  ;;  %v1622_v59 = vld [vmem:[%s8037_s7 + $0x10] sm:$0xff]  ;;  %v1676_v48 = vld [vmem:[%s8037_s7 + $0x1c0] sm:$0xff]  ;;  %v1655_v63 = vld [vmem:[%s8037_s7 + $0x118] sm:$0xff] }
 0x19b   : > { %v1202_v52 = vpop.f32.mrf.mxu1  ;;  %4253 = vmatmul.mubr.msk.f32.vlgmr.msra.gmra.mxu0 %vm1231_vm10, %v5541_v29 }
 0x19c   : > { %v1203_v6 = vadd.f32 %v1202_v52, %v1103_v2  ;;  %1504 = vmatprep.mubr.f32.mxu0 %v4733_v4  ;;  %1718 = vmatpush1.msra.mxu0 %v1650_v0  ;;  %v1621_v0 = vld [vmem:[%s8037_s7 + $0x8] sm:$0xff]  ;;  %v1682_v2 = vld [vmem:[%s8037_s7 + $0x1f0] sm:$0xff]  ;;  %v1679_v52 = vld [vmem:[%s8037_s7 + $0x1d8] sm:$0xff] }
 0x19d   : > { %v4552_v1 = vpop.f32.mrf.mxu1  ;;  %1719 = vmatprep.subr.mxu0 %v1649_v62  ;;  %v1681_v62 = vld [vmem:[%s8037_s7 + $0x1e8] sm:$0xff] }
 0x19e   : > { %v1226_v56 = vmax.f32 %v1203_v6, 0.0  ;;  %1720 = vmatpush1.msra.mxu0 %v1648_v37  ;;  %v1678_v37 = vld [vmem:[%s8037_s7 + $0x1d0] sm:$0xff]  ;;  %v1675_v6 = vld [vmem:[%s8037_s7 + $0x1b8] sm:$0xff]  ;;  %v1672_v1 = vld [vmem:[%s8037_s7 + $0x1a0] sm:$0xff] }
 0x19f   : > { %4254 = vmatmul.mubr.msk.f32.gmra.mxu0 %vm1231_vm10, %v5562_v12  ;;  %1721 = vmatprep.subr.mxu0 %v1647_v9  ;;  %v1673_v9 = vld [vmem:[%s8037_s7 + $0x1a8] sm:$0xff] }
 0x1a0   : > { %4553 = vmatprep.subr.mxu1 %v1226_v56  ;;  %1510 = vmatprep.mubr.f32.mxu0 %v4733_v4 }
 0x1a1   : > { %4554 = vmatpush3.msra.mxu1 %v1226_v56  ;;  %1722 = vmatpush1.msra.mxu0 %v1646_v32  ;;  %v1667_v32 = vld [vmem:[%s8037_s7 + $0x178] sm:$0xff] }
 0x1a2   : > { %4555 = vmatprep.subr.mxu1 %v1223_v41  ;;  %1723 = vmatprep.subr.mxu0 %v1645_v31  ;;  %v1666_v31 = vld [vmem:[%s8037_s7 + $0x170] sm:$0xff] }
 0x1a3   : > { %4556 = vmatpush3.msra.mxu1 %v1223_v41  ;;  %4255 = vmatmul.mubr.msk.f32.gmra.mxu0 %vm1231_vm10, %v5583_v7 }
 0x1a4   : > { %4557 = vmatprep.subr.mxu1 %v1220_v10  ;;  %1516 = vmatprep.mubr.f32.mxu0 %v4733_v4 }
 0x1a5   : > { %4558 = vmatpush3.msra.mxu1 %v1220_v10  ;;  %1724 = vmatpush1.msra.mxu0 %v1644_v47  ;;  %v1657_v47 = vld [vmem:[%s8037_s7 + $0x128] sm:$0xff] }
 0x1a6   : > { %4559 = vmatprep.subr.mxu1 %v1217_v35  ;;  %1725 = vmatprep.subr.mxu0 %v1643_v50  ;;  %v1656_v50 = vld [vmem:[%s8037_s7 + $0x120] sm:$0xff] }
 0x1a7   : > { %4560 = vmatpush3.msra.mxu1 %v1217_v35  ;;  %4256 = vmatmul.mubr.msk.f32.gmra.mxu0 %vm1231_vm10, %v5599_v57 }
 0x1a8   : > { %4561 = vmatprep.subr.mxu1 %v1214_v55  ;;  %1726 = vmatpush1.msra.mxu0 %v1642_v3  ;;  %v1703_v3 = vld [vmem:[%s8037_s7 + $0x298] sm:$0xff] }
 0x1a9   : > { %4562 = vmatpush3.msra.mxu1 %v1214_v55  ;;  %1727 = vmatprep.subr.mxu0 %v1641_v13  ;;  %v1701_v13 = vld [vmem:[%s8037_s7 + $0x288] sm:$0xff] }
 0x1aa   : > { %4563 = vmatprep.subr.mxu1 %v1211_v51  ;;  %1728 = vmatpush1.msra.mxu0 %v1640_v36  ;;  %v1700_v36 = vld [vmem:[%s8037_s7 + $0x280] sm:$0xff] }
 0x1ab   : > { %4564 = vmatpush3.msra.mxu1 %v1211_v51  ;;  %1729 = vmatprep.subr.mxu0 %v1639_v5  ;;  %v1698_v5 = vld [vmem:[%s8037_s7 + $0x270] sm:$0xff] }
 0x1ac   : > { %4565 = vmatprep.subr.mxu1 %v1208_v15  ;;  %1730 = vmatpush1.msra.mxu0 %v1638_v49  ;;  %v1697_v49 = vld [vmem:[%s8037_s7 + $0x268] sm:$0xff] }
 0x1ad   : > { %4566 = vmatpush3.msra.mxu1 %v1208_v15  ;;  %1731 = vmatprep.subr.mxu0 %v1637_v18  ;;  %v1695_v18 = vld [vmem:[%s8037_s7 + $0x258] sm:$0xff] }
 0x1ae   : > { %4573 = vmatprep.subr.mxu1 %v1226_v56  ;;  %4568 = vmatmul.mubr.msk.f32.vlgmr.msra.gmra.mxu1 %vm1231_vm10, %v5506_v45  ;;  %v1633_v45 = vld [vmem:[%s8037_s7 + $0x68] sm:$0xff] }
 0x1af   : > { %4574 = vmatpush3.msra.mxu1 %v1226_v56  ;;  %4570 = vmatprep.mubr.msk.f32.mxu1 %vm1231_vm10, %v5514_v43  ;;  %v1632_v43 = vld [vmem:[%s8037_s7 + $0x60] sm:$0xff] }
 0x1b0   : > { %4575 = vmatprep.subr.mxu1 %v1223_v41  ;;  %1732 = vmatpush1.msra.mxu0 %v1636_v19  ;;  %v1668_v56 = vld [vmem:[%s8037_s7 + $0x180] sm:$0xff]  ;;  %v1694_v19 = vld [vmem:[%s8037_s7 + $0x250] sm:$0xff] }
 0x1b1   : > { %4576 = vmatpush3.msra.mxu1 %v1223_v41  ;;  %1733 = vmatprep.subr.mxu0 %v1635_v21  ;;  %v1662_v41 = vld [vmem:[%s8037_s7 + $0x150] sm:$0xff]  ;;  %v1693_v21 = vld [vmem:[%s8037_s7 + $0x248] sm:$0xff] }
 0x1b2   : > { %4577 = vmatprep.subr.mxu1 %v1220_v10  ;;  %4571 = vmatmul.mubr.msk.f32.gmra.mxu1 %vm1231_vm10, %v5523_v24  ;;  %v1630_v24 = vld [vmem:[%s8037_s7 + $0x50] sm:$0xff] }
 0x1b3   : > { %4578 = vmatpush3.msra.mxu1 %v1220_v10  ;;  %4587 = vmatprep.mubr.msk.f32.mxu1 %vm1231_vm10, %v5541_v29  ;;  %v1623_v29 = vld [vmem:[%s8037_s7 + $0x18] sm:$0xff]  ;;  %v1658_v10 = vld [vmem:[%s8037_s7 + $0x130] sm:$0xff] }
 0x1b4   : > { %4579 = vmatprep.subr.mxu1 %v1217_v35  ;;  %1734 = vmatpush1.msra.mxu0 %v1634_v22  ;;  %v1692_v22 = vld [vmem:[%s8037_s7 + $0x240] sm:$0xff] }
 0x1b5   : > { %4580 = vmatpush3.msra.mxu1 %v1217_v35  ;;  %1735 = vmatprep.subr.mxu0 %v1633_v45  ;;  %v1653_v35 = vld [vmem:[%s8037_s7 + $0x108] sm:$0xff]  ;;  %v1691_v45 = vld [vmem:[%s8037_s7 + $0x238] sm:$0xff] }
 0x1b6   : > { %4581 = vmatprep.subr.mxu1 %v1214_v55  ;;  %1736 = vmatpush1.msra.mxu0 %v1632_v43  ;;  %v1690_v43 = vld [vmem:[%s8037_s7 + $0x230] sm:$0xff] }
 0x1b7   : > { %4582 = vmatpush3.msra.mxu1 %v1214_v55  ;;  %1737 = vmatprep.subr.mxu0 %v1631_v17  ;;  %v1978_v55 = vld [vmem:[%s8038_s8 + $0x298] sm:$0xff]  ;;  %v1689_v17 = vld [vmem:[%s8037_s7 + $0x228] sm:$0xff] }
 0x1b8   : > { %4583 = vmatprep.subr.mxu1 %v1211_v51  ;;  %1738 = vmatpush1.msra.mxu0 %v1630_v24  ;;  %v1688_v24 = vld [vmem:[%s8037_s7 + $0x220] sm:$0xff] }
 0x1b9   : > { %4584 = vmatpush3.msra.mxu1 %v1211_v51  ;;  %1739 = vmatprep.subr.mxu0 %v1629_v26  ;;  %v1699_v51 = vld [vmem:[%s8037_s7 + $0x278] sm:$0xff] }
 0x1ba   : > { %4585 = vmatprep.subr.mxu1 %v1208_v15  ;;  %1740 = vmatpush1.msra.mxu0 %v1628_v27  ;;  %v1687_v26 = vld [vmem:[%s8037_s7 + $0x218] sm:$0xff]  ;;  %v1686_v27 = vld [vmem:[%s8037_s7 + $0x210] sm:$0xff] }
 0x1bb   : > { %4586 = vmatpush3.msra.mxu1 %v1208_v15  ;;  %1741 = vmatprep.subr.mxu0 %v1627_v28  ;;  %v1696_v15 = vld [vmem:[%s8037_s7 + $0x260] sm:$0xff]  ;;  %v1685_v28 = vld [vmem:[%s8037_s7 + $0x208] sm:$0xff] }
 0x1bc   : > { %4588 = vmatmul.mubr.msk.f32.vlgmr.msra.gmra.mxu1 %vm1231_vm10, %v5562_v12  ;;  %1742 = vmatpush1.msra.mxu0 %v1626_v20  ;;  %v1674_v12 = vld [vmem:[%s8037_s7 + $0x1b0] sm:$0xff]  ;;  %v1684_v20 = vld [vmem:[%s8037_s7 + $0x200] sm:$0xff] }
 0x1bd   : > { %4590 = vmatprep.mubr.msk.f32.mxu1 %vm1231_vm10, %v5583_v7  ;;  %1743 = vmatprep.subr.mxu0 %v1625_v11  ;;  %v1661_v7 = vld [vmem:[%s8037_s7 + $0x148] sm:$0xff]  ;;  %v1926_v11 = vld [vmem:[%s8038_s8 + $0xf8] sm:$0xff] }
 0x1be   : > { %1744 = vmatpush1.msra.mxu0 %v1624_v46  ;;  %1818 = vmatprep.subr.mxu1 %v1703_v3  ;;  %v1964_v3 = vld [vmem:[%s8038_s8 + $0x228] sm:$0xff] }
 0x1bf   : > { %1745 = vmatprep.subr.mxu0 %v1623_v29  ;;  %1819 = vmatpush1.msra.mxu1 %v1702_v8  ;;  %v1963_v8 = vld [vmem:[%s8038_s8 + $0x220] sm:$0xff] }
 0x1c0   : > { %4591 = vmatmul.mubr.msk.f32.gmra.mxu1 %vm1231_vm10, %v5599_v57  ;;  %1746 = vmatpush1.msra.mxu0 %v1622_v59  ;;  %v1652_v57 = vld [vmem:[%s8037_s7 + $0x100] sm:$0xff] }
 0x1c1   : > { %1747 = vmatprep.subr.mxu0 %v1621_v0  ;;  %1870 = vmatprep.mubr.f32.mxu1 %v4733_v4 }
 0x1c2   : > { %1748 = vmatpush1.msra.mxu0 %v1620_v16  ;;  %1820 = vmatprep.subr.mxu1 %v1701_v13  ;;  %v1961_v13 = vld [vmem:[%s8038_s8 + $0x210] sm:$0xff] }
 0x1c3   : > { %1749 = vmatprep.subr.mxu0 %v1683_v25  ;;  %1821 = vmatpush1.msra.mxu1 %v1700_v36 }
 0x1c4   : > { %1750 = vmatpush2.msra.mxu0 %v1682_v2  ;;  %1822 = vmatprep.subr.mxu1 %v1699_v51  ;;  %v1960_v51 = vld [vmem:[%s8038_s8 + $0x208] sm:$0xff] }
 0x1c5   : > { %1751 = vmatprep.subr.mxu0 %v1681_v62  ;;  %1823 = vmatpush1.msra.mxu1 %v1698_v5  ;;  %v1959_v5 = vld [vmem:[%s8038_s8 + $0x200] sm:$0xff] }
 0x1c6   : > { %1752 = vmatpush2.msra.mxu0 %v1680_v39  ;;  %1824 = vmatprep.subr.mxu1 %v1697_v49 }
 0x1c7   : > { %1753 = vmatprep.subr.mxu0 %v1679_v52  ;;  %1825 = vmatpush1.msra.mxu1 %v1696_v15 }
 0x1c8   : > { %1754 = vmatpush2.msra.mxu0 %v1678_v37  ;;  %1826 = vmatprep.subr.mxu1 %v1695_v18 }
 0x1c9   : > { %1755 = vmatprep.subr.mxu0 %v1677_v42  ;;  %1827 = vmatpush1.msra.mxu1 %v1694_v19 }
 0x1ca   : > { %1756 = vmatpush2.msra.mxu0 %v1676_v48  ;;  %1828 = vmatprep.subr.mxu1 %v1693_v21  ;;  %v1977_v48 = vld [vmem:[%s8038_s8 + $0x290] sm:$0xff] }
 0x1cb   : > { %1757 = vmatprep.subr.mxu0 %v1675_v6  ;;  %1829 = vmatpush1.msra.mxu1 %v1692_v22 }
 0x1cc   : > { %1758 = vmatpush2.msra.mxu0 %v1674_v12  ;;  %1830 = vmatprep.subr.mxu1 %v1691_v45  ;;  %v1976_v12 = vld [vmem:[%s8038_s8 + $0x288] sm:$0xff]  ;;  %v1925_v45 = vld [vmem:[%s8038_s8 + $0xf0] sm:$0xff] }
 0x1cd   : > { %1759 = vmatprep.subr.mxu0 %v1673_v9  ;;  %1831 = vmatpush1.msra.mxu1 %v1690_v43 }
 0x1ce   : > { %1760 = vmatpush2.msra.mxu0 %v1672_v1  ;;  %1832 = vmatprep.subr.mxu1 %v1689_v17  ;;  %v1975_v1 = vld [vmem:[%s8038_s8 + $0x280] sm:$0xff]  ;;  %v1924_v17 = vld [vmem:[%s8038_s8 + $0xe8] sm:$0xff] }
 0x1cf   : > { %1761 = vmatprep.subr.mxu0 %v1671_v34  ;;  %1833 = vmatpush1.msra.mxu1 %v1688_v24  ;;  %v1923_v24 = vld [vmem:[%s8038_s8 + $0xe0] sm:$0xff] }
 0x1d0   : > { %1762 = vmatpush2.msra.mxu0 %v1670_v33  ;;  %1834 = vmatprep.subr.mxu1 %v1687_v26  ;;  %v1922_v26 = vld [vmem:[%s8038_s8 + $0xd8] sm:$0xff] }
 0x1d1   : > { %1763 = vmatprep.subr.mxu0 %v1669_v44  ;;  %1835 = vmatpush1.msra.mxu1 %v1686_v27  ;;  %v1974_v44 = vld [vmem:[%s8038_s8 + $0x278] sm:$0xff] }
 0x1d2   : > { %1764 = vmatpush2.msra.mxu0 %v1668_v56  ;;  %1836 = vmatprep.subr.mxu1 %v1685_v28  ;;  %v1973_v56 = vld [vmem:[%s8038_s8 + $0x270] sm:$0xff] }
 0x1d3   : > { %1765 = vmatprep.subr.mxu0 %v1667_v32  ;;  %1837 = vmatpush1.msra.mxu1 %v1684_v20  ;;  %v1921_v28 = vld [vmem:[%s8038_s8 + $0xd0] sm:$0xff] }
 0x1d4   : > { %1766 = vmatpush2.msra.mxu0 %v1666_v31  ;;  %1979 = vmatprep.subr.mxu1 %v1926_v11  ;;  %v1972_v31 = vld [vmem:[%s8038_s8 + $0x268] sm:$0xff] }
 0x1d5   : > { %1767 = vmatprep.subr.mxu0 %v1665_v40  ;;  %v1920_v11 = vld [vmem:[%s8038_s8 + $0xc8] sm:$0xff] }
 0x1d6   : > { %1768 = vmatpush2.msra.mxu0 %v1664_v54  ;;  %v1971_v54 = vld [vmem:[%s8038_s8 + $0x260] sm:$0xff] }
 0x1d7   : > { %1769 = vmatprep.subr.mxu0 %v1663_v58 }
 0x1d8   : > { %1770 = vmatpush2.msra.mxu0 %v1662_v41 }
 0x1d9   : > { %1771 = vmatprep.subr.mxu0 %v1661_v7  ;;  %v1970_v7 = vld [vmem:[%s8038_s8 + $0x258] sm:$0xff] }
 0x1da   : > { %1772 = vmatpush2.msra.mxu0 %v1660_v38  ;;  %v1969_v38 = vld [vmem:[%s8038_s8 + $0x250] sm:$0xff] }
 0x1db   : > { %1773 = vmatprep.subr.mxu0 %v1659_v30 }
 0x1dc   : > { %1774 = vmatpush2.msra.mxu0 %v1658_v10  ;;  %v1968_v10 = vld [vmem:[%s8038_s8 + $0x248] sm:$0xff] }
 0x1dd   : > { %1775 = vmatprep.subr.mxu0 %v1657_v47 }
 0x1de   : > { %1776 = vmatpush2.msra.mxu0 %v1656_v50  ;;  %v1967_v50 = vld [vmem:[%s8038_s8 + $0x240] sm:$0xff] }
 0x1df   : > { %1777 = vmatprep.subr.mxu0 %v1655_v63 }
 0x1e0   : > { %1778 = vmatpush2.msra.mxu0 %v1654_v14 }
 0x1e1   : > { %1779 = vmatprep.subr.mxu0 %v1653_v35  ;;  %v1966_v35 = vld [vmem:[%s8038_s8 + $0x238] sm:$0xff] }
 0x1e2   : > { %1780 = vmatpush2.msra.mxu0 %v1652_v57  ;;  %v1965_v57 = vld [vmem:[%s8038_s8 + $0x230] sm:$0xff] }
 0x1e3   : > { %2080 = vmatprep.subr.mxu0 %v1978_v55  ;;  %v1962_v55 = vld [vmem:[%s8038_s8 + $0x218] sm:$0xff] }
 0x24b   : > { %v1310_v46 = vpop.f32.mrf.mxu0 }
 0x24d   : > { %v1312_v29 = vpop.f32.mrf.mxu0 }
 0x24f   : > { %v1316_v59 = vpop.f32.mrf.mxu0 }
 0x251   : > { %v1318_v0 = vpop.f32.mrf.mxu0 }
 0x253   : > { %v1322_v16 = vpop.f32.mrf.mxu0 }
 0x255   : > { %v1324_v25 = vpop.f32.mrf.mxu0 }
 0x257   : > { %v1328_v2 = vpop.f32.mrf.mxu0 }
 0x259   : > { %v1330_v62 = vpop.f32.mrf.mxu0 }
 0x25b   : > { %v1500_v39 = vpop.f32.mrf.mxu0 }
 0x25c   : > { %v5850_v52 = vmax.f32 %v1310_v46, %v1500_v39  ;;  %v1919_v46 = vld [vmem:[%s8038_s8 + $0xc0] sm:$0xff]  ;;  %v1913_v39 = vld [vmem:[%s8038_s8 + $0x90] sm:$0xff] }
 0x25d   : > { %v1502_v37 = vpop.f32.mrf.mxu0 }
 0x25e   : > { %v5852_v42 = vmax.f32 %v1312_v29, %v1502_v37  ;;  %v1918_v29 = vld [vmem:[%s8038_s8 + $0xb8] sm:$0xff]  ;;  %v1912_v37 = vld [vmem:[%s8038_s8 + $0x88] sm:$0xff] }
 0x25f   : > { %v1506_v6 = vpop.f32.mrf.mxu0 }
 0x260   : > { %1781 = vmatprep.mubr.f32.mxu0 %v5852_v42  ;;  %v5862_v9 = vmax.f32 %v1316_v59, %v1506_v6  ;;  %v1910_v6 = vld [vmem:[%s8038_s8 + $0x78] sm:$0xff] }
 0x261   : > { %1782 = vmatmul.mubr.f32.vlgmr.msra.gmra.mxu0 %v5850_v52  ;;  %v1508_v34 = vpop.f32.mrf.mxu0 }
 0x262   : > { %2081 = vmatpush1.msra.mxu0 %v1977_v48  ;;  %v5867_v33 = vmax.f32 %v1318_v0, %v1508_v34  ;;  %v1917_v0 = vld [vmem:[%s8038_s8 + $0xb0] sm:$0xff]  ;;  %v1911_v48 = vld [vmem:[%s8038_s8 + $0x80] sm:$0xff] }
 0x263   : > { %2082 = vmatprep.subr.mxu0 %v1976_v12  ;;  %v1512_v32 = vpop.f32.mrf.mxu0  ;;  %v1909_v12 = vld [vmem:[%s8038_s8 + $0x70] sm:$0xff]  ;;  %v1907_v34 = vld [vmem:[%s8038_s8 + $0x60] sm:$0xff] }
 0x264   : > { %2083 = vmatpush1.msra.mxu0 %v1975_v1  ;;  %1787 = vmatprep.mubr.f32.mxu0 %v5867_v33  ;;  %v5879_v40 = vmax.f32 %v1322_v16, %v1512_v32  ;;  %v1916_v16 = vld [vmem:[%s8038_s8 + $0xa8] sm:$0xff]  ;;  %v1903_v32 = vld [vmem:[%s8038_s8 + $0x40] sm:$0xff] }
 0x265   : > { %2084 = vmatprep.subr.mxu0 %v1974_v44  ;;  %v1514_v58 = vpop.f32.mrf.mxu0  ;;  %1788 = vmatmul.mubr.f32.gmra.mxu0 %v5862_v9  ;;  %v1908_v1 = vld [vmem:[%s8038_s8 + $0x68] sm:$0xff]  ;;  %v1906_v44 = vld [vmem:[%s8038_s8 + $0x58] sm:$0xff] }
 0x266   : > { %2085 = vmatpush1.msra.mxu0 %v1973_v56  ;;  %v5885_v41 = vmax.f32 %v1324_v25, %v1514_v58  ;;  %v1915_v25 = vld [vmem:[%s8038_s8 + $0xa0] sm:$0xff]  ;;  %v1904_v56 = vld [vmem:[%s8038_s8 + $0x48] sm:$0xff] }
 0x267   : > { %2086 = vmatprep.subr.mxu0 %v1972_v31  ;;  %v1518_v30 = vpop.f32.mrf.mxu0  ;;  %v1902_v31 = vld [vmem:[%s8038_s8 + $0x38] sm:$0xff]  ;;  %v1900_v58 = vld [vmem:[%s8038_s8 + $0x28] sm:$0xff] }
 0x268   : > { %2087 = vmatpush1.msra.mxu0 %v1971_v54  ;;  %1793 = vmatprep.mubr.f32.mxu0 %v5885_v41  ;;  %v5897_v47 = vmax.f32 %v1328_v2, %v1518_v30  ;;  %v1914_v2 = vld [vmem:[%s8038_s8 + $0x98] sm:$0xff]  ;;  %v1901_v54 = vld [vmem:[%s8038_s8 + $0x30] sm:$0xff] }
 0x269   : > { %2088 = vmatprep.subr.mxu0 %v1970_v7  ;;  %v1520_v63 = vpop.f32.mrf.mxu0  ;;  %1794 = vmatmul.mubr.f32.gmra.mxu0 %v5879_v40  ;;  %v1899_v7 = vld [vmem:[%s8038_s8 + $0x20] sm:$0xff]  ;;  %v1897_v30 = vld [vmem:[%s8038_s8 + $0x10] sm:$0xff] }
 0x26a   : > { %2089 = vmatpush1.msra.mxu0 %v1969_v38  ;;  %v5903_v14 = vmax.f32 %v1330_v62, %v1520_v63  ;;  %v1898_v38 = vld [vmem:[%s8038_s8 + $0x18] sm:$0xff] }
 0x26b   : > { %2090 = vmatprep.subr.mxu0 %v1968_v10  ;;  %v1896_v10 = vld [vmem:[%s8038_s8 + $0x8] sm:$0xff]  ;;  %v1958_v63 = vld [vmem:[%s8038_s8 + $0x1f8] sm:$0xff] }
 0x26c   : > { %2091 = vmatpush1.msra.mxu0 %v1967_v50  ;;  %1799 = vmatprep.mubr.f32.mxu0 %v5903_v14  ;;  %v1895_v50 = vld [vmem:[%s8038_s8] sm:$0xff] }
 0x26d   : > { %2092 = vmatprep.subr.mxu0 %v1966_v35  ;;  %1800 = vmatmul.mubr.f32.gmra.mxu0 %v5897_v47  ;;  %v1957_v35 = vld [vmem:[%s8038_s8 + $0x1f0] sm:$0xff] }
 0x26e   : > { %2093 = vmatpush1.msra.mxu0 %v1965_v57  ;;  %2132 = vmatprep.mubr.f32.mxu0 %v4733_v4  ;;  %v4569_v36 = vpop.f32.mrf.mxu1  ;;  %v1956_v57 = vld [vmem:[%s8038_s8 + $0x1e8] sm:$0xff] }
 0x26f   : > { %2094 = vmatprep.subr.mxu0 %v1964_v3  ;;  %v1955_v3 = vld [vmem:[%s8038_s8 + $0x1e0] sm:$0xff] }
 0x270   : > { %2095 = vmatpush1.msra.mxu0 %v1963_v8  ;;  %v1399_v49 = vpop.f32.mrf.mxu1  ;;  %v1954_v8 = vld [vmem:[%s8038_s8 + $0x1d8] sm:$0xff] }
 0x271   : > { %2096 = vmatprep.subr.mxu0 %v1962_v55  ;;  %v1953_v55 = vld [vmem:[%s8038_s8 + $0x1d0] sm:$0xff] }
 0x272   : > { %2097 = vmatpush1.msra.mxu0 %v1961_v13  ;;  %v4572_v15 = vpop.f32.mrf.mxu1  ;;  %v1952_v13 = vld [vmem:[%s8038_s8 + $0x1c8] sm:$0xff] }
 0x273   : > { %2098 = vmatprep.subr.mxu0 %v1960_v51  ;;  %v1950_v51 = vld [vmem:[%s8038_s8 + $0x1b8] sm:$0xff] }
 0x274   : > { %2099 = vmatpush1.msra.mxu0 %v1959_v5  ;;  %v1409_v18 = vpop.f32.mrf.mxu1  ;;  %v1949_v5 = vld [vmem:[%s8038_s8 + $0x1b0] sm:$0xff] }
 0x27c   : > { %v4589_v19 = vpop.f32.mrf.mxu1 }
 0x27d   : > { %v1613_v27 = vmax.f32 %v4569_v36, %v4589_v19  ;;  %v1951_v36 = vld [vmem:[%s8038_s8 + $0x1c0] sm:$0xff]  ;;  %v1945_v19 = vld [vmem:[%s8038_s8 + $0x190] sm:$0xff] }
 0x27e   : > { %v1589_v21 = vpop.f32.mrf.mxu1 }
 0x27f   : > { %v1610_v22 = vmax.f32 %v1399_v49, %v1589_v21  ;;  %v1948_v49 = vld [vmem:[%s8038_s8 + $0x1a8] sm:$0xff] }
 0x280   : > { %v4592_v43 = vpop.f32.mrf.mxu1  ;;  %v1944_v21 = vld [vmem:[%s8038_s8 + $0x188] sm:$0xff] }
 0x281   : > { %4261 = vmatmul.mubr.msk.f32.vlgmr.msra.gmra.mxu1 %vm1704_vm11, %v1610_v22  ;;  %4265 = vmatmul.mubr.msk.f32.vlgmr.msra.gmra.mxu0 %vm1704_vm11, %v1610_v22  ;;  %v1619_v62 = vmax.f32 %v4572_v15, %v4592_v43  ;;  %v1947_v15 = vld [vmem:[%s8038_s8 + $0x1a0] sm:$0xff]  ;;  %v1941_v43 = vld [vmem:[%s8038_s8 + $0x170] sm:$0xff] }
 0x282   : > { %1980 = vmatpush1.msra.mxu1 %v1925_v45  ;;  %1876 = vmatprep.mubr.f32.mxu1 %v4733_v4  ;;  %v1599_v20 = vpop.f32.mrf.mxu1  ;;  %v1943_v22 = vld [vmem:[%s8038_s8 + $0x180] sm:$0xff]  ;;  %v1942_v45 = vld [vmem:[%s8038_s8 + $0x178] sm:$0xff] }
 0x283   : > { %1981 = vmatprep.subr.mxu1 %v1924_v17  ;;  %2138 = vmatprep.mubr.f32.mxu0 %v4733_v4  ;;  %v1616_v59 = vmax.f32 %v1409_v18, %v1599_v20  ;;  %v1946_v18 = vld [vmem:[%s8038_s8 + $0x198] sm:$0xff]  ;;  %v1940_v17 = vld [vmem:[%s8038_s8 + $0x168] sm:$0xff]  ;;  %v1935_v20 = vld [vmem:[%s8038_s8 + $0x140] sm:$0xff] }
 0x284   : > { %1982 = vmatpush1.msra.mxu1 %v1923_v24  ;;  %v1939_v24 = vld [vmem:[%s8038_s8 + $0x160] sm:$0xff] }
 0x285   : > { %1983 = vmatprep.subr.mxu1 %v1922_v26  ;;  %4262 = vmatmul.mubr.msk.f32.gmra.mxu1 %vm1704_vm11, %v1613_v27  ;;  %v1938_v26 = vld [vmem:[%s8038_s8 + $0x158] sm:$0xff] }
 0x286   : > { %1984 = vmatpush1.msra.mxu1 %v1921_v28  ;;  %4266 = vmatmul.mubr.msk.f32.gmra.mxu0 %vm1704_vm11, %v1613_v27  ;;  %v1937_v27 = vld [vmem:[%s8038_s8 + $0x150] sm:$0xff]  ;;  %v1936_v28 = vld [vmem:[%s8038_s8 + $0x148] sm:$0xff] }
 0x287   : > { %1985 = vmatprep.subr.mxu1 %v1920_v11  ;;  %1882 = vmatprep.mubr.f32.mxu1 %v4733_v4  ;;  %v1934_v11 = vld [vmem:[%s8038_s8 + $0x138] sm:$0xff] }
 0x288   : > { %1986 = vmatpush1.msra.mxu1 %v1919_v46  ;;  %2144 = vmatprep.mubr.f32.mxu0 %v4733_v4  ;;  %v1933_v46 = vld [vmem:[%s8038_s8 + $0x130] sm:$0xff] }
 0x289   : > { %1987 = vmatprep.subr.mxu1 %v1918_v29  ;;  %4263 = vmatmul.mubr.msk.f32.gmra.mxu1 %vm1704_vm11, %v1616_v59  ;;  %v1932_v29 = vld [vmem:[%s8038_s8 + $0x128] sm:$0xff] }
 0x28a   : > { %1988 = vmatpush1.msra.mxu1 %v1917_v0  ;;  %4267 = vmatmul.mubr.msk.f32.gmra.mxu0 %vm1704_vm11, %v1616_v59  ;;  %v1931_v59 = vld [vmem:[%s8038_s8 + $0x120] sm:$0xff]  ;;  %v1930_v0 = vld [vmem:[%s8038_s8 + $0x118] sm:$0xff] }
 0x28b   : > { %1989 = vmatprep.subr.mxu1 %v1916_v16  ;;  %1888 = vmatprep.mubr.f32.mxu1 %v4733_v4  ;;  %v1929_v16 = vld [vmem:[%s8038_s8 + $0x110] sm:$0xff] }
 0x28c   : > { %1990 = vmatpush1.msra.mxu1 %v1915_v25  ;;  %2150 = vmatprep.mubr.f32.mxu0 %v4733_v4  ;;  %v1928_v25 = vld [vmem:[%s8038_s8 + $0x108] sm:$0xff] }
 0x28d   : > { %1991 = vmatprep.subr.mxu1 %v1914_v2  ;;  %4264 = vmatmul.mubr.msk.f32.gmra.mxu1 %vm1704_vm11, %v1619_v62  ;;  %v1927_v2 = vld [vmem:[%s8038_s8 + $0x100] sm:$0xff] }
 0x28e   : > { %1992 = vmatpush1.msra.mxu1 %v1913_v39  ;;  %4268 = vmatmul.mubr.msk.f32.gmra.mxu0 %vm1704_vm11, %v1619_v62  ;;  %v2373_v62 = vld [vmem:[%s8033_s3 + $0x170] sm:$0xff]  ;;  %v2366_v39 = vld [vmem:[%s8033_s3 + $0x138] sm:$0xff] }
 0x28f   : > { %1993 = vmatprep.subr.mxu1 %v1912_v37  ;;  %2043 = vmatprep.mubr.f32.mxu1 %v5852_v42  ;;  %v1905_v42 = vld [vmem:[%s8038_s8 + $0x50] sm:$0xff] }
 0x290   : > { %1994 = vmatpush1.msra.mxu1 %v1911_v48  ;;  %2666 = vmatprep.subr.mxu0 %v2373_v62  ;;  %v2465_v37 = vld [vmem:[%s8033_s3 + $0x450] sm:$0xff]  ;;  %v2463_v48 = vld [vmem:[%s8033_s3 + $0x440] sm:$0xff]  ;;  %v2328_v62 = vld [vmem:[%s8033_s3 + $0x8] sm:$0xff] }
 0x291   : > { %1995 = vmatprep.subr.mxu1 %v1910_v6  ;;  %v2364_v6 = vld [vmem:[%s8033_s3 + $0x128] sm:$0xff] }
 0x292   : > { %1996 = vmatpush1.msra.mxu1 %v1909_v12  ;;  %v2462_v12 = vld [vmem:[%s8033_s3 + $0x438] sm:$0xff] }
 0x293   : > { %1997 = vmatprep.subr.mxu1 %v1908_v1  ;;  %v2363_v1 = vld [vmem:[%s8033_s3 + $0x120] sm:$0xff] }
 0x294   : > { %1998 = vmatpush1.msra.mxu1 %v1907_v34  ;;  %v2460_v34 = vld [vmem:[%s8033_s3 + $0x428] sm:$0xff] }
 0x295   : > { %1999 = vmatprep.subr.mxu1 %v1906_v44  ;;  %v2361_v44 = vld [vmem:[%s8033_s3 + $0x110] sm:$0xff] }
 0x296   : > { %2000 = vmatpush1.msra.mxu1 %v1905_v42  ;;  %v2459_v42 = vld [vmem:[%s8033_s3 + $0x420] sm:$0xff] }
 0x297   : > { %2001 = vmatprep.subr.mxu1 %v1904_v56  ;;  %v2360_v56 = vld [vmem:[%s8033_s3 + $0x108] sm:$0xff] }
 0x298   : > { %2002 = vmatpush1.msra.mxu1 %v1903_v32  ;;  %v2457_v32 = vld [vmem:[%s8033_s3 + $0x410] sm:$0xff] }
 0x299   : > { %2003 = vmatprep.subr.mxu1 %v1902_v31  ;;  %v2358_v31 = vld [vmem:[%s8033_s3 + $0xf8] sm:$0xff] }
 0x29a   : > { %2004 = vmatpush1.msra.mxu1 %v1901_v54  ;;  %v2456_v54 = vld [vmem:[%s8033_s3 + $0x408] sm:$0xff] }
 0x29b   : > { %2005 = vmatprep.subr.mxu1 %v1900_v58  ;;  %v2357_v58 = vld [vmem:[%s8033_s3 + $0xf0] sm:$0xff] }
 0x29c   : > { %2006 = vmatpush1.msra.mxu1 %v1899_v7  ;;  %v2454_v7 = vld [vmem:[%s8033_s3 + $0x3f8] sm:$0xff] }
 0x29d   : > { %2007 = vmatprep.subr.mxu1 %v1898_v38  ;;  %v2355_v38 = vld [vmem:[%s8033_s3 + $0xe0] sm:$0xff] }
 0x29e   : > { %2008 = vmatpush1.msra.mxu1 %v1897_v30  ;;  %v2453_v30 = vld [vmem:[%s8033_s3 + $0x3f0] sm:$0xff] }
 0x29f   : > { %2009 = vmatprep.subr.mxu1 %v1896_v10  ;;  %v2354_v10 = vld [vmem:[%s8033_s3 + $0xd8] sm:$0xff] }
 0x2a0   : > { %2010 = vmatpush1.msra.mxu1 %v1895_v50  ;;  %v2451_v50 = vld [vmem:[%s8033_s3 + $0x3e0] sm:$0xff] }
 0x2a1   : > { %2011 = vmatprep.subr.mxu1 %v1958_v63  ;;  %v2352_v63 = vld [vmem:[%s8033_s3 + $0xc8] sm:$0xff] }
 0x2a2   : > { %2012 = vmatpush2.msra.mxu1 %v1957_v35  ;;  %v2450_v35 = vld [vmem:[%s8033_s3 + $0x3d8] sm:$0xff] }
 0x2a3   : > { %2013 = vmatprep.subr.mxu1 %v1956_v57  ;;  %v2351_v57 = vld [vmem:[%s8033_s3 + $0xc0] sm:$0xff] }
 0x2a4   : > { %2014 = vmatpush2.msra.mxu1 %v1955_v3  ;;  %v2448_v3 = vld [vmem:[%s8033_s3 + $0x3c8] sm:$0xff] }
 0x2a5   : > { %2015 = vmatprep.subr.mxu1 %v1954_v8  ;;  %v2349_v8 = vld [vmem:[%s8033_s3 + $0xb0] sm:$0xff] }
 0x2a6   : > { %2016 = vmatpush2.msra.mxu1 %v1953_v55  ;;  %v2447_v55 = vld [vmem:[%s8033_s3 + $0x3c0] sm:$0xff] }
 0x2a7   : > { %2017 = vmatprep.subr.mxu1 %v1952_v13  ;;  %v2348_v13 = vld [vmem:[%s8033_s3 + $0xa8] sm:$0xff] }
 0x2a8   : > { %2018 = vmatpush2.msra.mxu1 %v1951_v36  ;;  %v2445_v36 = vld [vmem:[%s8033_s3 + $0x3b0] sm:$0xff] }
 0x2a9   : > { %2019 = vmatprep.subr.mxu1 %v1950_v51  ;;  %v2346_v51 = vld [vmem:[%s8033_s3 + $0x98] sm:$0xff] }
 0x2aa   : > { %2020 = vmatpush2.msra.mxu1 %v1949_v5  ;;  %v2444_v5 = vld [vmem:[%s8033_s3 + $0x3a8] sm:$0xff] }
 0x2ab   : > { %2021 = vmatprep.subr.mxu1 %v1948_v49  ;;  %v2345_v49 = vld [vmem:[%s8033_s3 + $0x90] sm:$0xff] }
 0x2ac   : > { %2022 = vmatpush2.msra.mxu1 %v1947_v15  ;;  %v2442_v15 = vld [vmem:[%s8033_s3 + $0x398] sm:$0xff] }
 0x2ad   : > { %2023 = vmatprep.subr.mxu1 %v1946_v18  ;;  %v2343_v18 = vld [vmem:[%s8033_s3 + $0x80] sm:$0xff] }
 0x2ae   : > { %2024 = vmatpush2.msra.mxu1 %v1945_v19  ;;  %v2441_v19 = vld [vmem:[%s8033_s3 + $0x390] sm:$0xff] }
 0x2af   : > { %2025 = vmatprep.subr.mxu1 %v1944_v21  ;;  %v2342_v21 = vld [vmem:[%s8033_s3 + $0x78] sm:$0xff] }
 0x2b0   : > { %2026 = vmatpush2.msra.mxu1 %v1943_v22  ;;  %v2439_v22 = vld [vmem:[%s8033_s3 + $0x380] sm:$0xff] }
 0x2b1   : > { %2027 = vmatprep.subr.mxu1 %v1942_v45  ;;  %v2340_v45 = vld [vmem:[%s8033_s3 + $0x68] sm:$0xff] }
 0x2b2   : > { %2028 = vmatpush2.msra.mxu1 %v1941_v43  ;;  %v2438_v43 = vld [vmem:[%s8033_s3 + $0x378] sm:$0xff] }
 0x2b3   : > { %2029 = vmatprep.subr.mxu1 %v1940_v17  ;;  %v2339_v17 = vld [vmem:[%s8033_s3 + $0x60] sm:$0xff] }
 0x2b4   : > { %2030 = vmatpush2.msra.mxu1 %v1939_v24  ;;  %v2436_v24 = vld [vmem:[%s8033_s3 + $0x368] sm:$0xff] }
 0x2b5   : > { %2031 = vmatprep.subr.mxu1 %v1938_v26  ;;  %v2337_v26 = vld [vmem:[%s8033_s3 + $0x50] sm:$0xff] }
 0x2b6   : > { %2032 = vmatpush2.msra.mxu1 %v1937_v27  ;;  %v2435_v27 = vld [vmem:[%s8033_s3 + $0x360] sm:$0xff] }
 0x2b7   : > { %2033 = vmatprep.subr.mxu1 %v1936_v28  ;;  %v2336_v28 = vld [vmem:[%s8033_s3 + $0x48] sm:$0xff] }
 0x2b8   : > { %2034 = vmatpush2.msra.mxu1 %v1935_v20  ;;  %v2433_v20 = vld [vmem:[%s8033_s3 + $0x350] sm:$0xff] }
 0x2b9   : > { %2035 = vmatprep.subr.mxu1 %v1934_v11  ;;  %v2334_v11 = vld [vmem:[%s8033_s3 + $0x38] sm:$0xff] }
 0x2ba   : > { %2036 = vmatpush2.msra.mxu1 %v1933_v46  ;;  %v2432_v46 = vld [vmem:[%s8033_s3 + $0x348] sm:$0xff] }
 0x2bb   : > { %2037 = vmatprep.subr.mxu1 %v1932_v29  ;;  %v2333_v29 = vld [vmem:[%s8033_s3 + $0x30] sm:$0xff] }
 0x2bc   : > { %2038 = vmatpush2.msra.mxu1 %v1931_v59  ;;  %v2430_v59 = vld [vmem:[%s8033_s3 + $0x338] sm:$0xff] }
 0x2bd   : > { %2039 = vmatprep.subr.mxu1 %v1930_v0  ;;  %v2331_v0 = vld [vmem:[%s8033_s3 + $0x20] sm:$0xff] }
 0x2be   : > { %2040 = vmatpush2.msra.mxu1 %v1929_v16  ;;  %v2429_v16 = vld [vmem:[%s8033_s3 + $0x330] sm:$0xff] }
 0x2bf   : > { %2041 = vmatprep.subr.mxu1 %v1928_v25  ;;  %v2330_v25 = vld [vmem:[%s8033_s3 + $0x18] sm:$0xff] }
 0x2c0   : > { %2042 = vmatpush2.msra.mxu1 %v1927_v2  ;;  %v2427_v2 = vld [vmem:[%s8033_s3 + $0x320] sm:$0xff] }
 0x2c1   : > { %2044 = vmatmul.mubr.f32.vlgmr.msra.gmra.mxu1 %v5850_v52  ;;  %v2372_v52 = vld [vmem:[%s8033_s3 + $0x168] sm:$0xff] }
 0x2c2   : > { %2049 = vmatprep.mubr.f32.mxu1 %v5867_v33  ;;  %v2469_v33 = vld [vmem:[%s8033_s3 + $0x470] sm:$0xff]  ;;  %2667 = vmatpush1.msra.mxu0 %v2372_v52  ;;  %v2426_v52 = vld [vmem:[%s8033_s3 + $0x318] sm:$0xff] }
 0x2c3   : > { %2749 = vmatprep.subr.mxu1 %v2469_v33  ;;  %v2424_v33 = vld [vmem:[%s8033_s3 + $0x308] sm:$0xff] }
 0x2c5   : > { %2050 = vmatmul.mubr.f32.gmra.mxu1 %v5862_v9  ;;  %v2370_v9 = vld [vmem:[%s8033_s3 + $0x158] sm:$0xff] }
 0x2c6   : > { %2055 = vmatprep.mubr.f32.mxu1 %v5885_v41  ;;  %v2468_v41 = vld [vmem:[%s8033_s3 + $0x468] sm:$0xff]  ;;  %2668 = vmatprep.subr.mxu0 %v2370_v9  ;;  %v2327_v9 = vld [vmem:[%s8033_s3] sm:$0xff] }
 0x2c7   : > { %2750 = vmatpush1.msra.mxu1 %v2468_v41  ;;  %v2423_v41 = vld [vmem:[%s8033_s3 + $0x300] sm:$0xff] }
 0x2c9   : > { %2056 = vmatmul.mubr.f32.gmra.mxu1 %v5879_v40  ;;  %v2369_v40 = vld [vmem:[%s8033_s3 + $0x150] sm:$0xff] }
 0x2ca   : > { %2061 = vmatprep.mubr.f32.mxu1 %v5903_v14  ;;  %v2466_v14 = vld [vmem:[%s8033_s3 + $0x458] sm:$0xff]  ;;  %2669 = vmatpush1.msra.mxu0 %v2369_v40  ;;  %v2421_v40 = vld [vmem:[%s8033_s3 + $0x2f0] sm:$0xff] }
 0x2cb   : > { %2751 = vmatprep.subr.mxu1 %v2466_v14  ;;  %v2517_v14 = vld [vmem:[%s8033_s3 + $0x5f0] sm:$0xff] }
 0x2cc   : > { %2752 = vmatpush1.msra.mxu1 %v2465_v37  ;;  %v2516_v37 = vld [vmem:[%s8033_s3 + $0x5e8] sm:$0xff] }
 0x2cd   : > { %2062 = vmatmul.mubr.f32.gmra.mxu1 %v5897_v47  ;;  %v2367_v47 = vld [vmem:[%s8033_s3 + $0x140] sm:$0xff]  ;;  %2753 = vmatprep.subr.mxu1 %v2463_v48 }
 0x2ce   : > { %2670 = vmatprep.subr.mxu0 %v2367_v47  ;;  %2754 = vmatpush1.msra.mxu1 %v2462_v12  ;;  %v2420_v47 = vld [vmem:[%s8033_s3 + $0x2e8] sm:$0xff]  ;;  %v2514_v12 = vld [vmem:[%s8033_s3 + $0x5d8] sm:$0xff] }
 0x2cf   : > { %2671 = vmatpush1.msra.mxu0 %v2366_v39  ;;  %2755 = vmatprep.subr.mxu1 %v2460_v34  ;;  %v2418_v39 = vld [vmem:[%s8033_s3 + $0x2d8] sm:$0xff]  ;;  %v2513_v34 = vld [vmem:[%s8033_s3 + $0x5d0] sm:$0xff] }
 0x2d0   : > { %2672 = vmatprep.subr.mxu0 %v2364_v6  ;;  %2756 = vmatpush1.msra.mxu1 %v2459_v42  ;;  %v2417_v6 = vld [vmem:[%s8033_s3 + $0x2d0] sm:$0xff]  ;;  %v2511_v42 = vld [vmem:[%s8033_s3 + $0x5c0] sm:$0xff] }
 0x2d1   : > { %2673 = vmatpush1.msra.mxu0 %v2363_v1  ;;  %2757 = vmatprep.subr.mxu1 %v2457_v32  ;;  %v2415_v1 = vld [vmem:[%s8033_s3 + $0x2c0] sm:$0xff]  ;;  %v2510_v32 = vld [vmem:[%s8033_s3 + $0x5b8] sm:$0xff] }
 0x2d2   : > { %2674 = vmatprep.subr.mxu0 %v2361_v44  ;;  %2758 = vmatpush1.msra.mxu1 %v2456_v54  ;;  %v2414_v44 = vld [vmem:[%s8033_s3 + $0x2b8] sm:$0xff]  ;;  %v2411_v54 = vld [vmem:[%s8033_s3 + $0x2a0] sm:$0xff] }
 0x2d3   : > { %2675 = vmatpush1.msra.mxu0 %v2360_v56  ;;  %2759 = vmatprep.subr.mxu1 %v2454_v7  ;;  %v2412_v56 = vld [vmem:[%s8033_s3 + $0x2a8] sm:$0xff]  ;;  %v2409_v7 = vld [vmem:[%s8033_s3 + $0x290] sm:$0xff] }
 0x2d4   : > { %2676 = vmatprep.subr.mxu0 %v2358_v31  ;;  %2760 = vmatpush1.msra.mxu1 %v2453_v30  ;;  %v2408_v30 = vld [vmem:[%s8033_s3 + $0x288] sm:$0xff] }
 0x2d5   : > { %2677 = vmatpush1.msra.mxu0 %v2357_v58  ;;  %2761 = vmatprep.subr.mxu1 %v2451_v50  ;;  %v2508_v58 = vld [vmem:[%s8033_s3 + $0x5a8] sm:$0xff]  ;;  %v2406_v50 = vld [vmem:[%s8033_s3 + $0x278] sm:$0xff] }
 0x2d6   : > { %2678 = vmatprep.subr.mxu0 %v2355_v38  ;;  %2762 = vmatpush1.msra.mxu1 %v2450_v35  ;;  %v2507_v38 = vld [vmem:[%s8033_s3 + $0x5a0] sm:$0xff] }
 0x2d7   : > { %2679 = vmatpush1.msra.mxu0 %v2354_v10  ;;  %2763 = vmatprep.subr.mxu1 %v2448_v3  ;;  %v2505_v10 = vld [vmem:[%s8033_s3 + $0x590] sm:$0xff]  ;;  %v2502_v3 = vld [vmem:[%s8033_s3 + $0x578] sm:$0xff] }
 0x2d8   : > { %2680 = vmatprep.subr.mxu0 %v2352_v63  ;;  %2764 = vmatpush1.msra.mxu1 %v2447_v55  ;;  %v2504_v63 = vld [vmem:[%s8033_s3 + $0x588] sm:$0xff]  ;;  %v2501_v55 = vld [vmem:[%s8033_s3 + $0x570] sm:$0xff] }
 0x2d9   : > { %2681 = vmatpush1.msra.mxu0 %v2351_v57  ;;  %2765 = vmatprep.subr.mxu1 %v2445_v36  ;;  %v2405_v57 = vld [vmem:[%s8033_s3 + $0x270] sm:$0xff]  ;;  %v2499_v36 = vld [vmem:[%s8033_s3 + $0x560] sm:$0xff] }
 0x2da   : > { %2682 = vmatprep.subr.mxu0 %v2349_v8  ;;  %2766 = vmatpush1.msra.mxu1 %v2444_v5  ;;  %v2403_v8 = vld [vmem:[%s8033_s3 + $0x260] sm:$0xff]  ;;  %v2498_v5 = vld [vmem:[%s8033_s3 + $0x558] sm:$0xff] }
 0x2db   : > { %2683 = vmatpush1.msra.mxu0 %v2348_v13  ;;  %2767 = vmatprep.subr.mxu1 %v2442_v15  ;;  %v2402_v13 = vld [vmem:[%s8033_s3 + $0x258] sm:$0xff]  ;;  %v2399_v15 = vld [vmem:[%s8033_s3 + $0x240] sm:$0xff] }
 0x2dc   : > { %2684 = vmatprep.subr.mxu0 %v2346_v51  ;;  %2768 = vmatpush1.msra.mxu1 %v2441_v19  ;;  %v2400_v51 = vld [vmem:[%s8033_s3 + $0x248] sm:$0xff]  ;;  %v2397_v19 = vld [vmem:[%s8033_s3 + $0x230] sm:$0xff] }
 0x2dd   : > { %2685 = vmatpush1.msra.mxu0 %v2345_v49  ;;  %2769 = vmatprep.subr.mxu1 %v2439_v22  ;;  %v2396_v22 = vld [vmem:[%s8033_s3 + $0x228] sm:$0xff] }
 0x2de   : > { %2686 = vmatprep.subr.mxu0 %v2343_v18  ;;  %2770 = vmatpush1.msra.mxu1 %v2438_v43  ;;  %v2496_v18 = vld [vmem:[%s8033_s3 + $0x548] sm:$0xff]  ;;  %v2394_v43 = vld [vmem:[%s8033_s3 + $0x218] sm:$0xff] }
 0x2df   : > { %2687 = vmatpush1.msra.mxu0 %v2342_v21  ;;  %2771 = vmatprep.subr.mxu1 %v2436_v24  ;;  %v2495_v21 = vld [vmem:[%s8033_s3 + $0x540] sm:$0xff] }
 0x2e0   : > { %2688 = vmatprep.subr.mxu0 %v2340_v45  ;;  %2772 = vmatpush1.msra.mxu1 %v2435_v27  ;;  %v2493_v45 = vld [vmem:[%s8033_s3 + $0x530] sm:$0xff] }
 0x2e1   : > { %2689 = vmatpush1.msra.mxu0 %v2339_v17  ;;  %2773 = vmatprep.subr.mxu1 %v2433_v20  ;;  %v2492_v17 = vld [vmem:[%s8033_s3 + $0x528] sm:$0xff]  ;;  %v2393_v27 = vld [vmem:[%s8033_s3 + $0x210] sm:$0xff]  ;;  %v2391_v20 = vld [vmem:[%s8033_s3 + $0x200] sm:$0xff] }
 0x2e2   : > { %2690 = vmatprep.subr.mxu0 %v2337_v26  ;;  %2774 = vmatpush1.msra.mxu1 %v2432_v46  ;;  %v2390_v46 = vld [vmem:[%s8033_s3 + $0x1f8] sm:$0xff] }
 0x2e3   : > { %2691 = vmatpush1.msra.mxu0 %v2336_v28  ;;  %2775 = vmatprep.subr.mxu1 %v2430_v59  ;;  %v2490_v28 = vld [vmem:[%s8033_s3 + $0x518] sm:$0xff]  ;;  %v2388_v59 = vld [vmem:[%s8033_s3 + $0x1e8] sm:$0xff] }
 0x2e4   : > { %2692 = vmatprep.subr.mxu0 %v2334_v11  ;;  %2776 = vmatpush1.msra.mxu1 %v2429_v16  ;;  %v2489_v11 = vld [vmem:[%s8033_s3 + $0x510] sm:$0xff] }
 0x2e5   : > { %2693 = vmatpush1.msra.mxu0 %v2333_v29  ;;  %2777 = vmatprep.subr.mxu1 %v2427_v2  ;;  %v2487_v29 = vld [vmem:[%s8033_s3 + $0x500] sm:$0xff] }
 0x2e6   : > { %2694 = vmatprep.subr.mxu0 %v2331_v0  ;;  %2778 = vmatpush1.msra.mxu1 %v2426_v52  ;;  %v2486_v0 = vld [vmem:[%s8033_s3 + $0x4f8] sm:$0xff]  ;;  %v2387_v2 = vld [vmem:[%s8033_s3 + $0x1e0] sm:$0xff]  ;;  %v2385_v52 = vld [vmem:[%s8033_s3 + $0x1d0] sm:$0xff] }
 0x2e7   : > { %2695 = vmatpush1.msra.mxu0 %v2330_v25  ;;  %2779 = vmatprep.subr.mxu1 %v2424_v33  ;;  %v2384_v33 = vld [vmem:[%s8033_s3 + $0x1c8] sm:$0xff] }
 0x2e8   : > { %2696 = vmatprep.subr.mxu0 %v2328_v62  ;;  %2780 = vmatpush1.msra.mxu1 %v2423_v41  ;;  %v2484_v62 = vld [vmem:[%s8033_s3 + $0x4e8] sm:$0xff]  ;;  %v2382_v41 = vld [vmem:[%s8033_s3 + $0x1b8] sm:$0xff] }
 0x2e9   : > { %2697 = vmatpush1.msra.mxu0 %v2327_v9  ;;  %2781 = vmatprep.subr.mxu1 %v2517_v14  ;;  %v2483_v9 = vld [vmem:[%s8033_s3 + $0x4e0] sm:$0xff] }
 0x2ea   : > { %2698 = vmatprep.subr.mxu0 %v2421_v40  ;;  %2782 = vmatpush2.msra.mxu1 %v2516_v37  ;;  %v2481_v40 = vld [vmem:[%s8033_s3 + $0x4d0] sm:$0xff] }
 0x2eb   : > { %2699 = vmatpush2.msra.mxu0 %v2420_v47  ;;  %2783 = vmatprep.subr.mxu1 %v2514_v12  ;;  %v2480_v47 = vld [vmem:[%s8033_s3 + $0x4c8] sm:$0xff]  ;;  %v2381_v37 = vld [vmem:[%s8033_s3 + $0x1b0] sm:$0xff]  ;;  %v2379_v12 = vld [vmem:[%s8033_s3 + $0x1a0] sm:$0xff] }
 0x2ec   : > { %2700 = vmatprep.subr.mxu0 %v2418_v39  ;;  %2784 = vmatpush2.msra.mxu1 %v2513_v34 }
 0x2ed   : > { %2701 = vmatpush2.msra.mxu0 %v2417_v6  ;;  %2785 = vmatprep.subr.mxu1 %v2511_v42  ;;  %v2478_v6 = vld [vmem:[%s8033_s3 + $0x4b8] sm:$0xff] }
 0x2ee   : > { %2702 = vmatprep.subr.mxu0 %v2415_v1  ;;  %2786 = vmatpush2.msra.mxu1 %v2510_v32 }
 0x2ef   : > { %2703 = vmatpush2.msra.mxu0 %v2414_v44  ;;  %2787 = vmatprep.subr.mxu1 %v2508_v58 }
 0x2f0   : > { %2704 = vmatprep.subr.mxu0 %v2412_v56  ;;  %2788 = vmatpush2.msra.mxu1 %v2507_v38 }
 0x2f1   : > { %2705 = vmatpush2.msra.mxu0 %v2411_v54  ;;  %2789 = vmatprep.subr.mxu1 %v2505_v10 }
 0x2f2   : > { %2706 = vmatprep.subr.mxu0 %v2409_v7  ;;  %2790 = vmatpush2.msra.mxu1 %v2504_v63 }
 0x2f3   : > { %2707 = vmatpush2.msra.mxu0 %v2408_v30  ;;  %2791 = vmatprep.subr.mxu1 %v2502_v3 }
 0x2f4   : > { %2708 = vmatprep.subr.mxu0 %v2406_v50  ;;  %2792 = vmatpush2.msra.mxu1 %v2501_v55 }
 0x2f5   : > { %2709 = vmatpush2.msra.mxu0 %v2405_v57  ;;  %2793 = vmatprep.subr.mxu1 %v2499_v36 }
 0x2f6   : > { %2710 = vmatprep.subr.mxu0 %v2403_v8  ;;  %2794 = vmatpush2.msra.mxu1 %v2498_v5 }
 0x2f7   : > { %2711 = vmatpush2.msra.mxu0 %v2402_v13  ;;  %2795 = vmatprep.subr.mxu1 %v2496_v18 }
 0x2f8   : > { %2712 = vmatprep.subr.mxu0 %v2400_v51  ;;  %2796 = vmatpush2.msra.mxu1 %v2495_v21 }
 0x2f9   : > { %2713 = vmatpush2.msra.mxu0 %v2399_v15  ;;  %2797 = vmatprep.subr.mxu1 %v2493_v45  ;;  %v2375_v45 = vld [vmem:[%s8033_s3 + $0x180] sm:$0xff] }
 0x2fa   : > { %2714 = vmatprep.subr.mxu0 %v2397_v19  ;;  %2798 = vmatpush2.msra.mxu1 %v2492_v17  ;;  %v2378_v19 = vld [vmem:[%s8033_s3 + $0x198] sm:$0xff] }
 0x2fb   : > { %2715 = vmatpush2.msra.mxu0 %v2396_v22  ;;  %2799 = vmatprep.subr.mxu1 %v2490_v28  ;;  %v2475_v22 = vld [vmem:[%s8033_s3 + $0x4a0] sm:$0xff]  ;;  %v2565_v28 = vld [vmem:[%s8033_s3 + $0x770] sm:$0xff] }
 0x2fc   : > { %2716 = vmatprep.subr.mxu0 %v2394_v43  ;;  %2800 = vmatpush2.msra.mxu1 %v2489_v11  ;;  %v2474_v43 = vld [vmem:[%s8033_s3 + $0x498] sm:$0xff] }
 0x2fd   : > { %2717 = vmatpush2.msra.mxu0 %v2393_v27  ;;  %2801 = vmatprep.subr.mxu1 %v2487_v29  ;;  %v2472_v27 = vld [vmem:[%s8033_s3 + $0x488] sm:$0xff] }
 0x2fe   : > { %2718 = vmatprep.subr.mxu0 %v2391_v20  ;;  %2802 = vmatpush2.msra.mxu1 %v2486_v0  ;;  %v2471_v20 = vld [vmem:[%s8033_s3 + $0x480] sm:$0xff] }
 0x2ff   : > { %2719 = vmatpush2.msra.mxu0 %v2390_v46  ;;  %2803 = vmatprep.subr.mxu1 %v2484_v62 }
 0x300   : > { %2720 = vmatprep.subr.mxu0 %v2388_v59  ;;  %2804 = vmatpush2.msra.mxu1 %v2483_v9 }
 0x301   : > { %2721 = vmatpush2.msra.mxu0 %v2387_v2  ;;  %2805 = vmatprep.subr.mxu1 %v2481_v40 }
 0x302   : > { %2722 = vmatprep.subr.mxu0 %v2385_v52  ;;  %2806 = vmatpush2.msra.mxu1 %v2480_v47  ;;  %v2640_v52 = vld [vmem:[%s8033_s3 + $0x9c8] sm:$0xff] }
 0x303   : > { %2723 = vmatpush2.msra.mxu0 %v2384_v33  ;;  %2807 = vmatprep.subr.mxu1 %v2478_v6 }
 0x304   : > { %2724 = vmatprep.subr.mxu0 %v2382_v41 }
 0x305   : > { %2725 = vmatpush2.msra.mxu0 %v2381_v37 }
 0x306   : > { %2726 = vmatprep.subr.mxu0 %v2379_v12 }
 0x307   : > { %2727 = vmatpush2.msra.mxu0 %v2378_v19 }
 0x321   : > { %v6350_v48 = vpop.f32.mrf.mxu0 }
 0x323   : > { %v6376_v31 = vpop.f32.mrf.mxu0 }
 0x325   : > { %v6402_v35 = vpop.f32.mrf.mxu0 }
 0x327   : > { %v6428_v49 = vpop.f32.mrf.mxu0 }
 0x329   : > { %v6454_v24 = vpop.f32.mrf.mxu0 }
 0x32b   : > { %v6482_v16 = vpop.f32.mrf.mxu0 }
 0x32d   : > { %v6508_v14 = vpop.f32.mrf.mxu0 }
 0x32f   : > { %v6519_v1 = vpop.f32.mrf.mxu0 }
 0x341   : > { %v6456_v26 = vpop.f32.mrf.mxu1  ;;  %v2134_v44 = vpop.f32.mrf.mxu0 }
 0x342   : > { %v1873_v3 = vadd.f32 %v6456_v26, %v6350_v48  ;;  %v2477_v48 = vld [vmem:[%s8033_s3 + $0x4b0] sm:$0xff] }
 0x343   : > { %v1874_v25 = vpop.f32.mrf.mxu1  ;;  %v2136_v56 = vpop.f32.mrf.mxu0  ;;  %2808 = vmatpush2.msra.mxu1 %v2477_v48 }
 0x344   : > { %v1875_v55 = vadd.f32 %v1874_v25, %v6376_v31  ;;  %v2376_v31 = vld [vmem:[%s8033_s3 + $0x188] sm:$0xff]  ;;  %2809 = vmatprep.subr.mxu1 %v2475_v22 }
 0x345   : > { %v1878_v39 = vpop.f32.mrf.mxu1  ;;  %2728 = vmatprep.subr.mxu0 %v2376_v31  ;;  %2810 = vmatpush2.msra.mxu1 %v2474_v43 }
 0x346   : > { %v2140_v54 = vpop.f32.mrf.mxu0  ;;  %v1879_v13 = vadd.f32 %v1878_v39, %v6402_v35  ;;  %2729 = vmatpush2.msra.mxu0 %v2375_v45  ;;  %2811 = vmatprep.subr.mxu1 %v2472_v27 }
 0x347   : > { %v1880_v34 = vpop.f32.mrf.mxu1  ;;  %2832 = vmatprep.subr.mxu0 %v2565_v28  ;;  %2812 = vmatpush2.msra.mxu1 %v2471_v20 }
 0x348   : > { %v2142_v7 = vpop.f32.mrf.mxu0  ;;  %v1881_v51 = vadd.f32 %v1880_v34, %v6428_v49  ;;  %2929 = vmatprep.subr.mxu1 %v2640_v52 }
 0x349   : > { %v1884_v42 = vpop.f32.mrf.mxu1 }
 0x34a   : > { %v2146_v10 = vpop.f32.mrf.mxu0  ;;  %v1885_v17 = vadd.f32 %v1884_v42, %v6454_v24 }
 0x34b   : > { %v1886_v32 = vpop.f32.mrf.mxu1 }
 0x34c   : > { %v2148_v5 = vpop.f32.mrf.mxu0  ;;  %v1887_v59 = vadd.f32 %v1886_v32, %v6482_v16 }
 0x34d   : > { %v6521_v58 = vpop.f32.mrf.mxu1 }
 0x34e   : > { %v2152_v0 = vpop.f32.mrf.mxu0 }
 0x34f   : > { %v6523_v38 = vpop.f32.mrf.mxu1 }
 0x381   : > { %v2045_v30 = vpop.f32.mrf.mxu1 }
 0x382   : > { %v2135_v50 = vadd.f32 %v2134_v44, %v2045_v30  ;;  %v2154_v44 = vpop.f32.mrf.mxu0  ;;  %v1893_v30 = vadd.f32 %v6523_v38, %v6519_v1 }
 0x383   : > { %v2047_v63 = vpop.f32.mrf.mxu1 }
 0x384   : > { %v2137_v57 = vadd.f32 %v2136_v56, %v2047_v63  ;;  %v6530_v15 = vmax.f32 %v1873_v3, %v2135_v50 }
 0x385   : > { %v2051_v8 = vpop.f32.mrf.mxu1 }
 0x386   : > { %v2141_v36 = vadd.f32 %v2140_v54, %v2051_v8  ;;  %v6541_v35 = vmax.f32 %v1875_v55, %v2137_v57  ;;  %v2209_v2 = vrot.slane %v6530_v15, 2  ;;  %v2173_v62 = vrot.slane %v6530_v15, 1 }
 0x387   : > { %v2053_v18 = vpop.f32.mrf.mxu1  ;;  %v1891_v57 = vadd.f32 %v6521_v58, %v6508_v14  ;;  %v2244_v1 = vrot.slane %v6530_v15, 3 }
 0x388   : > { %v6543_v21 = vmax.f32 %v1879_v13, %v2141_v36  ;;  %v2143_v49 = vadd.f32 %v2142_v7, %v2053_v18  ;;  %v2212_v40 = vrot.slane %v6541_v35, 2  ;;  %v2176_v47 = vrot.slane %v6541_v35, 1 }
 0x389   : > { %v2057_v26 = vpop.f32.mrf.mxu1  ;;  %v2285_v52 = vrot.slane %v6541_v35, 4 }
 0x38a   : > { %v6564_v11 = vmax.f32 %v1881_v51, %v2143_v49  ;;  %v2147_v46 = vadd.f32 %v2146_v10, %v2057_v26  ;;  %v2210_v24 = vrot.slane %v6543_v21, 2  ;;  %v2174_v29 = vrot.slane %v6543_v21, 1 }
 0x38b   : > { %v2059_v25 = vpop.f32.mrf.mxu1  ;;  %v2245_v63 = vrot.slane %v6543_v21, 3 }
 0x38c   : > { %v6574_v9 = vmax.f32 %v1885_v17, %v2147_v46  ;;  %v2149_v33 = vadd.f32 %v2148_v5, %v2059_v25  ;;  %v2213_v41 = vrot.slane %v6564_v11, 2  ;;  %v2177_v39 = vrot.slane %v6564_v11, 1 }
 0x38d   : > { %v2063_v16 = vpop.f32.mrf.mxu1  ;;  %v2211_v6 = vsel %vm494_vm1, %v2209_v2, %v2210_v24  ;;  %v2175_v34 = vsel %vm457_vm3, %v2173_v62, %v2174_v29  ;;  %v2246_v51 = vsel %vm531_vm2, %v2244_v1, %v2245_v63  ;;  %v2286_v2 = vrot.slane %v6564_v11, 4 }
 0x38e   : > { %v6580_v37 = vmax.f32 %v1887_v59, %v2149_v33  ;;  %v2214_v12 = vsel %vm494_vm1, %v2212_v40, %v2213_v41  ;;  %v2153_v42 = vadd.f32 %v2152_v0, %v2063_v16  ;;  %v2178_v54 = vsel %vm457_vm3, %v2176_v47, %v2177_v39 }
 0x38f   : > { %v2065_v56 = vpop.f32.mrf.mxu1  ;;  %v4700_v32 = vpack.i.bf16 %v2214_v12, %v2211_v6  ;;  %v2215_v7 = vrot.slane %v6574_v9, 2  ;;  %v4695_v50 = vpack.i.bf16 %v2178_v54, %v2175_v34  ;;  %v2179_v14 = vrot.slane %v6574_v9, 1 }
 0x390   : > { %v2155_v10 = vadd.f32 %v2154_v44, %v2065_v56  ;;  %v2217_v3 = vrot.slane %v6580_v37, 2  ;;  %v2181_v8 = vrot.slane %v6580_v37, 1  ;;  %v2163_v38 = vmax.f32 %v1891_v57, %v2153_v42 }
 0x391   : > { %4701 = vrot.lane.b32.xlu1 %v4700_v32, %s4739_s30  ;;  %4696 = vrot.lane.b32.xlu0 %v4695_v50, %s4740_s14  ;;  %v2216_v13 = vsel %vm494_vm1, %v2210_v24, %v2215_v7  ;;  %v2250_v5 = vrot.slane %v6574_v9, 3  ;;  %v2180_v31 = vsel %vm457_vm3, %v2174_v29, %v2179_v14  ;;  %v2283_v29 = vrot.slane %v6543_v21, 4 }
 0x392   : > { %v6595_v55 = vmax.f32 %v1893_v30, %v2155_v10  ;;  %v2218_v36 = vsel %vm494_vm1, %v2213_v41, %v2217_v3  ;;  %v2182_v18 = vsel %vm457_vm3, %v2177_v39, %v2181_v8  ;;  %v2219_v49 = vrot.slane %v2163_v38, 2 }
 0x393   : > { %v4705_v58 = vpack.i.bf16 %v2218_v36, %v2216_v13  ;;  %v2183_v22 = vrot.slane %v2163_v38, 1  ;;  %v4710_v45 = vpack.i.bf16 %v2182_v18, %v2180_v31  ;;  %v2251_v43 = vsel %vm531_vm2, %v2245_v63, %v2250_v5  ;;  %v2639_v18 = vld [vmem:[%s8033_s3 + $0x9c0] sm:$0xff]  ;;  %v2637_v31 = vld [vmem:[%s8033_s3 + $0x9b0] sm:$0xff] }
 0x394   : > { %v2221_v19 = vrot.slane %v6595_v55, 2  ;;  %v2185_v48 = vrot.slane %v6595_v55, 1  ;;  %v2220_v27 = vsel %vm494_vm1, %v2215_v7, %v2219_v49  ;;  %v2254_v24 = vrot.slane %v2163_v38, 3  ;;  %v2558_v49 = vld [vmem:[%s8033_s3 + $0x738] sm:$0xff] }
 0x395   : > { %4706 = vrot.lane.b32.xlu1 %v4705_v58, %s4739_s30  ;;  %2258 = vrot.lane.b32.xlu0 %v2246_v51, %s4735_s22  ;;  %v2184_v28 = vsel %vm457_vm3, %v2179_v14, %v2183_v22  ;;  %v2282_v59 = vrot.slane %v6530_v15, 4  ;;  %v2288_v62 = vrot.slane %v6574_v9, 4  ;;  %v2287_v33 = vsel %vm568_vm0, %v2285_v52, %v2286_v2  ;;  %v2562_v14 = vld [vmem:[%s8033_s3 + $0x758] sm:$0xff]  ;;  %v2636_v22 = vld [vmem:[%s8033_s3 + $0x9a8] sm:$0xff] }
 0x396   : > { %v2222_v17 = vsel %vm494_vm1, %v2217_v3, %v2221_v19  ;;  %v2186_v26 = vsel %vm457_vm3, %v2181_v8, %v2185_v48  ;;  %v2255_v0 = vsel %vm531_vm2, %v2250_v5, %v2254_v24  ;;  %v2290_v41 = vrot.slane %v6580_v37, 4  ;;  %v2561_v5 = vld [vmem:[%s8033_s3 + $0x750] sm:$0xff]  ;;  %v2559_v48 = vld [vmem:[%s8033_s3 + $0x740] sm:$0xff] }
 0x397   : > { %v4715_v20 = vpack.i.bf16 %v2222_v17, %v2220_v27  ;;  %v4720_v46 = vpack.i.bf16 %v2186_v26, %v2184_v28  ;;  %v2284_v25 = vsel %vm568_vm0, %v2282_v59, %v2283_v29  ;;  %v2289_v40 = vsel %vm568_vm0, %v2283_v29, %v2288_v62  ;;  %v2556_v26 = vld [vmem:[%s8033_s3 + $0x728] sm:$0xff]  ;;  %v2555_v24 = vld [vmem:[%s8033_s3 + $0x720] sm:$0xff]  ;;  %v2633_v29 = vld [vmem:[%s8033_s3 + $0x990] sm:$0xff] }
 0x398   : > { %v2292_v16 = vrot.slane %v2163_v38, 4  ;;  %v2291_v47 = vsel %vm568_vm0, %v2286_v2, %v2290_v41  ;;  %v2294_v6 = vrot.slane %v6595_v55, 4  ;;  %v2248_v12 = vrot.slane %v6564_v11, 3  ;;  %v2564_v38 = vld [vmem:[%s8033_s3 + $0x768] sm:$0xff] }
 0x399   : > { %2262 = vrot.lane.b32.xlu1 %v2251_v43, %s4735_s22  ;;  %4711 = vrot.lane.b32.xlu0 %v4710_v45, %s4740_s14  ;;  %v2247_v34 = vrot.slane %v6541_v35, 3  ;;  %v2252_v56 = vrot.slane %v6580_v37, 3  ;;  %v2256_v32 = vrot.slane %v6595_v55, 3  ;;  %vm4162_vm1 = vcmask 519168  }
 0x39a   : > { %v2293_v39 = vsel %vm568_vm0, %v2288_v62, %v2292_v16  ;;  %v2295_v44 = vsel %vm568_vm0, %v2290_v41, %v2294_v6  ;;  %v2552_v16 = vld [vmem:[%s8033_s3 + $0x708] sm:$0xff]  ;;  %vm4159_vm0 = vcmask 523264  }
 0x39b   : > { %v2249_v42 = vsel %vm531_vm2, %v2247_v34, %v2248_v12  ;;  %v2253_v54 = vsel %vm531_vm2, %v2248_v12, %v2252_v56  ;;  %v2257_v7 = vsel %vm531_vm2, %v2252_v56, %v2256_v32  ;;  %v2628_v6 = vld [vmem:[%s8033_s3 + $0x968] sm:$0xff]  ;;  %v2549_v34 = vld [vmem:[%s8033_s3 + $0x6f0] sm:$0xff] }
 0x39c   : > { %v2625_v56 = vld [vmem:[%s8033_s3 + $0x950] sm:$0xff] }
 0x39d   : > { %4716 = vrot.lane.b32.xlu0 %v4715_v20, %s4739_s30  ;;  %4721 = vrot.lane.b32.xlu1 %v4720_v46, %s4740_s14  ;;  %v2634_v46 = vld [vmem:[%s8033_s3 + $0x998] sm:$0xff] }
 0x3a1   : > { %2266 = vrot.lane.b32.xlu0 %v2255_v0, %s4735_s22  ;;  %2296 = vrot.lane.b32.xlu1 %v2284_v25, %s4741_s19  ;;  %v2553_v0 = vld [vmem:[%s8033_s3 + $0x710] sm:$0xff]  ;;  %v2631_v25 = vld [vmem:[%s8033_s3 + $0x980] sm:$0xff] }
 0x3a5   : > { %2298 = vrot.lane.b32.xlu0 %v2287_v33, %s4741_s19  ;;  %2300 = vrot.lane.b32.xlu1 %v2289_v40, %s4741_s19 }
 0x3a9   : > { %2302 = vrot.lane.b32.xlu0 %v2291_v47, %s4741_s19  ;;  %2304 = vrot.lane.b32.xlu1 %v2293_v39, %s4741_s19  ;;  %v2630_v47 = vld [vmem:[%s8033_s3 + $0x978] sm:$0xff] }
 0x3aa   : > { %v2550_v39 = vld [vmem:[%s8033_s3 + $0x6f8] sm:$0xff] }
 0x3ad   : > { %2306 = vrot.lane.b32.xlu0 %v2295_v44, %s4741_s19  ;;  %2260 = vrot.lane.b32.xlu1 %v2249_v42, %s4735_s22  ;;  %v2627_v44 = vld [vmem:[%s8033_s3 + $0x960] sm:$0xff]  ;;  %s4286_s19 = sshll.u32 %s8045_s26, 5 }
 0x3ae   : > { %v2547_v42 = vld [vmem:[%s8033_s3 + $0x6e0] sm:$0xff] }
 0x3b1   : > { %2264 = vrot.lane.b32.xlu0 %v2253_v54, %s4735_s22  ;;  %2268 = vrot.lane.b32.xlu1 %v2257_v7, %s4735_s22  ;;  %s440_s22 = scalar_lea.vmem %s8043_s13, %s4286_s19 }
 0x403   : > { %v4702_v30 = vpop.permute.xlu1 %4701  ;;  %v4697_v63 = vpop.permute.xlu0 %4696 }
 0x404   : > { %v4704_v10 = vunpack.i.h.bf16 %v4702_v30  ;;  %v4703_v50 = vunpack.i.l.bf16 %v4702_v30  ;;  %v4699_v57 = vunpack.i.h.bf16 %v4697_v63  ;;  %v4698_v3 = vunpack.i.l.bf16 %v4697_v63 }
 0x406   : > { %v2235_v8 = vsel %vm1704_vm11, %v4703_v50, %v4704_v10  ;;  %v2200_v55 = vsel %vm2199_vm12, %v4698_v3, %v4699_v57  ;;  %v6648_v1 = vsel %vm2199_vm12, %v6541_v35, %v4698_v3  ;;  %v2546_v10 = vld [vmem:[%s8033_s3 + $0x6d8] sm:$0xff] }
 0x407   : > { %v4707_v13 = vpop.permute.xlu1 %4706  ;;  %v6653_v36 = vpop.permute.xlu0 %2258  ;;  %2730 = vmatprep.mubr.f32.mxu0 %v6648_v1  ;;  %v6672_v19 = vsel %vm1704_vm11, %v2200_v55, %v4703_v50  ;;  %v2624_v50 = vld [vmem:[%s8033_s3 + $0x948] sm:$0xff]  ;;  %v2622_v3 = vld [vmem:[%s8033_s3 + $0x938] sm:$0xff]  ;;  %v2543_v55 = vld [vmem:[%s8033_s3 + $0x6c0] sm:$0xff] }
 0x408   : > { %v4709_v58 = vunpack.i.h.bf16 %v4707_v13  ;;  %v4708_v51 = vunpack.i.l.bf16 %v4707_v13  ;;  %2731 = vmatmul.mubr.f32.vlgmr.msra.gmra.mxu0 %v6530_v15  ;;  %v6662_v35 = vsel %vm613_vm7, %v2235_v8, %v6653_v36 }
 0x409   : > { %2833 = vmatpush1.msra.mxu0 %v2564_v38  ;;  %2813 = vmatprep.mubr.f32.mxu1 %v6662_v35  ;;  %v2621_v38 = vld [vmem:[%s8033_s3 + $0x930] sm:$0xff] }
 0x40a   : > { %2834 = vmatprep.subr.mxu0 %v2562_v14  ;;  %2814 = vmatmul.mubr.f32.vlgmr.msra.gmra.mxu1 %v6672_v19  ;;  %v2236_v45 = vsel %vm1704_vm11, %v4708_v51, %v4709_v58  ;;  %v2541_v14 = vld [vmem:[%s8033_s3 + $0x6b0] sm:$0xff]  ;;  %v2619_v58 = vld [vmem:[%s8033_s3 + $0x920] sm:$0xff] }
 0x40b   : > { %2835 = vmatpush1.msra.mxu0 %v2561_v5  ;;  %2930 = vmatpush1.msra.mxu1 %v2639_v18  ;;  %v6688_v43 = vpop.permute.xlu1 %2262  ;;  %v4712_v17 = vpop.permute.xlu0 %4711  ;;  %v2618_v5 = vld [vmem:[%s8033_s3 + $0x918] sm:$0xff] }
 0x40c   : > { %v4714_v27 = vunpack.i.h.bf16 %v4712_v17  ;;  %v4713_v28 = vunpack.i.l.bf16 %v4712_v17  ;;  %2836 = vmatprep.subr.mxu0 %v2559_v48  ;;  %2931 = vmatprep.subr.mxu1 %v2637_v31  ;;  %v6695_v20 = vsel %vm613_vm7, %v2236_v45, %v6688_v43  ;;  %v2538_v48 = vld [vmem:[%s8033_s3 + $0x698] sm:$0xff]  ;;  %v2616_v31 = vld [vmem:[%s8033_s3 + $0x908] sm:$0xff]  ;;  %v2535_v17 = vld [vmem:[%s8033_s3 + $0x680] sm:$0xff] }
 0x40d   : > { %2837 = vmatpush1.msra.mxu0 %v2558_v49  ;;  %2932 = vmatpush1.msra.mxu1 %v2636_v22  ;;  %v2537_v49 = vld [vmem:[%s8033_s3 + $0x690] sm:$0xff]  ;;  %v2615_v22 = vld [vmem:[%s8033_s3 + $0x900] sm:$0xff] }
 0x40e   : > { %2819 = vmatprep.mubr.f32.mxu1 %v6695_v20  ;;  %2838 = vmatprep.subr.mxu0 %v2556_v26  ;;  %v6709_v59 = vsel %vm2199_vm12, %v6564_v11, %v4713_v28  ;;  %v2201_v2 = vsel %vm2199_vm12, %v4713_v28, %v4714_v27  ;;  %v2422_v26 = vld [vmem:[%s8033_s3 + $0x2f8] sm:$0xff] }
 0x40f   : > { %2933 = vmatprep.subr.mxu1 %v2634_v46  ;;  %2839 = vmatpush1.msra.mxu0 %v2555_v24  ;;  %v4717_v62 = vpop.permute.xlu0 %4716  ;;  %v4722_v52 = vpop.permute.xlu1 %4721  ;;  %v6719_v33 = vsel %vm1704_vm11, %v2201_v2, %v4708_v51  ;;  %v2540_v51 = vld [vmem:[%s8033_s3 + $0x6a8] sm:$0xff]  ;;  %v2534_v27 = vld [vmem:[%s8033_s3 + $0x678] sm:$0xff]  ;;  %v2371_v2 = vld [vmem:[%s8033_s3 + $0x160] sm:$0xff] }
 0x410   : > { %2934 = vmatpush1.msra.mxu1 %v2633_v29  ;;  %2736 = vmatprep.mubr.f32.mxu0 %v6709_v59  ;;  %v4719_v11 = vunpack.i.h.bf16 %v4717_v62  ;;  %v4718_v40 = vunpack.i.l.bf16 %v4717_v62  ;;  %v4723_v41 = vunpack.i.l.bf16 %v4722_v52  ;;  %v4724_v12 = vunpack.i.h.bf16 %v4722_v52  ;;  %v2374_v28 = vld [vmem:[%s8033_s3 + $0x178] sm:$0xff]  ;;  %v2532_v24 = vld [vmem:[%s8033_s3 + $0x668] sm:$0xff]  ;;  %v2419_v29 = vld [vmem:[%s8033_s3 + $0x2e0] sm:$0xff] }
 0x411   : > { %2840 = vmatprep.subr.mxu0 %v2553_v0  ;;  %2935 = vmatprep.subr.mxu1 %v2631_v25  ;;  %v2531_v25 = vld [vmem:[%s8033_s3 + $0x660] sm:$0xff]  ;;  %v2529_v62 = vld [vmem:[%s8033_s3 + $0x650] sm:$0xff] }
 0x412   : > { %2737 = vmatmul.mubr.f32.gmra.mxu0 %v6543_v21  ;;  %2820 = vmatmul.mubr.f32.gmra.mxu1 %v6719_v33  ;;  %v2237_v7 = vsel %vm1704_vm11, %v4718_v40, %v4719_v11  ;;  %v6755_v30 = vsel %vm2199_vm12, %v6580_v37, %v4723_v41  ;;  %v2544_v37 = vld [vmem:[%s8033_s3 + $0x6c8] sm:$0xff]  ;;  %v2202_v57 = vsel %vm2199_vm12, %v4723_v41, %v4724_v12  ;;  %v2525_v12 = vld [vmem:[%s8033_s3 + $0x630] sm:$0xff] }
 0x413   : > { %2841 = vmatpush1.msra.mxu0 %v2552_v16  ;;  %2936 = vmatpush1.msra.mxu1 %v2630_v47  ;;  %v6748_v32 = vpop.permute.xlu0 %2266  ;;  %v6750_v54 = vpop.permute.xlu1 %2296  ;;  %v6786_v13 = vsel %vm1704_vm11, %v2202_v57, %v4718_v40  ;;  %v2416_v11 = vld [vmem:[%s8033_s3 + $0x2c8] sm:$0xff]  ;;  %v2526_v47 = vld [vmem:[%s8033_s3 + $0x638] sm:$0xff]  ;;  %v2519_v57 = vld [vmem:[%s8033_s3 + $0x600] sm:$0xff] }
 0x414   : > { %2842 = vmatprep.subr.mxu0 %v2550_v39  ;;  %2937 = vmatprep.subr.mxu1 %v2628_v6  ;;  %v6765_v63 = vsel %vm613_vm7, %v2237_v7, %v6748_v32  ;;  %v2528_v40 = vld [vmem:[%s8033_s3 + $0x648] sm:$0xff]  ;;  %v2413_v6 = vld [vmem:[%s8033_s3 + $0x2b0] sm:$0xff] }
 0x415   : > { %2843 = vmatpush1.msra.mxu0 %v2549_v34  ;;  %2938 = vmatpush1.msra.mxu1 %v2627_v44  ;;  %v2368_v41 = vld [vmem:[%s8033_s3 + $0x148] sm:$0xff]  ;;  %v2365_v44 = vld [vmem:[%s8033_s3 + $0x130] sm:$0xff] }
 0x416   : > { %2844 = vmatprep.subr.mxu0 %v2547_v42  ;;  %2939 = vmatprep.subr.mxu1 %v2625_v56  ;;  %v2523_v42 = vld [vmem:[%s8033_s3 + $0x620] sm:$0xff]  ;;  %v2410_v56 = vld [vmem:[%s8033_s3 + $0x298] sm:$0xff] }
 0x417   : > { %2742 = vmatprep.mubr.f32.mxu0 %v6755_v30  ;;  %2845 = vmatpush1.msra.mxu0 %v2546_v10  ;;  %v6775_v8 = vpop.permute.xlu1 %2300  ;;  %v2299_v18 = vpop.permute.xlu0 %2298  ;;  %v2362_v10 = vld [vmem:[%s8033_s3 + $0x118] sm:$0xff] }
 0x418   : > { %2743 = vmatmul.mubr.f32.gmra.mxu0 %v6574_v9  ;;  %2940 = vmatpush1.msra.mxu1 %v2624_v50  ;;  %v6829_v46 = vsel %vm2308_vm13, %v6750_v54, %v2299_v18  ;;  %v2520_v50 = vld [vmem:[%s8033_s3 + $0x608] sm:$0xff]  ;;  %v2353_v18 = vld [vmem:[%s8033_s3 + $0xd0] sm:$0xff] }
 0x419   : > { %2825 = vmatprep.mubr.f32.mxu1 %v6765_v63  ;;  %2846 = vmatprep.subr.mxu0 %v2544_v37  ;;  %v2407_v37 = vld [vmem:[%s8033_s3 + $0x280] sm:$0xff] }
 0x41a   : > { %2941 = vmatprep.subr.mxu1 %v2622_v3  ;;  %2826 = vmatmul.mubr.f32.gmra.mxu1 %v6786_v13  ;;  %v2359_v3 = vld [vmem:[%s8033_s3 + $0x100] sm:$0xff] }
 0x41b   : > { %2847 = vmatpush1.msra.mxu0 %v2543_v55  ;;  %2942 = vmatpush1.msra.mxu1 %v2621_v38  ;;  %v6813_v45 = vpop.permute.xlu1 %2304  ;;  %v2303_v0 = vpop.permute.xlu0 %2302  ;;  %v2613_v55 = vld [vmem:[%s8033_s3 + $0x8f0] sm:$0xff]  ;;  %v2404_v38 = vld [vmem:[%s8033_s3 + $0x268] sm:$0xff] }
 0x41c   : > { %2848 = vmatprep.subr.mxu0 %v2541_v14  ;;  %2943 = vmatprep.subr.mxu1 %v2619_v58  ;;  %v6863_v16 = vsel %vm2308_vm13, %v6775_v8, %v2303_v0  ;;  %v2612_v14 = vld [vmem:[%s8033_s3 + $0x8e8] sm:$0xff] }
 0x41d   : > { %2849 = vmatpush1.msra.mxu0 %v2540_v51  ;;  %2944 = vmatpush1.msra.mxu1 %v2618_v5  ;;  %v2356_v58 = vld [vmem:[%s8033_s3 + $0xe8] sm:$0xff]  ;;  %v2401_v51 = vld [vmem:[%s8033_s3 + $0x250] sm:$0xff] }
 0x41e   : > { %2850 = vmatprep.subr.mxu0 %v2538_v48  ;;  %2945 = vmatprep.subr.mxu1 %v2616_v31  ;;  %v2609_v5 = vld [vmem:[%s8033_s3 + $0x8d0] sm:$0xff]  ;;  %v2607_v48 = vld [vmem:[%s8033_s3 + $0x8c0] sm:$0xff]  ;;  %v2398_v31 = vld [vmem:[%s8033_s3 + $0x238] sm:$0xff] }
 0x41f   : > { %2851 = vmatpush1.msra.mxu0 %v2537_v49  ;;  %2946 = vmatpush1.msra.mxu1 %v2615_v22  ;;  %v6849_v52 = vpop.permute.xlu1 %2260  ;;  %v2307_v34 = vpop.permute.xlu0 %2306  ;;  %v2606_v49 = vld [vmem:[%s8033_s3 + $0x8b8] sm:$0xff]  ;;  %v2600_v0 = vld [vmem:[%s8033_s3 + $0x888] sm:$0xff] }
 0x420   : > { %2979 = vmatprep.mubr.f32.mxu1 %v4733_v4  ;;  %2852 = vmatprep.subr.mxu0 %v2535_v17  ;;  %v6871_v39 = vsel %vm2308_vm13, %v6849_v52, %v6750_v54  ;;  %v2522_v54 = vld [vmem:[%s8033_s3 + $0x618] sm:$0xff]  ;;  %v6896_v7 = vsel %vm2308_vm13, %v6813_v45, %v2307_v34  ;;  %v2604_v17 = vld [vmem:[%s8033_s3 + $0x8a8] sm:$0xff] }
 0x421   : > { %4375 = vmatprep.subr.mxu1 %v2422_v26  ;;  %4269 = vmatmul.mubr.msk.f32.vlgmr.msra.gmra.mxu1 %vm2659_vm14, %v6829_v46  ;;  %v2350_v22 = vld [vmem:[%s8033_s3 + $0xb8] sm:$0xff]  ;;  %v2395_v26 = vld [vmem:[%s8033_s3 + $0x220] sm:$0xff]  ;;  %v2592_v34 = vld [vmem:[%s8033_s3 + $0x848] sm:$0xff] }
 0x422   : > { %2853 = vmatpush1.msra.mxu0 %v2534_v27  ;;  %4376 = vmatpush3.msra.mxu1 %v2374_v28  ;;  %v2603_v27 = vld [vmem:[%s8033_s3 + $0x8a0] sm:$0xff] }
 0x423   : > { %2854 = vmatprep.subr.mxu0 %v2532_v24  ;;  %4377 = vmatprep.subr.mxu1 %v2419_v29  ;;  %v2347_v28 = vld [vmem:[%s8033_s3 + $0xa0] sm:$0xff]  ;;  %v2601_v24 = vld [vmem:[%s8033_s3 + $0x890] sm:$0xff]  ;;  %v2392_v29 = vld [vmem:[%s8033_s3 + $0x208] sm:$0xff] }
 0x424   : > { %2855 = vmatpush1.msra.mxu0 %v2531_v25  ;;  %2985 = vmatprep.mubr.f32.mxu1 %v4733_v4  ;;  %v2344_v25 = vld [vmem:[%s8033_s3 + $0x88] sm:$0xff] }
 0x425   : > { %4378 = vmatpush3.msra.mxu1 %v2371_v2  ;;  %2856 = vmatprep.subr.mxu0 %v2529_v62  ;;  %v2598_v2 = vld [vmem:[%s8033_s3 + $0x878] sm:$0xff]  ;;  %v2389_v62 = vld [vmem:[%s8033_s3 + $0x1f0] sm:$0xff] }
 0x426   : > { %4270 = vmatmul.mubr.msk.f32.gmra.mxu1 %vm2659_vm14, %v6863_v16  ;;  %4379 = vmatprep.subr.mxu1 %v2416_v11  ;;  %v2597_v11 = vld [vmem:[%s8033_s3 + $0x870] sm:$0xff] }
 0x427   : > { %2857 = vmatpush1.msra.mxu0 %v2528_v40  ;;  %4380 = vmatpush3.msra.mxu1 %v2368_v41  ;;  %v2341_v40 = vld [vmem:[%s8033_s3 + $0x70] sm:$0xff]  ;;  %v2595_v41 = vld [vmem:[%s8033_s3 + $0x860] sm:$0xff] }
 0x428   : > { %2858 = vmatprep.subr.mxu0 %v2526_v47  ;;  %2896 = vmatprep.mubr.f32.mxu0 %v6871_v39  ;;  %v2386_v47 = vld [vmem:[%s8033_s3 + $0x1d8] sm:$0xff] }
 0x429   : > { %4381 = vmatprep.subr.mxu1 %v2413_v6  ;;  %2859 = vmatpush1.msra.mxu0 %v2525_v12  ;;  %v2594_v6 = vld [vmem:[%s8033_s3 + $0x858] sm:$0xff] }
 0x42a   : > { %2991 = vmatprep.mubr.f32.mxu1 %v4733_v4  ;;  %4382 = vmatpush3.msra.mxu1 %v2365_v44  ;;  %v2338_v12 = vld [vmem:[%s8033_s3 + $0x58] sm:$0xff]  ;;  %v2383_v44 = vld [vmem:[%s8033_s3 + $0x1c0] sm:$0xff] }
 0x42b   : > { %2860 = vmatprep.subr.mxu0 %v2523_v42  ;;  %4271 = vmatmul.mubr.msk.f32.gmra.mxu1 %vm2659_vm14, %v6896_v7  ;;  %v2591_v42 = vld [vmem:[%s8033_s3 + $0x840] sm:$0xff] }
 0x42c   : > { %4383 = vmatprep.subr.mxu1 %v2410_v56  ;;  %2861 = vmatpush1.msra.mxu0 %v2522_v54  ;;  %v2335_v56 = vld [vmem:[%s8033_s3 + $0x40] sm:$0xff]  ;;  %v2589_v54 = vld [vmem:[%s8033_s3 + $0x830] sm:$0xff] }
 0x42d   : > { %4384 = vmatpush3.msra.mxu1 %v2362_v10  ;;  %3062 = vmatprep.mubr.f32.mxu1 %v6648_v1  ;;  %v2610_v1 = vld [vmem:[%s8033_s3 + $0x8d8] sm:$0xff]  ;;  %v2380_v10 = vld [vmem:[%s8033_s3 + $0x1a8] sm:$0xff] }
 0x42e   : > { %2862 = vmatprep.subr.mxu0 %v2520_v50  ;;  %4385 = vmatprep.subr.mxu1 %v2407_v37  ;;  %v2588_v50 = vld [vmem:[%s8033_s3 + $0x828] sm:$0xff] }
 0x42f   : > { %2863 = vmatpush1.msra.mxu0 %v2519_v57  ;;  %4386 = vmatpush3.msra.mxu1 %v2359_v3  ;;  %v2332_v37 = vld [vmem:[%s8033_s3 + $0x28] sm:$0xff]  ;;  %v2586_v57 = vld [vmem:[%s8033_s3 + $0x818] sm:$0xff]  ;;  %v2377_v3 = vld [vmem:[%s8033_s3 + $0x190] sm:$0xff] }
 0x430   : > { %2864 = vmatprep.subr.mxu0 %v2613_v55  ;;  %4387 = vmatprep.subr.mxu1 %v2404_v38  ;;  %v2585_v55 = vld [vmem:[%s8033_s3 + $0x810] sm:$0xff] }
 0x431   : > { %2865 = vmatpush2.msra.mxu0 %v2612_v14  ;;  %4388 = vmatpush3.msra.mxu1 %v2356_v58  ;;  %v2329_v38 = vld [vmem:[%s8033_s3 + $0x10] sm:$0xff]  ;;  %v2583_v14 = vld [vmem:[%s8033_s3 + $0x800] sm:$0xff]  ;;  %v2518_v58 = vld [vmem:[%s8033_s3 + $0x5f8] sm:$0xff] }
 0x432   : > { %2866 = vmatprep.subr.mxu0 %v2610_v1  ;;  %4389 = vmatprep.subr.mxu1 %v2401_v51  ;;  %v2582_v1 = vld [vmem:[%s8033_s3 + $0x7f8] sm:$0xff] }
 0x433   : > { %2867 = vmatpush2.msra.mxu0 %v2609_v5  ;;  %4390 = vmatpush3.msra.mxu1 %v2353_v18  ;;  %v2470_v51 = vld [vmem:[%s8033_s3 + $0x478] sm:$0xff]  ;;  %v2580_v5 = vld [vmem:[%s8033_s3 + $0x7e8] sm:$0xff]  ;;  %v2515_v18 = vld [vmem:[%s8033_s3 + $0x5e0] sm:$0xff] }
 0x434   : > { %2868 = vmatprep.subr.mxu0 %v2607_v48  ;;  %4391 = vmatprep.subr.mxu1 %v2398_v31  ;;  %v2579_v48 = vld [vmem:[%s8033_s3 + $0x7e0] sm:$0xff] }
 0x435   : > { %2869 = vmatpush2.msra.mxu0 %v2606_v49  ;;  %4392 = vmatpush3.msra.mxu1 %v2350_v22  ;;  %v2467_v31 = vld [vmem:[%s8033_s3 + $0x460] sm:$0xff]  ;;  %v2512_v49 = vld [vmem:[%s8033_s3 + $0x5c8] sm:$0xff] }
 0x436   : > { %2870 = vmatprep.subr.mxu0 %v2604_v17  ;;  %4393 = vmatprep.subr.mxu1 %v2395_v26  ;;  %v2576_v22 = vld [vmem:[%s8033_s3 + $0x7c8] sm:$0xff]  ;;  %v2574_v17 = vld [vmem:[%s8033_s3 + $0x7b8] sm:$0xff]  ;;  %v2509_v26 = vld [vmem:[%s8033_s3 + $0x5b0] sm:$0xff] }
 0x437   : > { %2871 = vmatpush2.msra.mxu0 %v2603_v27  ;;  %4394 = vmatpush3.msra.mxu1 %v2347_v28  ;;  %v2573_v27 = vld [vmem:[%s8033_s3 + $0x7b0] sm:$0xff] }
 0x438   : > { %2872 = vmatprep.subr.mxu0 %v2601_v24  ;;  %4395 = vmatprep.subr.mxu1 %v2392_v29  ;;  %v2461_v28 = vld [vmem:[%s8033_s3 + $0x430] sm:$0xff]  ;;  %v2506_v24 = vld [vmem:[%s8033_s3 + $0x598] sm:$0xff] }
 0x439   : > { %2873 = vmatpush2.msra.mxu0 %v2600_v0  ;;  %4396 = vmatpush3.msra.mxu1 %v2344_v25  ;;  %v2570_v29 = vld [vmem:[%s8033_s3 + $0x798] sm:$0xff]  ;;  %v2568_v0 = vld [vmem:[%s8033_s3 + $0x788] sm:$0xff]  ;;  %v2503_v25 = vld [vmem:[%s8033_s3 + $0x580] sm:$0xff] }
 0x43a   : > { %2874 = vmatprep.subr.mxu0 %v2598_v2  ;;  %4397 = vmatprep.subr.mxu1 %v2389_v62  ;;  %v2567_v2 = vld [vmem:[%s8033_s3 + $0x780] sm:$0xff] }
 0x43b   : > { %2875 = vmatpush2.msra.mxu0 %v2597_v11  ;;  %4398 = vmatpush3.msra.mxu1 %v2341_v40  ;;  %v2455_v62 = vld [vmem:[%s8033_s3 + $0x400] sm:$0xff]  ;;  %v2265_v11 = vpop.permute.xlu0 %2264  ;;  %v2614_v40 = vld [vmem:[%s8033_s3 + $0x8f8] sm:$0xff] }
 0x43c   : > { %2876 = vmatprep.subr.mxu0 %v2595_v41  ;;  %4399 = vmatprep.subr.mxu1 %v2386_v47  ;;  %v7124_v41 = vsel %vm613_vm7, %v6653_v36, %v6849_v52  ;;  %v2566_v47 = vld [vmem:[%s8033_s3 + $0x778] sm:$0xff]  ;;  %v2497_v36 = vld [vmem:[%s8033_s3 + $0x550] sm:$0xff]  ;;  %v2611_v52 = vld [vmem:[%s8033_s3 + $0x8e0] sm:$0xff] }
 0x43d   : > { %2877 = vmatpush2.msra.mxu0 %v2594_v6  ;;  %4400 = vmatpush3.msra.mxu1 %v2338_v12  ;;  %v7135_v6 = vsel %vm2308_vm13, %v2265_v11, %v6775_v8  ;;  %v2449_v12 = vld [vmem:[%s8033_s3 + $0x3d0] sm:$0xff]  ;;  %v2563_v8 = vld [vmem:[%s8033_s3 + $0x760] sm:$0xff] }
 0x43e   : > { %2878 = vmatprep.subr.mxu0 %v2592_v34  ;;  %4401 = vmatprep.subr.mxu1 %v2383_v44  ;;  %v2269_v34 = vpop.permute.xlu1 %2268  ;;  %v2494_v44 = vld [vmem:[%s8033_s3 + $0x538] sm:$0xff] }
 0x43f   : > { %2879 = vmatpush2.msra.mxu0 %v2591_v42  ;;  %4402 = vmatpush3.msra.mxu1 %v2335_v56  ;;  %v2608_v42 = vld [vmem:[%s8033_s3 + $0x8c8] sm:$0xff]  ;;  %v7158_v56 = vsel %vm613_vm7, %v6688_v43, %v2265_v11  ;;  %v2491_v43 = vld [vmem:[%s8033_s3 + $0x520] sm:$0xff]  ;;  %v2533_v11 = vld [vmem:[%s8033_s3 + $0x670] sm:$0xff] }
 0x440   : > { %2880 = vmatprep.subr.mxu0 %v2589_v54  ;;  %4403 = vmatprep.subr.mxu1 %v2380_v10  ;;  %v2446_v54 = vld [vmem:[%s8033_s3 + $0x3b8] sm:$0xff]  ;;  %v2560_v10 = vld [vmem:[%s8033_s3 + $0x748] sm:$0xff] }
 0x441   : > { %2881 = vmatpush2.msra.mxu0 %v2588_v50  ;;  %4404 = vmatpush3.msra.mxu1 %v2332_v37  ;;  %v7169_v50 = vsel %vm2308_vm13, %v2269_v34, %v6813_v45  ;;  %v2605_v37 = vld [vmem:[%s8033_s3 + $0x8b0] sm:$0xff] }
 0x442   : > { %2882 = vmatprep.subr.mxu0 %v2586_v57  ;;  %4405 = vmatprep.subr.mxu1 %v2377_v3  ;;  %v2443_v57 = vld [vmem:[%s8033_s3 + $0x3a0] sm:$0xff]  ;;  %v2557_v45 = vld [vmem:[%s8033_s3 + $0x730] sm:$0xff]  ;;  %v2488_v3 = vld [vmem:[%s8033_s3 + $0x508] sm:$0xff] }
 0x443   : > { %2883 = vmatpush2.msra.mxu0 %v2585_v55  ;;  %4406 = vmatpush3.msra.mxu1 %v2329_v38  ;;  %v2602_v55 = vld [vmem:[%s8033_s3 + $0x898] sm:$0xff]  ;;  %v2440_v38 = vld [vmem:[%s8033_s3 + $0x388] sm:$0xff] }
 0x444   : > { %2884 = vmatprep.subr.mxu0 %v2583_v14  ;;  %3063 = vmatmul.mubr.f32.vlgmr.msra.gmra.mxu1 %v6530_v15  ;;  %v2577_v15 = vld [vmem:[%s8033_s3 + $0x7d0] sm:$0xff]  ;;  %v7195_v14 = vsel %vm613_vm7, %v6748_v32, %v2269_v34  ;;  %v2626_v34 = vld [vmem:[%s8033_s3 + $0x958] sm:$0xff] }
 0x445   : > { %4416 = vmatprep.subr.mxu1 %v2518_v58  ;;  %2885 = vmatpush2.msra.mxu0 %v2582_v1  ;;  %v2554_v58 = vld [vmem:[%s8033_s3 + $0x718] sm:$0xff]  ;;  %v2485_v1 = vld [vmem:[%s8033_s3 + $0x4f0] sm:$0xff] }
 0x446   : > { %3067 = vmatprep.mubr.f32.mxu1 %v6709_v59  ;;  %4417 = vmatpush3.msra.mxu1 %v2470_v51  ;;  %v2464_v59 = vld [vmem:[%s8033_s3 + $0x448] sm:$0xff]  ;;  %v2599_v51 = vld [vmem:[%s8033_s3 + $0x880] sm:$0xff]  ;;  %v2437_v32 = vld [vmem:[%s8033_s3 + $0x370] sm:$0xff] }
 0x447   : > { %2886 = vmatprep.subr.mxu0 %v2580_v5  ;;  %4418 = vmatprep.subr.mxu1 %v2515_v18  ;;  %v2551_v5 = vld [vmem:[%s8033_s3 + $0x700] sm:$0xff]  ;;  %v2482_v18 = vld [vmem:[%s8033_s3 + $0x4d8] sm:$0xff] }
 0x448   : > { %2887 = vmatpush2.msra.mxu0 %v2579_v48  ;;  %4419 = vmatpush3.msra.mxu1 %v2467_v31  ;;  %v2596_v48 = vld [vmem:[%s8033_s3 + $0x868] sm:$0xff]  ;;  %v2434_v31 = vld [vmem:[%s8033_s3 + $0x358] sm:$0xff] }
 0x449   : > { %2888 = vmatprep.subr.mxu0 %v2577_v15  ;;  %3068 = vmatmul.mubr.f32.gmra.mxu1 %v6543_v21  ;;  %v2571_v21 = vld [vmem:[%s8033_s3 + $0x7a0] sm:$0xff]  ;;  %v2548_v15 = vld [vmem:[%s8033_s3 + $0x6e8] sm:$0xff] }
 0x44a   : > { %4420 = vmatprep.subr.mxu1 %v2512_v49  ;;  %2889 = vmatpush2.msra.mxu0 %v2576_v22  ;;  %v2593_v49 = vld [vmem:[%s8033_s3 + $0x850] sm:$0xff]  ;;  %v2431_v22 = vld [vmem:[%s8033_s3 + $0x340] sm:$0xff] }
 0x44b   : > { %3072 = vmatprep.mubr.f32.mxu1 %v6755_v30  ;;  %4421 = vmatpush3.msra.mxu1 %v2464_v59  ;;  %v2458_v30 = vld [vmem:[%s8033_s3 + $0x418] sm:$0xff]  ;;  %v2545_v59 = vld [vmem:[%s8033_s3 + $0x6d0] sm:$0xff] }
 0x44c   : > { %2890 = vmatprep.subr.mxu0 %v2574_v17  ;;  %4422 = vmatprep.subr.mxu1 %v2509_v26  ;;  %v2476_v17 = vld [vmem:[%s8033_s3 + $0x4a8] sm:$0xff]  ;;  %v2590_v26 = vld [vmem:[%s8033_s3 + $0x838] sm:$0xff] }
 0x44d   : > { %2891 = vmatpush2.msra.mxu0 %v2573_v27  ;;  %4423 = vmatpush3.msra.mxu1 %v2461_v28  ;;  %v2428_v27 = vld [vmem:[%s8033_s3 + $0x328] sm:$0xff]  ;;  %v2542_v28 = vld [vmem:[%s8033_s3 + $0x6b8] sm:$0xff] }
 0x44e   : > { %2892 = vmatprep.subr.mxu0 %v2571_v21  ;;  %3073 = vmatmul.mubr.f32.gmra.mxu1 %v6574_v9  ;;  %v2500_v9 = vld [vmem:[%s8033_s3 + $0x568] sm:$0xff]  ;;  %v2473_v21 = vld [vmem:[%s8033_s3 + $0x490] sm:$0xff] }
 0x44f   : > { %4424 = vmatprep.subr.mxu1 %v2506_v24  ;;  %2893 = vmatpush2.msra.mxu0 %v2570_v29  ;;  %v2587_v24 = vld [vmem:[%s8033_s3 + $0x820] sm:$0xff]  ;;  %v2425_v29 = vld [vmem:[%s8033_s3 + $0x310] sm:$0xff] }
 0x450   : > { %4425 = vmatpush3.msra.mxu1 %v2458_v30  ;;  %3142 = vmatprep.mubr.f32.mxu1 %v6662_v35  ;;  %v2452_v35 = vld [vmem:[%s8033_s3 + $0x3e8] sm:$0xff]  ;;  %v2539_v30 = vld [vmem:[%s8033_s3 + $0x6a0] sm:$0xff] }
 0x451   : > { %2894 = vmatprep.subr.mxu0 %v2568_v0  ;;  %4426 = vmatprep.subr.mxu1 %v2503_v25  ;;  %v2584_v0 = vld [vmem:[%s8033_s3 + $0x808] sm:$0xff] }
 0x452   : > { %2895 = vmatpush2.msra.mxu0 %v2567_v2  ;;  %4427 = vmatpush3.msra.mxu1 %v2455_v62  ;;  %v2536_v25 = vld [vmem:[%s8033_s3 + $0x688] sm:$0xff]  ;;  %v2641_v2 = vld [vmem:[%s8033_s3 + $0x9d0] sm:$0xff] }
 0x453   : > { %2897 = vmatmul.mubr.f32.vlgmr.msra.gmra.mxu0 %v7124_v41  ;;  %4428 = vmatprep.subr.mxu1 %v2500_v9  ;;  %v2581_v62 = vld [vmem:[%s8033_s3 + $0x7f0] sm:$0xff]  ;;  %v2638_v9 = vld [vmem:[%s8033_s3 + $0x9b8] sm:$0xff] }
 0x454   : > { %4457 = vmatprep.subr.mxu0 %v2614_v40  ;;  %2902 = vmatprep.mubr.f32.mxu0 %v7135_v6  ;;  %v2635_v40 = vld [vmem:[%s8033_s3 + $0x9a0] sm:$0xff] }
 0x455   : > { %4429 = vmatpush3.msra.mxu1 %v2452_v35  ;;  %4458 = vmatpush3.msra.mxu0 %v2566_v47  ;;  %v2575_v35 = vld [vmem:[%s8033_s3 + $0x7c0] sm:$0xff] }
 0x456   : > { %4430 = vmatprep.subr.mxu1 %v2497_v36  ;;  %4459 = vmatprep.subr.mxu0 %v2611_v52  ;;  %v2527_v47 = vld [vmem:[%s8033_s3 + $0x640] sm:$0xff]  ;;  %v2632_v36 = vld [vmem:[%s8033_s3 + $0x988] sm:$0xff]  ;;  %v2629_v52 = vld [vmem:[%s8033_s3 + $0x970] sm:$0xff] }
 0x457   : > { %4431 = vmatpush3.msra.mxu1 %v2449_v12  ;;  %4460 = vmatpush3.msra.mxu0 %v2563_v8  ;;  %v2569_v12 = vld [vmem:[%s8033_s3 + $0x790] sm:$0xff] }
 0x458   : > { %2903 = vmatmul.mubr.f32.gmra.mxu0 %v7158_v56  ;;  %4432 = vmatprep.subr.mxu1 %v2494_v44  ;;  %v2521_v8 = vld [vmem:[%s8033_s3 + $0x610] sm:$0xff]  ;;  %v2620_v44 = vld [vmem:[%s8033_s3 + $0x928] sm:$0xff] }
 0x459   : > { %4461 = vmatprep.subr.mxu0 %v2608_v42  ;;  %2908 = vmatprep.mubr.f32.mxu0 %v7169_v50  ;;  %v2617_v42 = vld [vmem:[%s8033_s3 + $0x910] sm:$0xff] }
 0x45a   : > { %4433 = vmatpush3.msra.mxu1 %v2446_v54  ;;  %4462 = vmatpush3.msra.mxu0 %v2560_v10 }
 0x45b   : > { %4434 = vmatprep.subr.mxu1 %v2491_v43  ;;  %4463 = vmatprep.subr.mxu0 %v2605_v37 }
 0x45c   : > { %4435 = vmatpush3.msra.mxu1 %v2443_v57  ;;  %4464 = vmatpush3.msra.mxu0 %v2557_v45 }
 0x45d   : > { %2909 = vmatmul.mubr.f32.gmra.mxu0 %v7195_v14  ;;  %4436 = vmatprep.subr.mxu1 %v2488_v3 }
 0x45e   : > { %4465 = vmatprep.subr.mxu0 %v2602_v55  ;;  %4437 = vmatpush3.msra.mxu1 %v2440_v38 }
 0x45f   : > { %4466 = vmatpush3.msra.mxu0 %v2554_v58  ;;  %3222 = vmatprep.mubr.f32.mxu0 %v6871_v39  ;;  %v2479_v39 = vld [vmem:[%s8033_s3 + $0x4c0] sm:$0xff] }
 0x460   : > { %4438 = vmatprep.subr.mxu1 %v2485_v1  ;;  %4467 = vmatprep.subr.mxu0 %v2599_v51  ;;  %v7361_v1 = vld [vmem:[%s8034_s4] sm:$0x7] }
 0x461   : > { %4439 = vmatpush3.msra.mxu1 %v2437_v32  ;;  %4468 = vmatpush3.msra.mxu0 %v2551_v5 }
 0x462   : > { %4440 = vmatprep.subr.mxu1 %v2482_v18  ;;  %4469 = vmatprep.subr.mxu0 %v2596_v48  ;;  %v2647_v18 = vrot.slane %v7361_v1, %v755_v60  ;;  %v2651_v48 = vrot.slane %v7361_v1, %v759_v61 }
 0x463   : > { %4441 = vmatpush3.msra.mxu1 %v2434_v31  ;;  %4470 = vmatpush3.msra.mxu0 %v2548_v15 }
 0x464   : > { %4442 = vmatprep.subr.mxu1 %v2479_v39  ;;  %4471 = vmatprep.subr.mxu0 %v2593_v49 }
 0x465   : > { %4443 = vmatpush3.msra.mxu1 %v2431_v22  ;;  %4472 = vmatpush3.msra.mxu0 %v2545_v59 }
 0x466   : > { %4444 = vmatprep.subr.mxu1 %v2476_v17  ;;  %4473 = vmatprep.subr.mxu0 %v2590_v26 }
 0x467   : > { %4445 = vmatpush3.msra.mxu1 %v2428_v27  ;;  %4474 = vmatpush3.msra.mxu0 %v2542_v28 }
 0x468   : > { %4446 = vmatprep.subr.mxu1 %v2473_v21  ;;  %4475 = vmatprep.subr.mxu0 %v2587_v24 }
 0x469   : > { %4447 = vmatpush3.msra.mxu1 %v2425_v29  ;;  %4476 = vmatpush3.msra.mxu0 %v2539_v30 }
 0x46a   : > { %3143 = vmatmul.mubr.f32.vlgmr.msra.gmra.mxu1 %v6672_v19  ;;  %4477 = vmatprep.subr.mxu0 %v2584_v0  ;;  %v2578_v19 = vld [vmem:[%s8033_s3 + $0x7d8] sm:$0xff] }
 0x46b   : > { %4593 = vmatprep.subr.mxu1 %v4733_v4  ;;  %3147 = vmatprep.mubr.f32.mxu1 %v6695_v20  ;;  %v2530_v20 = vld [vmem:[%s8033_s3 + $0x658] sm:$0xff] }
 0x46c   : > { %4478 = vmatpush3.msra.mxu0 %v2536_v25  ;;  %4594 = vmatpush3.msra.mxu1 %v2641_v2 }
 0x46d   : > { %4479 = vmatprep.subr.mxu0 %v2581_v62  ;;  %4595 = vmatprep.subr.mxu1 %v4733_v4 }
 0x46e   : > { %4480 = vmatpush3.msra.mxu0 %v2533_v11  ;;  %4596 = vmatpush3.msra.mxu1 %v2638_v9 }
 0x46f   : > { %3148 = vmatmul.mubr.f32.gmra.mxu1 %v6719_v33  ;;  %4481 = vmatprep.subr.mxu0 %v2578_v19  ;;  %v2572_v33 = vld [vmem:[%s8033_s3 + $0x7a8] sm:$0xff] }
 0x470   : > { %4597 = vmatprep.subr.mxu1 %v4733_v4  ;;  %3152 = vmatprep.mubr.f32.mxu1 %v6765_v63  ;;  %v2524_v63 = vld [vmem:[%s8033_s3 + $0x628] sm:$0xff] }
 0x471   : > { %4482 = vmatpush3.msra.mxu0 %v2530_v20  ;;  %4598 = vmatpush3.msra.mxu1 %v2635_v40 }
 0x472   : > { %4483 = vmatprep.subr.mxu0 %v2575_v35  ;;  %4599 = vmatprep.subr.mxu1 %v4733_v4 }
 0x473   : > { %4484 = vmatpush3.msra.mxu0 %v2527_v47  ;;  %4600 = vmatpush3.msra.mxu1 %v2632_v36 }
 0x474   : > { %3153 = vmatmul.mubr.f32.gmra.mxu1 %v6786_v13  ;;  %4485 = vmatprep.subr.mxu0 %v2572_v33  ;;  %v2623_v13 = vld [vmem:[%s8033_s3 + $0x940] sm:$0xff] }
 0x475   : > { %4601 = vmatprep.subr.mxu1 %v4733_v4  ;;  %4486 = vmatpush3.msra.mxu0 %v2524_v63 }
 0x476   : > { %4602 = vmatpush3.msra.mxu1 %v2629_v52  ;;  %4487 = vmatprep.subr.mxu0 %v2569_v12 }
 0x477   : > { %4603 = vmatprep.subr.mxu1 %v4733_v4  ;;  %4488 = vmatpush3.msra.mxu0 %v2521_v8 }
 0x478   : > { %4604 = vmatpush3.msra.mxu1 %v2626_v34  ;;  %3223 = vmatmul.mubr.f32.vlgmr.msra.gmra.mxu0 %v7124_v41 }
 0x479   : > { %4605 = vmatprep.subr.mxu1 %v4733_v4  ;;  %3227 = vmatprep.mubr.f32.mxu0 %v7135_v6 }
 0x47a   : > { %4606 = vmatpush3.msra.mxu1 %v2623_v13  ;;  %4611 = vmatprep.mubr.msk.f32.mxu1 %vm4738_vm9, %v4733_v4 }
 0x47b   : > { %4607 = vmatprep.subr.mxu1 %v4733_v4 }
 0x47c   : > { %4608 = vmatpush3.msra.mxu1 %v2620_v44  ;;  %3228 = vmatmul.mubr.f32.gmra.mxu0 %v7158_v56 }
 0x47d   : > { %4609 = vmatprep.subr.mxu1 %v4733_v4  ;;  %3232 = vmatprep.mubr.f32.mxu0 %v7169_v50 }
 0x47e   : > { %4610 = vmatpush3.msra.mxu1 %v2617_v42 }
 0x47f   : > { %4612 = vmatmul.mubr.msk.f32.vlgmr.msra.gmra.mxu1 %vm2659_vm14, %v6829_v46 }
 0x480   : > { %3233 = vmatmul.mubr.f32.gmra.mxu0 %v7195_v14  ;;  %4614 = vmatprep.mubr.msk.f32.mxu1 %vm4738_vm9, %v4733_v4 }
 0x481   : > { %3400 = vmatprep.mubr.f32.mxu0 %v4733_v4 }
 0x483   : > { %4615 = vmatmul.mubr.msk.f32.gmra.mxu1 %vm2659_vm14, %v6863_v16 }
 0x484   : > { %4617 = vmatprep.mubr.msk.f32.mxu1 %vm4738_vm9, %v4733_v4 }
 0x487   : > { %4618 = vmatmul.mubr.msk.f32.gmra.mxu1 %vm2659_vm14, %v6896_v7 }
 0x488   : > { %3560 = vmatprep.mubr.f32.mxu1 %v4733_v4 }
 0x4c8   : > { %v2732_v43 = vpop.f32.mrf.mxu0 }
 0x4c9   : > { %v2733_v27 = vadd.f32 %v2732_v43, %v2647_v18  ;;  %v3684_v43 = vld [vmem:[%s8041_s11 + $0xf0] sm:$0xff] }
 0x4ca   : > { %v2815_v41 = vpop.f32.mrf.mxu1  ;;  %v2734_v57 = vpop.f32.mrf.mxu0 }
 0x4cb   : > { %v2735_v59 = vadd.f32 %v2734_v57, %v2651_v48  ;;  %v2816_v2 = vadd.f32 %v2815_v41, %v2733_v27  ;;  %v7410_v57 = vld [vmem:[%s8040_s10 + $0x8] sm:$0xf] }
 0x4cc   : > { %v2817_v46 = vpop.f32.mrf.mxu1 }
 0x4cd   : > { %v2818_v30 = vadd.f32 %v2817_v46, %v2735_v59 }
 0x4d2   : > { %v2821_v6 = vpop.f32.mrf.mxu1  ;;  %v2738_v45 = vpop.f32.mrf.mxu0 }
 0x4d3   : > { %v2739_v22 = vadd.f32 %v2738_v45, %v2647_v18  ;;  %v3683_v45 = vld [vmem:[%s8041_s11 + $0xe8] sm:$0xff] }
 0x4d4   : > { %v2823_v56 = vpop.f32.mrf.mxu1  ;;  %v2740_v3 = vpop.f32.mrf.mxu0 }
 0x4d5   : > { %v2741_v31 = vadd.f32 %v2740_v3, %v2651_v48  ;;  %v2822_v29 = vadd.f32 %v2821_v6, %v2739_v22  ;;  %v3327_v6 = vld [vmem:[%s8039_s9] sm:$0xff]  ;;  %v3672_v22 = vld [vmem:[%s8041_s11 + $0x90] sm:$0xff] }
 0x4d7   : > { %v2824_v28 = vadd.f32 %v2823_v56, %v2741_v31  ;;  %v7387_v56 = vld [vmem:[%s8040_s10] sm:$0xff] }
 0x4d8   : > { %v2744_v38 = vpop.f32.mrf.mxu0 }
 0x4d9   : > { %v2745_v15 = vadd.f32 %v2744_v38, %v2647_v18  ;;  %v3680_v38 = vld [vmem:[%s8041_s11 + $0xd0] sm:$0xff]  ;;  %v3675_v18 = vld [vmem:[%s8041_s11 + $0xa8] sm:$0xff] }
 0x4da   : > { %v2827_v54 = vpop.f32.mrf.mxu1  ;;  %v2746_v58 = vpop.f32.mrf.mxu0 }
 0x4db   : > { %v2747_v17 = vadd.f32 %v2746_v58, %v2651_v48  ;;  %v2828_v21 = vadd.f32 %v2827_v54, %v2745_v15  ;;  %v3678_v58 = vld [vmem:[%s8041_s11 + $0xc0] sm:$0xff] }
 0x4dc   : > { %v2829_v10 = vpop.f32.mrf.mxu1  ;;  %v3674_v48 = vld [vmem:[%s8041_s11 + $0xa0] sm:$0xff] }
 0x4dd   : > { %v2830_v0 = vadd.f32 %v2829_v10, %v2747_v17  ;;  %v3685_v10 = vld [vmem:[%s8041_s11 + $0xf8] sm:$0xff]  ;;  %v3671_v17 = vld [vmem:[%s8041_s11 + $0x88] sm:$0xff] }
 0x4e1   : > { %v2981_v50 = vpop.f32.mrf.mxu1 }
 0x4e3   : > { %v2983_v37 = vpop.f32.mrf.mxu1 }
 0x4e6   : > { %v2987_v16 = vpop.f32.mrf.mxu1 }
 0x4e8   : > { %v2989_v55 = vpop.f32.mrf.mxu1 }
 0x4eb   : > { %v2993_v14 = vpop.f32.mrf.mxu1 }
 0x4ed   : > { %v2995_v7 = vpop.f32.mrf.mxu1 }
 0x504   : > { %v7363_v32 = vpop.f32.mrf.mxu1 }
 0x506   : > { %v7371_v39 = vpop.f32.mrf.mxu1 }
 0x509   : > { %v7373_v24 = vpop.f32.mrf.mxu1 }
 0x50b   : > { %v7375_v9 = vpop.f32.mrf.mxu1 }
 0x50c   : > { %v4412_v27 = vadd.f32 %v7375_v9, %v7373_v24  ;;  %v4409_v24 = vadd.f32 %v7371_v39, %v7363_v32  ;;  %v3666_v9 = vld [vmem:[%s8041_s11 + $0x60] sm:$0xff]  ;;  %v3665_v32 = vld [vmem:[%s8041_s11 + $0x58] sm:$0xff] }
 0x50e   : > { %v7377_v63 = vpop.f32.mrf.mxu1 }
 0x510   : > { %v7379_v42 = vpop.f32.mrf.mxu1 }
 0x513   : > { %v2898_v51 = vpop.f32.mrf.mxu0 }
 0x514   : > { %v2899_v40 = vadd.f32 %v2898_v51, %v2816_v2  ;;  %v3677_v51 = vld [vmem:[%s8041_s11 + $0xb8] sm:$0xff]  ;;  %v3667_v2 = vld [vmem:[%s8041_s11 + $0x68] sm:$0xff] }
 0x515   : > { %v2900_v5 = vpop.f32.mrf.mxu0 }
 0x516   : > { %v2901_v19 = vadd.f32 %v2900_v5, %v2818_v30  ;;  %v2982_v8 = vadd.f32 %v2981_v50, %v2899_v40  ;;  %v3676_v5 = vld [vmem:[%s8041_s11 + $0xb0] sm:$0xff] }
 0x517   : > { %v3668_v30 = vld [vmem:[%s8041_s11 + $0x70] sm:$0xff] }
 0x518   : > { %v2904_v49 = vpop.f32.mrf.mxu0  ;;  %v2984_v52 = vadd.f32 %v2983_v37, %v2901_v19  ;;  %v3318_v46 = vmax.f32 %v2982_v8, 0.0  ;;  %v7404_v37 = vld [vmem:[%s8039_s9 + $0x8] sm:$0xf]  ;;  %v3664_v40 = vld [vmem:[%s8041_s11 + $0x50] sm:$0xff] }
 0x519   : > { %v2905_v62 = vadd.f32 %v2904_v49, %v2822_v29  ;;  %v3673_v49 = vld [vmem:[%s8041_s11 + $0x98] sm:$0xff] }
 0x51a   : > { %v2906_v26 = vpop.f32.mrf.mxu0  ;;  %v3319_v41 = vmax.f32 %v2984_v52, 0.0  ;;  %v3669_v29 = vld [vmem:[%s8041_s11 + $0x78] sm:$0xff] }
 0x51b   : > { %v2907_v25 = vadd.f32 %v2906_v26, %v2824_v28  ;;  %v2988_v33 = vadd.f32 %v2987_v16, %v2905_v62  ;;  %v3682_v16 = vld [vmem:[%s8041_s11 + $0xe0] sm:$0xff] }
 0x51c   : > { %v3670_v26 = vld [vmem:[%s8041_s11 + $0x80] sm:$0xff] }
 0x51d   : > { %v2910_v60 = vpop.f32.mrf.mxu0  ;;  %v2990_v47 = vadd.f32 %v2989_v55, %v2907_v25  ;;  %v3321_v44 = vmax.f32 %v2988_v33, 0.0  ;;  %v3681_v55 = vld [vmem:[%s8041_s11 + $0xd8] sm:$0xff] }
 0x51e   : > { %v2911_v61 = vadd.f32 %v2910_v60, %v2828_v21  ;;  %v4415_v60 = vadd.f32 %v7379_v42, %v7377_v63  ;;  %v3663_v63 = vld [vmem:[%s8041_s11 + $0x48] sm:$0xff]  ;;  %v3661_v42 = vld [vmem:[%s8041_s11 + $0x38] sm:$0xff] }
 0x51f   : > { %v2912_v11 = vpop.f32.mrf.mxu0  ;;  %v3322_v13 = vmax.f32 %v2990_v47, 0.0 }
 0x520   : > { %v2913_v20 = vadd.f32 %v2912_v11, %v2830_v0  ;;  %v2994_v35 = vadd.f32 %v2993_v14, %v2911_v61  ;;  %v3679_v14 = vld [vmem:[%s8041_s11 + $0xc8] sm:$0xff]  ;;  %v2655_v0 = vrot.slane %v7361_v1, %v763_v23 }
 0x522   : > { %v2996_v36 = vadd.f32 %v2995_v7, %v2913_v20  ;;  %v3324_v34 = vmax.f32 %v2994_v35, 0.0  ;;  %v3070_v53 = vadd.f32 %v4412_v27, %v2655_v0  ;;  %v3075_v39 = vadd.f32 %v4415_v60, %v2655_v0  ;;  %v3707_v27 = vld [vmem:[%s8041_s11 + $0x1a8] sm:$0xff]  ;;  %v3702_v60 = vld [vmem:[%s8041_s11 + $0x180] sm:$0xff] }
 0x523   : > { %v3065_v35 = vadd.f32 %v4409_v24, %v2655_v0  ;;  %v3700_v0 = vld [vmem:[%s8041_s11 + $0x170] sm:$0xff]  ;;  %v3699_v24 = vld [vmem:[%s8041_s11 + $0x168] sm:$0xff] }
 0x524   : > { %v3325_v12 = vmax.f32 %v2996_v36, 0.0 }
 0x526   : > { %3362 = vmatprep.subr.mxu0 %v3325_v12  ;;  %3522 = vmatprep.subr.mxu1 %v3325_v12 }
 0x527   : > { %3363 = vmatpush1.msra.mxu0 %v3324_v34  ;;  %3523 = vmatpush1.msra.mxu1 %v3324_v34  ;;  %v3662_v34 = vld [vmem:[%s8041_s11 + $0x40] sm:$0xff] }
 0x528   : > { %3364 = vmatprep.subr.mxu0 %v3322_v13  ;;  %3524 = vmatprep.subr.mxu1 %v3322_v13 }
 0x529   : > { %3365 = vmatpush1.msra.mxu0 %v3321_v44  ;;  %3525 = vmatpush1.msra.mxu1 %v3321_v44 }
 0x52a   : > { %v7389_v54 = vpop.f32.mrf.mxu1  ;;  %3366 = vmatprep.subr.mxu0 %v3319_v41  ;;  %3526 = vmatprep.subr.mxu1 %v3319_v41 }
 0x52b   : > { %3367 = vmatpush1.msra.mxu0 %v3318_v46  ;;  %3527 = vmatpush1.msra.mxu1 %v3318_v46 }
 0x52c   : > { %v4449_v50 = vpop.f32.mrf.mxu1  ;;  %4275 = vmatmul.mubr.msk.f32.vlgmr.msra.gmra.mxu0 %vm3329_vm15, %v3327_v6  ;;  %4279 = vmatmul.mubr.msk.f32.vlgmr.msra.gmra.mxu1 %vm3329_vm15, %v7387_v56 }
 0x52d   : > { %3406 = vmatprep.mubr.f32.mxu0 %v4733_v4  ;;  %3566 = vmatprep.mubr.f32.mxu1 %v4733_v4  ;;  %v4450_v23 = vadd.f32 %v4449_v50, %v7389_v54 }
 0x52e   : > { %3750 = vmatprep.subr.mxu1 %v3685_v10  ;;  %v3659_v10 = vld [vmem:[%s8041_s11 + $0x28] sm:$0xff] }
 0x52f   : > { %3751 = vmatpush1.msra.mxu1 %v3684_v43  ;;  %v4451_v3 = vpop.f32.mrf.mxu1  ;;  %v3145_v13 = vadd.f32 %v4450_v23, %v3065_v35  ;;  %v3658_v43 = vld [vmem:[%s8041_s11 + $0x20] sm:$0xff]  ;;  %v3691_v23 = vld [vmem:[%s8041_s11 + $0x128] sm:$0xff]  ;;  %v3748_v35 = vld [vmem:[%s8041_s11 + $0x2f0] sm:$0xff] }
 0x530   : > { %4276 = vmatmul.mubr.msk.f32.gmra.mxu0 %vm3329_vm15, %v7404_v37  ;;  %4280 = vmatmul.mubr.msk.f32.gmra.mxu1 %vm3329_vm15, %v7410_v57 }
 0x531   : > { %4626 = vmatprep.mubr.msk.f32.mxu0 %vm3329_vm15, %v3327_v6  ;;  %3752 = vmatprep.subr.mxu1 %v3683_v45  ;;  %v4452_v7 = vpop.f32.mrf.mxu1  ;;  %v3660_v6 = vld [vmem:[%s8041_s11 + $0x30] sm:$0xff] }
 0x532   : > { %3753 = vmatpush1.msra.mxu1 %v3682_v16  ;;  %v4453_v25 = vadd.f32 %v4452_v7, %v4451_v3  ;;  %v3657_v3 = vld [vmem:[%s8041_s11 + $0x18] sm:$0xff]  ;;  %v3655_v7 = vld [vmem:[%s8041_s11 + $0x8] sm:$0xff] }
 0x533   : > { %3754 = vmatprep.subr.mxu1 %v3681_v55 }
 0x534   : > { %3755 = vmatpush1.msra.mxu1 %v3680_v38  ;;  %v4454_v31 = vpop.f32.mrf.mxu1  ;;  %v3150_v47 = vadd.f32 %v4453_v25, %v3070_v53  ;;  %v3656_v38 = vld [vmem:[%s8041_s11 + $0x10] sm:$0xff]  ;;  %v3698_v25 = vld [vmem:[%s8041_s11 + $0x160] sm:$0xff] }
 0x535   : > { %3756 = vmatprep.subr.mxu1 %v3679_v14  ;;  %v3692_v53 = vld [vmem:[%s8041_s11 + $0x130] sm:$0xff] }
 0x536   : > { %3757 = vmatpush1.msra.mxu1 %v3678_v58  ;;  %v4455_v28 = vpop.f32.mrf.mxu1 }
 0x537   : > { %3758 = vmatprep.subr.mxu1 %v3677_v51  ;;  %v4456_v62 = vadd.f32 %v4455_v28, %v4454_v31  ;;  %v3654_v51 = vld [vmem:[%s8041_s11] sm:$0xff] }
 0x538   : > { %v4489_v15 = vpop.f32.mrf.mxu0  ;;  %3759 = vmatpush1.msra.mxu1 %v3676_v5  ;;  %v3706_v28 = vld [vmem:[%s8041_s11 + $0x1a0] sm:$0xff] }
 0x539   : > { %3760 = vmatprep.subr.mxu1 %v3675_v18  ;;  %v3155_v52 = vadd.f32 %v4456_v62, %v3075_v39  ;;  %v3717_v18 = vld [vmem:[%s8041_s11 + $0x1f8] sm:$0xff]  ;;  %v3695_v62 = vld [vmem:[%s8041_s11 + $0x148] sm:$0xff] }
 0x53a   : > { %v4490_v59 = vpop.f32.mrf.mxu0  ;;  %3761 = vmatpush1.msra.mxu1 %v3674_v48  ;;  %v3716_v48 = vld [vmem:[%s8041_s11 + $0x1f0] sm:$0xff]  ;;  %v3687_v39 = vld [vmem:[%s8041_s11 + $0x108] sm:$0xff] }
 0x53b   : > { %3762 = vmatprep.subr.mxu1 %v3673_v49  ;;  %v4491_v36 = vadd.f32 %v4490_v59, %v4489_v15  ;;  %v3715_v15 = vld [vmem:[%s8041_s11 + $0x1e8] sm:$0xff]  ;;  %v3714_v49 = vld [vmem:[%s8041_s11 + $0x1e0] sm:$0xff]  ;;  %v3712_v59 = vld [vmem:[%s8041_s11 + $0x1d0] sm:$0xff] }
 0x53c   : > { %v4492_v21 = vpop.f32.mrf.mxu0  ;;  %3763 = vmatpush1.msra.mxu1 %v3672_v22  ;;  %v3713_v22 = vld [vmem:[%s8041_s11 + $0x1d8] sm:$0xff] }
 0x53d   : > { %3764 = vmatprep.subr.mxu1 %v3671_v17  ;;  %v3225_v54 = vadd.f32 %v4491_v36, %v3145_v13  ;;  %v3711_v17 = vld [vmem:[%s8041_s11 + $0x1c8] sm:$0xff]  ;;  %v3999_v36 = vld [vmem:[%s8042_s12 + $0x2f8] sm:$0xff]  ;;  %v3740_v13 = vld [vmem:[%s8041_s11 + $0x2b0] sm:$0xff] }
 0x53e   : > { %v4493_v61 = vpop.f32.mrf.mxu0  ;;  %3765 = vmatpush1.msra.mxu1 %v3670_v26  ;;  %v3708_v26 = vld [vmem:[%s8041_s11 + $0x1b0] sm:$0xff] }
 0x53f   : > { %v3304_v11 = vpop.f32.mrf.mxu1  ;;  %3766 = vmatprep.subr.mxu1 %v3669_v29  ;;  %v4494_v1 = vadd.f32 %v4493_v61, %v4492_v21  ;;  %v3705_v21 = vld [vmem:[%s8041_s11 + $0x198] sm:$0xff]  ;;  %v3703_v29 = vld [vmem:[%s8041_s11 + $0x188] sm:$0xff] }
 0x540   : > { %v4495_v19 = vpop.f32.mrf.mxu0  ;;  %3767 = vmatpush1.msra.mxu1 %v3668_v30  ;;  %v3305_v14 = vadd.f32 %v3304_v11, %v3225_v54  ;;  %v3701_v30 = vld [vmem:[%s8041_s11 + $0x178] sm:$0xff]  ;;  %v3694_v11 = vld [vmem:[%s8041_s11 + $0x140] sm:$0xff] }
 0x541   : > { %v4613_v20 = vpop.f32.mrf.mxu1  ;;  %3768 = vmatprep.subr.mxu1 %v3667_v2  ;;  %v3230_v44 = vadd.f32 %v4494_v1, %v3150_v47  ;;  %v3697_v61 = vld [vmem:[%s8041_s11 + $0x158] sm:$0xff]  ;;  %v3696_v2 = vld [vmem:[%s8041_s11 + $0x150] sm:$0xff]  ;;  %v3690_v1 = vld [vmem:[%s8041_s11 + $0x120] sm:$0xff] }
 0x542   : > { %v4496_v33 = vpop.f32.mrf.mxu0  ;;  %3769 = vmatpush1.msra.mxu1 %v3666_v9  ;;  %v3320_v31 = vmax.f32 %v3305_v14, 0.0  ;;  %v3693_v9 = vld [vmem:[%s8041_s11 + $0x138] sm:$0xff]  ;;  %v3747_v47 = vld [vmem:[%s8041_s11 + $0x2e8] sm:$0xff]  ;;  %v3734_v54 = vld [vmem:[%s8041_s11 + $0x280] sm:$0xff] }
 0x543   : > { %v4497_v12 = vadd.f32 %v4496_v33, %v4495_v19  ;;  %v3309_v8 = vpop.f32.mrf.mxu1  ;;  %3770 = vmatprep.subr.mxu1 %v3665_v32  ;;  %v3689_v19 = vld [vmem:[%s8041_s11 + $0x118] sm:$0xff]  ;;  %v3688_v32 = vld [vmem:[%s8041_s11 + $0x110] sm:$0xff]  ;;  %v3746_v33 = vld [vmem:[%s8041_s11 + $0x2e0] sm:$0xff] }
 0x544   : > { %3771 = vmatpush1.msra.mxu1 %v3664_v40  ;;  %v3310_v45 = vadd.f32 %v3309_v8, %v3230_v44  ;;  %v3749_v20 = vld [vmem:[%s8041_s11 + $0x2f8] sm:$0xff]  ;;  %v3686_v40 = vld [vmem:[%s8041_s11 + $0x100] sm:$0xff]  ;;  %v3739_v44 = vld [vmem:[%s8041_s11 + $0x2a8] sm:$0xff] }
 0x545   : > { %v4616_v41 = vpop.f32.mrf.mxu1  ;;  %v3235_v46 = vadd.f32 %v4497_v12, %v3155_v52  ;;  %3772 = vmatprep.subr.mxu1 %v3663_v63  ;;  %v3745_v63 = vld [vmem:[%s8041_s11 + $0x2d8] sm:$0xff]  ;;  %v3744_v52 = vld [vmem:[%s8041_s11 + $0x2d0] sm:$0xff]  ;;  %v3743_v12 = vld [vmem:[%s8041_s11 + $0x2c8] sm:$0xff] }
 0x546   : > { %3773 = vmatpush1.msra.mxu1 %v3662_v34  ;;  %v3323_v5 = vmax.f32 %v3310_v45, 0.0  ;;  %v3742_v8 = vld [vmem:[%s8041_s11 + $0x2c0] sm:$0xff]  ;;  %v3741_v34 = vld [vmem:[%s8041_s11 + $0x2b8] sm:$0xff] }
 0x547   : > { %v3314_v50 = vpop.f32.mrf.mxu1  ;;  %3774 = vmatprep.subr.mxu1 %v3661_v42  ;;  %v3738_v42 = vld [vmem:[%s8041_s11 + $0x2a0] sm:$0xff]  ;;  %v3737_v41 = vld [vmem:[%s8041_s11 + $0x298] sm:$0xff] }
 0x548   : > { %v3315_v16 = vadd.f32 %v3314_v50, %v3235_v46  ;;  %3775 = vmatpush1.msra.mxu1 %v3660_v6  ;;  %v3736_v46 = vld [vmem:[%s8041_s11 + $0x290] sm:$0xff]  ;;  %v3735_v6 = vld [vmem:[%s8041_s11 + $0x288] sm:$0xff]  ;;  %v3730_v45 = vld [vmem:[%s8041_s11 + $0x260] sm:$0xff] }
 0x549   : > { %v4619_v55 = vpop.f32.mrf.mxu1  ;;  %3776 = vmatprep.subr.mxu1 %v3659_v10  ;;  %v3733_v10 = vld [vmem:[%s8041_s11 + $0x278] sm:$0xff]  ;;  %v3732_v50 = vld [vmem:[%s8041_s11 + $0x270] sm:$0xff] }
 0x54a   : > { %v3326_v58 = vmax.f32 %v3315_v16, 0.0  ;;  %3777 = vmatpush1.msra.mxu1 %v3658_v43  ;;  %v3731_v43 = vld [vmem:[%s8041_s11 + $0x268] sm:$0xff]  ;;  %v3729_v16 = vld [vmem:[%s8041_s11 + $0x258] sm:$0xff] }
 0x54b   : > { %3778 = vmatprep.subr.mxu1 %v3657_v3  ;;  %v3728_v3 = vld [vmem:[%s8041_s11 + $0x250] sm:$0xff]  ;;  %v3727_v55 = vld [vmem:[%s8041_s11 + $0x248] sm:$0xff]  ;;  %v3725_v14 = vld [vmem:[%s8041_s11 + $0x238] sm:$0xff] }
 0x54c   : > { %4620 = vmatprep.subr.mxu0 %v3326_v58  ;;  %3779 = vmatpush1.msra.mxu1 %v3656_v38  ;;  %v3726_v38 = vld [vmem:[%s8041_s11 + $0x240] sm:$0xff] }
 0x54d   : > { %4621 = vmatpush3.msra.mxu0 %v3326_v58  ;;  %3780 = vmatprep.subr.mxu1 %v3655_v7  ;;  %v3723_v7 = vld [vmem:[%s8041_s11 + $0x228] sm:$0xff] }
 0x54e   : > { %4622 = vmatprep.subr.mxu0 %v3323_v5  ;;  %3781 = vmatpush1.msra.mxu1 %v3654_v51  ;;  %v3722_v51 = vld [vmem:[%s8041_s11 + $0x220] sm:$0xff] }
 0x54f   : > { %4623 = vmatpush3.msra.mxu0 %v3323_v5  ;;  %3782 = vmatprep.subr.mxu1 %v3717_v18  ;;  %v3720_v18 = vld [vmem:[%s8041_s11 + $0x210] sm:$0xff] }
 0x550   : > { %4624 = vmatprep.subr.mxu0 %v3320_v31  ;;  %3783 = vmatpush2.msra.mxu1 %v3716_v48  ;;  %v3719_v48 = vld [vmem:[%s8041_s11 + $0x208] sm:$0xff] }
 0x551   : > { %4625 = vmatpush3.msra.mxu0 %v3320_v31  ;;  %3784 = vmatprep.subr.mxu1 %v3715_v15  ;;  %v3935_v15 = vld [vmem:[%s8042_s12 + $0xf8] sm:$0xff] }
 0x552   : > { %4629 = vmatprep.subr.mxu0 %v3326_v58  ;;  %4627 = vmatmul.mubr.msk.f32.vlgmr.msra.gmra.mxu0 %vm3329_vm15, %v7404_v37  ;;  %v3710_v37 = vld [vmem:[%s8041_s11 + $0x1c0] sm:$0xff] }
 0x553   : > { %4630 = vmatpush3.msra.mxu0 %v3326_v58  ;;  %4635 = vmatprep.mubr.msk.f32.mxu0 %vm3329_vm15, %v7387_v56  ;;  %v3709_v56 = vld [vmem:[%s8041_s11 + $0x1b8] sm:$0xff]  ;;  %v3724_v58 = vld [vmem:[%s8041_s11 + $0x230] sm:$0xff] }
 0x554   : > { %4631 = vmatprep.subr.mxu0 %v3323_v5  ;;  %3785 = vmatpush2.msra.mxu1 %v3714_v49 }
 0x555   : > { %4632 = vmatpush3.msra.mxu0 %v3323_v5  ;;  %3786 = vmatprep.subr.mxu1 %v3713_v22  ;;  %v3721_v5 = vld [vmem:[%s8041_s11 + $0x218] sm:$0xff] }
 0x556   : > { %4633 = vmatprep.subr.mxu0 %v3320_v31  ;;  %3787 = vmatpush2.msra.mxu1 %v3712_v59 }
 0x557   : > { %4634 = vmatpush3.msra.mxu0 %v3320_v31  ;;  %3788 = vmatprep.subr.mxu1 %v3711_v17  ;;  %v3718_v31 = vld [vmem:[%s8041_s11 + $0x200] sm:$0xff] }
 0x558   : > { %4636 = vmatmul.mubr.msk.f32.vlgmr.msra.gmra.mxu0 %vm3329_vm15, %v7410_v57  ;;  %3789 = vmatpush2.msra.mxu1 %v3710_v37  ;;  %v3704_v57 = vld [vmem:[%s8041_s11 + $0x190] sm:$0xff] }
 0x559   : > { %3790 = vmatprep.subr.mxu1 %v3709_v56  ;;  %3891 = vmatprep.mubr.f32.mxu0 %v4733_v4 }
 0x55a   : > { %3791 = vmatpush2.msra.mxu1 %v3708_v26  ;;  %3827 = vmatprep.subr.mxu0 %v3749_v20  ;;  %v3998_v26 = vld [vmem:[%s8042_s12 + $0x2f0] sm:$0xff] }
 0x55b   : > { %3792 = vmatprep.subr.mxu1 %v3707_v27  ;;  %3828 = vmatpush1.msra.mxu0 %v3748_v35  ;;  %v3982_v20 = vld [vmem:[%s8042_s12 + $0x270] sm:$0xff]  ;;  %v3980_v35 = vld [vmem:[%s8042_s12 + $0x260] sm:$0xff] }
 0x55c   : > { %3793 = vmatpush2.msra.mxu1 %v3706_v28  ;;  %3829 = vmatprep.subr.mxu0 %v3747_v47  ;;  %v3979_v47 = vld [vmem:[%s8042_s12 + $0x258] sm:$0xff] }
 0x55d   : > { %3794 = vmatprep.subr.mxu1 %v3705_v21  ;;  %3830 = vmatpush1.msra.mxu0 %v3746_v33  ;;  %v3997_v21 = vld [vmem:[%s8042_s12 + $0x2e8] sm:$0xff] }
 0x55e   : > { %3795 = vmatpush2.msra.mxu1 %v3704_v57  ;;  %3831 = vmatprep.subr.mxu0 %v3745_v63  ;;  %v3996_v57 = vld [vmem:[%s8042_s12 + $0x2e0] sm:$0xff]  ;;  %v3977_v33 = vld [vmem:[%s8042_s12 + $0x248] sm:$0xff] }
 0x55f   : > { %3796 = vmatprep.subr.mxu1 %v3703_v29  ;;  %3832 = vmatpush1.msra.mxu0 %v3744_v52  ;;  %v3976_v63 = vld [vmem:[%s8042_s12 + $0x240] sm:$0xff]  ;;  %v3975_v52 = vld [vmem:[%s8042_s12 + $0x238] sm:$0xff] }
 0x560   : > { %3797 = vmatpush2.msra.mxu1 %v3702_v60  ;;  %3833 = vmatprep.subr.mxu0 %v3743_v12  ;;  %v3974_v12 = vld [vmem:[%s8042_s12 + $0x230] sm:$0xff] }
 0x561   : > { %3798 = vmatprep.subr.mxu1 %v3701_v30  ;;  %3834 = vmatpush1.msra.mxu0 %v3742_v8  ;;  %v3973_v8 = vld [vmem:[%s8042_s12 + $0x228] sm:$0xff] }
 0x562   : > { %3799 = vmatpush2.msra.mxu1 %v3700_v0  ;;  %3835 = vmatprep.subr.mxu0 %v3741_v34  ;;  %v3995_v0 = vld [vmem:[%s8042_s12 + $0x2d8] sm:$0xff]  ;;  %v3972_v34 = vld [vmem:[%s8042_s12 + $0x220] sm:$0xff] }
 0x563   : > { %3800 = vmatprep.subr.mxu1 %v3699_v24  ;;  %3836 = vmatpush1.msra.mxu0 %v3740_v13  ;;  %v3971_v13 = vld [vmem:[%s8042_s12 + $0x218] sm:$0xff] }
 0x564   : > { %3801 = vmatpush2.msra.mxu1 %v3698_v25  ;;  %3837 = vmatprep.subr.mxu0 %v3739_v44  ;;  %v3994_v25 = vld [vmem:[%s8042_s12 + $0x2d0] sm:$0xff] }
 0x565   : > { %3802 = vmatprep.subr.mxu1 %v3697_v61  ;;  %3838 = vmatpush1.msra.mxu0 %v3738_v42  ;;  %v3993_v61 = vld [vmem:[%s8042_s12 + $0x2c8] sm:$0xff]  ;;  %v3970_v44 = vld [vmem:[%s8042_s12 + $0x210] sm:$0xff] }
 0x566   : > { %3803 = vmatpush2.msra.mxu1 %v3696_v2  ;;  %3839 = vmatprep.subr.mxu0 %v3737_v41  ;;  %v3992_v2 = vld [vmem:[%s8042_s12 + $0x2c0] sm:$0xff]  ;;  %v3969_v42 = vld [vmem:[%s8042_s12 + $0x208] sm:$0xff] }
 0x567   : > { %3804 = vmatprep.subr.mxu1 %v3695_v62  ;;  %3840 = vmatpush1.msra.mxu0 %v3736_v46  ;;  %v3991_v62 = vld [vmem:[%s8042_s12 + $0x2b8] sm:$0xff]  ;;  %v3968_v41 = vld [vmem:[%s8042_s12 + $0x200] sm:$0xff] }
 0x568   : > { %3805 = vmatpush2.msra.mxu1 %v3694_v11  ;;  %3841 = vmatprep.subr.mxu0 %v3735_v6  ;;  %v3990_v11 = vld [vmem:[%s8042_s12 + $0x2b0] sm:$0xff] }
 0x569   : > { %3806 = vmatprep.subr.mxu1 %v3693_v9  ;;  %3842 = vmatpush1.msra.mxu0 %v3734_v54  ;;  %v3989_v9 = vld [vmem:[%s8042_s12 + $0x2a8] sm:$0xff] }
 0x56a   : > { %3807 = vmatpush2.msra.mxu1 %v3692_v53  ;;  %3843 = vmatprep.subr.mxu0 %v3733_v10  ;;  %v3988_v53 = vld [vmem:[%s8042_s12 + $0x2a0] sm:$0xff] }
 0x56b   : > { %3808 = vmatprep.subr.mxu1 %v3691_v23  ;;  %3844 = vmatpush1.msra.mxu0 %v3732_v50  ;;  %v3987_v23 = vld [vmem:[%s8042_s12 + $0x298] sm:$0xff] }
 0x56c   : > { %3809 = vmatpush2.msra.mxu1 %v3690_v1  ;;  %3845 = vmatprep.subr.mxu0 %v3731_v43  ;;  %v3986_v1 = vld [vmem:[%s8042_s12 + $0x290] sm:$0xff] }
 0x56d   : > { %3810 = vmatprep.subr.mxu1 %v3689_v19  ;;  %3846 = vmatpush1.msra.mxu0 %v3730_v45  ;;  %v3985_v19 = vld [vmem:[%s8042_s12 + $0x288] sm:$0xff]  ;;  %v3934_v43 = vld [vmem:[%s8042_s12 + $0xf0] sm:$0xff] }
 0x56e   : > { %3811 = vmatpush2.msra.mxu1 %v3688_v32  ;;  %3847 = vmatprep.subr.mxu0 %v3729_v16  ;;  %v3984_v32 = vld [vmem:[%s8042_s12 + $0x280] sm:$0xff]  ;;  %v3933_v45 = vld [vmem:[%s8042_s12 + $0xe8] sm:$0xff] }
 0x56f   : > { %3812 = vmatprep.subr.mxu1 %v3687_v39  ;;  %3848 = vmatpush1.msra.mxu0 %v3728_v3  ;;  %v3983_v39 = vld [vmem:[%s8042_s12 + $0x278] sm:$0xff]  ;;  %v3932_v16 = vld [vmem:[%s8042_s12 + $0xe0] sm:$0xff] }
 0x570   : > { %3813 = vmatpush2.msra.mxu1 %v3686_v40  ;;  %3849 = vmatprep.subr.mxu0 %v3727_v55  ;;  %v3981_v40 = vld [vmem:[%s8042_s12 + $0x268] sm:$0xff]  ;;  %v3931_v3 = vld [vmem:[%s8042_s12 + $0xd8] sm:$0xff] }
 0x571   : > { %4077 = vmatprep.subr.mxu1 %v3999_v36  ;;  %3850 = vmatpush1.msra.mxu0 %v3726_v38  ;;  %v3978_v36 = vld [vmem:[%s8042_s12 + $0x250] sm:$0xff] }
 0x572   : > { %3851 = vmatprep.subr.mxu0 %v3725_v14  ;;  %v3930_v38 = vld [vmem:[%s8042_s12 + $0xd0] sm:$0xff]  ;;  %v3929_v14 = vld [vmem:[%s8042_s12 + $0xc8] sm:$0xff] }
 0x573   : > { %3852 = vmatpush1.msra.mxu0 %v3724_v58  ;;  %v3928_v58 = vld [vmem:[%s8042_s12 + $0xc0] sm:$0xff] }
 0x574   : > { %3853 = vmatprep.subr.mxu0 %v3723_v7  ;;  %v3927_v7 = vld [vmem:[%s8042_s12 + $0xb8] sm:$0xff] }
 0x575   : > { %3854 = vmatpush1.msra.mxu0 %v3722_v51  ;;  %v3925_v51 = vld [vmem:[%s8042_s12 + $0xa8] sm:$0xff] }
 0x576   : > { %3855 = vmatprep.subr.mxu0 %v3721_v5  ;;  %v3924_v5 = vld [vmem:[%s8042_s12 + $0xa0] sm:$0xff] }
 0x577   : > { %3856 = vmatpush1.msra.mxu0 %v3720_v18  ;;  %v3923_v18 = vld [vmem:[%s8042_s12 + $0x98] sm:$0xff] }
 0x578   : > { %3857 = vmatprep.subr.mxu0 %v3719_v48  ;;  %v3922_v48 = vld [vmem:[%s8042_s12 + $0x90] sm:$0xff] }
 0x579   : > { %3858 = vmatpush1.msra.mxu0 %v3718_v31  ;;  %v3921_v31 = vld [vmem:[%s8042_s12 + $0x88] sm:$0xff] }
 0x57a   : > { %4000 = vmatprep.subr.mxu0 %v3935_v15  ;;  %v3920_v15 = vld [vmem:[%s8042_s12 + $0x80] sm:$0xff] }
 0x5ec   : > { %v3402_v49 = vpop.f32.mrf.mxu0  ;;  %v3562_v22 = vpop.f32.mrf.mxu1 }
 0x5ed   : > { %v7722_v59 = vmax.f32 %v3402_v49, %v3562_v22  ;;  %v3919_v49 = vld [vmem:[%s8042_s12 + $0x78] sm:$0xff]  ;;  %v3918_v22 = vld [vmem:[%s8042_s12 + $0x70] sm:$0xff] }
 0x5ee   : > { %v3404_v17 = vpop.f32.mrf.mxu0  ;;  %v3564_v37 = vpop.f32.mrf.mxu1 }
 0x5ef   : > { %v7724_v56 = vmax.f32 %v3404_v17, %v3564_v37  ;;  %v3917_v17 = vld [vmem:[%s8042_s12 + $0x68] sm:$0xff]  ;;  %v3916_v37 = vld [vmem:[%s8042_s12 + $0x60] sm:$0xff] }
 0x5f0   : > { %v3408_v27 = vpop.f32.mrf.mxu0  ;;  %v3568_v28 = vpop.f32.mrf.mxu1 }
 0x5f1   : > { %3814 = vmatprep.mubr.f32.mxu1 %v7724_v56  ;;  %v7737_v60 = vmax.f32 %v3408_v27, %v3568_v28  ;;  %v3913_v27 = vld [vmem:[%s8042_s12 + $0x48] sm:$0xff]  ;;  %v3912_v28 = vld [vmem:[%s8042_s12 + $0x40] sm:$0xff] }
 0x5f2   : > { %3815 = vmatmul.mubr.f32.vlgmr.msra.gmra.mxu1 %v7722_v59  ;;  %v3410_v29 = vpop.f32.mrf.mxu0  ;;  %v3570_v30 = vpop.f32.mrf.mxu1 }
 0x5f3   : > { %4078 = vmatpush1.msra.mxu1 %v3998_v26  ;;  %v7742_v24 = vmax.f32 %v3410_v29, %v3570_v30  ;;  %v3914_v26 = vld [vmem:[%s8042_s12 + $0x50] sm:$0xff]  ;;  %v3909_v29 = vld [vmem:[%s8042_s12 + $0x28] sm:$0xff]  ;;  %v3908_v30 = vld [vmem:[%s8042_s12 + $0x20] sm:$0xff] }
 0x5f4   : > { %4079 = vmatprep.subr.mxu1 %v3997_v21  ;;  %v3911_v21 = vld [vmem:[%s8042_s12 + $0x38] sm:$0xff] }
 0x5f5   : > { %4080 = vmatpush1.msra.mxu1 %v3996_v57  ;;  %3820 = vmatprep.mubr.f32.mxu1 %v7742_v24  ;;  %v3910_v57 = vld [vmem:[%s8042_s12 + $0x30] sm:$0xff] }
 0x5f6   : > { %4081 = vmatprep.subr.mxu1 %v3995_v0  ;;  %3821 = vmatmul.mubr.f32.gmra.mxu1 %v7737_v60  ;;  %v3907_v0 = vld [vmem:[%s8042_s12 + $0x18] sm:$0xff] }
 0x5f7   : > { %4082 = vmatpush1.msra.mxu1 %v3994_v25  ;;  %4141 = vmatprep.mubr.f32.mxu1 %v4733_v4  ;;  %v3906_v25 = vld [vmem:[%s8042_s12 + $0x10] sm:$0xff] }
 0x5f8   : > { %4083 = vmatprep.subr.mxu1 %v3993_v61  ;;  %v3905_v61 = vld [vmem:[%s8042_s12 + $0x8] sm:$0xff] }
 0x5f9   : > { %4084 = vmatpush1.msra.mxu1 %v3992_v2  ;;  %v3904_v2 = vld [vmem:[%s8042_s12] sm:$0xff] }
 0x5fa   : > { %4085 = vmatprep.subr.mxu1 %v3991_v62  ;;  %v3967_v62 = vld [vmem:[%s8042_s12 + $0x1f8] sm:$0xff] }
 0x5fb   : > { %4086 = vmatpush1.msra.mxu1 %v3990_v11  ;;  %v3966_v11 = vld [vmem:[%s8042_s12 + $0x1f0] sm:$0xff] }
 0x5fc   : > { %4087 = vmatprep.subr.mxu1 %v3989_v9  ;;  %v3965_v9 = vld [vmem:[%s8042_s12 + $0x1e8] sm:$0xff] }
 0x5fd   : > { %4088 = vmatpush1.msra.mxu1 %v3988_v53  ;;  %v3964_v53 = vld [vmem:[%s8042_s12 + $0x1e0] sm:$0xff] }
 0x5fe   : > { %4089 = vmatprep.subr.mxu1 %v3987_v23  ;;  %v3963_v23 = vld [vmem:[%s8042_s12 + $0x1d8] sm:$0xff] }
 0x5ff   : > { %4090 = vmatpush1.msra.mxu1 %v3986_v1  ;;  %v3962_v1 = vld [vmem:[%s8042_s12 + $0x1d0] sm:$0xff] }
 0x600   : > { %4091 = vmatprep.subr.mxu1 %v3985_v19  ;;  %v3961_v19 = vld [vmem:[%s8042_s12 + $0x1c8] sm:$0xff] }
 0x601   : > { %4092 = vmatpush1.msra.mxu1 %v3984_v32  ;;  %v3960_v32 = vld [vmem:[%s8042_s12 + $0x1c0] sm:$0xff] }
 0x602   : > { %4093 = vmatprep.subr.mxu1 %v3983_v39  ;;  %v3959_v39 = vld [vmem:[%s8042_s12 + $0x1b8] sm:$0xff] }
 0x603   : > { %4094 = vmatpush1.msra.mxu1 %v3982_v20  ;;  %v3958_v20 = vld [vmem:[%s8042_s12 + $0x1b0] sm:$0xff] }
 0x604   : > { %4095 = vmatprep.subr.mxu1 %v3981_v40  ;;  %v3957_v40 = vld [vmem:[%s8042_s12 + $0x1a8] sm:$0xff] }
 0x605   : > { %4096 = vmatpush1.msra.mxu1 %v3980_v35  ;;  %v3956_v35 = vld [vmem:[%s8042_s12 + $0x1a0] sm:$0xff] }
 0x606   : > { %4097 = vmatprep.subr.mxu1 %v3979_v47  ;;  %v3955_v47 = vld [vmem:[%s8042_s12 + $0x198] sm:$0xff] }
 0x607   : > { %4098 = vmatpush1.msra.mxu1 %v3978_v36  ;;  %v3954_v36 = vld [vmem:[%s8042_s12 + $0x190] sm:$0xff] }
 0x608   : > { %4099 = vmatprep.subr.mxu1 %v3977_v33  ;;  %v3953_v33 = vld [vmem:[%s8042_s12 + $0x188] sm:$0xff] }
 0x609   : > { %4100 = vmatpush1.msra.mxu1 %v3976_v63  ;;  %v3952_v63 = vld [vmem:[%s8042_s12 + $0x180] sm:$0xff] }
 0x60a   : > { %4101 = vmatprep.subr.mxu1 %v3975_v52  ;;  %v3951_v52 = vld [vmem:[%s8042_s12 + $0x178] sm:$0xff] }
 0x60b   : > { %4102 = vmatpush1.msra.mxu1 %v3974_v12  ;;  %v3950_v12 = vld [vmem:[%s8042_s12 + $0x170] sm:$0xff] }
 0x60c   : > { %4103 = vmatprep.subr.mxu1 %v3973_v8  ;;  %v3949_v8 = vld [vmem:[%s8042_s12 + $0x168] sm:$0xff] }
 0x60d   : > { %4104 = vmatpush1.msra.mxu1 %v3972_v34  ;;  %v3948_v34 = vld [vmem:[%s8042_s12 + $0x160] sm:$0xff] }
 0x60e   : > { %4105 = vmatprep.subr.mxu1 %v3971_v13  ;;  %v3947_v13 = vld [vmem:[%s8042_s12 + $0x158] sm:$0xff] }
 0x60f   : > { %4106 = vmatpush1.msra.mxu1 %v3970_v44  ;;  %v3946_v44 = vld [vmem:[%s8042_s12 + $0x150] sm:$0xff] }
 0x610   : > { %4107 = vmatprep.subr.mxu1 %v3969_v42  ;;  %v3945_v42 = vld [vmem:[%s8042_s12 + $0x148] sm:$0xff] }
 0x611   : > { %4108 = vmatpush1.msra.mxu1 %v3968_v41  ;;  %v3944_v41 = vld [vmem:[%s8042_s12 + $0x140] sm:$0xff] }
 0x612   : > { %v4628_v46 = vpop.f32.mrf.mxu0 }
 0x614   : > { %v3479_v6 = vpop.f32.mrf.mxu0 }
 0x618   : > { %v4637_v54 = vpop.f32.mrf.mxu0 }
 0x619   : > { %v3653_v55 = vmax.f32 %v4628_v46, %v4637_v54  ;;  %v3943_v46 = vld [vmem:[%s8042_s12 + $0x138] sm:$0xff]  ;;  %v3941_v54 = vld [vmem:[%s8042_s12 + $0x128] sm:$0xff] }
 0x61a   : > { %v3639_v10 = vpop.f32.mrf.mxu0 }
 0x61b   : > { %v3650_v50 = vmax.f32 %v3479_v6, %v3639_v10  ;;  %v3942_v6 = vld [vmem:[%s8042_s12 + $0x130] sm:$0xff]  ;;  %v3940_v10 = vld [vmem:[%s8042_s12 + $0x120] sm:$0xff] }
 0x61d   : > { %3892 = vmatmul.mubr.f32.vlgmr.msra.gmra.mxu0 %v3650_v50  ;;  %4142 = vmatmul.mubr.f32.vlgmr.msra.gmra.mxu1 %v3650_v50  ;;  %v3939_v50 = vld [vmem:[%s8042_s12 + $0x118] sm:$0xff] }
 0x61e   : > { %4001 = vmatpush1.msra.mxu0 %v3934_v43  ;;  %3897 = vmatprep.mubr.f32.mxu0 %v4733_v4  ;;  %v3938_v43 = vld [vmem:[%s8042_s12 + $0x110] sm:$0xff] }
 0x61f   : > { %4002 = vmatprep.subr.mxu0 %v3933_v45  ;;  %4147 = vmatprep.mubr.f32.mxu1 %v4733_v4  ;;  %v3926_v4 = vld [vmem:[%s8042_s12 + $0xb0] sm:$0xff]  ;;  %v3937_v45 = vld [vmem:[%s8042_s12 + $0x108] sm:$0xff] }
 0x620   : > { %4003 = vmatpush1.msra.mxu0 %v3932_v16  ;;  %v3936_v16 = vld [vmem:[%s8042_s12 + $0x100] sm:$0xff] }
 0x621   : > { %4004 = vmatprep.subr.mxu0 %v3931_v3  ;;  %3898 = vmatmul.mubr.f32.gmra.mxu0 %v3653_v55 }
 0x622   : > { %4005 = vmatpush1.msra.mxu0 %v3930_v38  ;;  %4064 = vmatprep.mubr.f32.mxu0 %v7724_v56  ;;  %v3915_v56 = vld [vmem:[%s8042_s12 + $0x58] sm:$0xff] }
 0x623   : > { %4006 = vmatprep.subr.mxu0 %v3929_v14  ;;  %4148 = vmatmul.mubr.f32.gmra.mxu1 %v3653_v55 }
 0x624   : > { %4007 = vmatpush1.msra.mxu0 %v3928_v58 }
 0x625   : > { %4008 = vmatprep.subr.mxu0 %v3927_v7 }
 0x626   : > { %4009 = vmatpush1.msra.mxu0 %v3926_v4 }
 0x627   : > { %4010 = vmatprep.subr.mxu0 %v3925_v51 }
 0x628   : > { %4011 = vmatpush1.msra.mxu0 %v3924_v5 }
 0x629   : > { %4012 = vmatprep.subr.mxu0 %v3923_v18 }
 0x62a   : > { %4013 = vmatpush1.msra.mxu0 %v3922_v48 }
 0x62b   : > { %4014 = vmatprep.subr.mxu0 %v3921_v31 }
 0x62c   : > { %4015 = vmatpush1.msra.mxu0 %v3920_v15 }
 0x62d   : > { %4016 = vmatprep.subr.mxu0 %v3919_v49 }
 0x62e   : > { %4017 = vmatpush1.msra.mxu0 %v3918_v22 }
 0x62f   : > { %4018 = vmatprep.subr.mxu0 %v3917_v17 }
 0x630   : > { %4019 = vmatpush1.msra.mxu0 %v3916_v37 }
 0x631   : > { %4020 = vmatprep.subr.mxu0 %v3915_v56 }
 0x632   : > { %4021 = vmatpush1.msra.mxu0 %v3914_v26 }
 0x633   : > { %4022 = vmatprep.subr.mxu0 %v3913_v27 }
 0x634   : > { %4023 = vmatpush1.msra.mxu0 %v3912_v28 }
 0x635   : > { %4024 = vmatprep.subr.mxu0 %v3911_v21 }
 0x636   : > { %4025 = vmatpush1.msra.mxu0 %v3910_v57 }
 0x637   : > { %4026 = vmatprep.subr.mxu0 %v3909_v29 }
 0x638   : > { %4027 = vmatpush1.msra.mxu0 %v3908_v30 }
 0x639   : > { %4028 = vmatprep.subr.mxu0 %v3907_v0 }
 0x63a   : > { %4029 = vmatpush1.msra.mxu0 %v3906_v25 }
 0x63b   : > { %4030 = vmatprep.subr.mxu0 %v3905_v61 }
 0x63c   : > { %4031 = vmatpush1.msra.mxu0 %v3904_v2 }
 0x63d   : > { %4032 = vmatprep.subr.mxu0 %v3967_v62 }
 0x63e   : > { %4033 = vmatpush2.msra.mxu0 %v3966_v11 }
 0x63f   : > { %4034 = vmatprep.subr.mxu0 %v3965_v9 }
 0x640   : > { %4035 = vmatpush2.msra.mxu0 %v3964_v53 }
 0x641   : > { %4036 = vmatprep.subr.mxu0 %v3963_v23 }
 0x642   : > { %4037 = vmatpush2.msra.mxu0 %v3962_v1 }
 0x643   : > { %4038 = vmatprep.subr.mxu0 %v3961_v19 }
 0x644   : > { %4039 = vmatpush2.msra.mxu0 %v3960_v32 }
 0x645   : > { %4040 = vmatprep.subr.mxu0 %v3959_v39 }
 0x646   : > { %4041 = vmatpush2.msra.mxu0 %v3958_v20 }
 0x647   : > { %4042 = vmatprep.subr.mxu0 %v3957_v40 }
 0x648   : > { %4043 = vmatpush2.msra.mxu0 %v3956_v35 }
 0x649   : > { %4044 = vmatprep.subr.mxu0 %v3955_v47 }
 0x64a   : > { %4045 = vmatpush2.msra.mxu0 %v3954_v36 }
 0x64b   : > { %4046 = vmatprep.subr.mxu0 %v3953_v33 }
 0x64c   : > { %4047 = vmatpush2.msra.mxu0 %v3952_v63 }
 0x64d   : > { %4048 = vmatprep.subr.mxu0 %v3951_v52 }
 0x64e   : > { %4049 = vmatpush2.msra.mxu0 %v3950_v12 }
 0x64f   : > { %4050 = vmatprep.subr.mxu0 %v3949_v8 }
 0x650   : > { %4051 = vmatpush2.msra.mxu0 %v3948_v34 }
 0x651   : > { %4052 = vmatprep.subr.mxu0 %v3947_v13 }
 0x652   : > { %4053 = vmatpush2.msra.mxu0 %v3946_v44 }
 0x653   : > { %4054 = vmatprep.subr.mxu0 %v3945_v42 }
 0x654   : > { %4055 = vmatpush2.msra.mxu0 %v3944_v41 }
 0x655   : > { %4056 = vmatprep.subr.mxu0 %v3943_v46 }
 0x656   : > { %4057 = vmatpush2.msra.mxu0 %v3942_v6 }
 0x657   : > { %4058 = vmatprep.subr.mxu0 %v3941_v54 }
 0x658   : > { %4059 = vmatpush2.msra.mxu0 %v3940_v10 }
 0x659   : > { %4060 = vmatprep.subr.mxu0 %v3939_v50 }
 0x65a   : > { %4061 = vmatpush2.msra.mxu0 %v3938_v43 }
 0x65b   : > { %4062 = vmatprep.subr.mxu0 %v3937_v45 }
 0x65c   : > { %4063 = vmatpush2.msra.mxu0 %v3936_v16 }
 0x65d   : > { %4065 = vmatmul.mubr.f32.vlgmr.msra.gmra.mxu0 %v7722_v59 }
 0x65e   : > { %4070 = vmatprep.mubr.f32.mxu0 %v7742_v24 }
 0x661   : > { %4071 = vmatmul.mubr.f32.gmra.mxu0 %v7737_v60 }
 0x6b2   : > { %v3816_v3 = vpop.f32.mrf.mxu1 }
 0x6b4   : > { %v3818_v55 = vpop.f32.mrf.mxu1 }
 0x6b6   : > { %v3822_v14 = vpop.f32.mrf.mxu1 }
 0x6b8   : > { %v3824_v7 = vpop.f32.mrf.mxu1 }
 0x6dd   : > { %v3893_v38 = vpop.f32.mrf.mxu0  ;;  %v4143_v4 = vpop.f32.mrf.mxu1 }
 0x6de   : > { %v3894_v31 = vadd.f32 %v3893_v38, %v3816_v3 }
 0x6df   : > { %v3895_v58 = vpop.f32.mrf.mxu0  ;;  %v4145_v5 = vpop.f32.mrf.mxu1 }
 0x6e0   : > { %v3896_v60 = vadd.f32 %v3895_v58, %v3818_v55 }
 0x6e1   : > { %v3899_v51 = vpop.f32.mrf.mxu0 }
 0x6e2   : > { %v3900_v37 = vadd.f32 %v3899_v51, %v3822_v14 }
 0x6e3   : > { %v3901_v18 = vpop.f32.mrf.mxu0  ;;  %v4149_v49 = vpop.f32.mrf.mxu1 }
 0x6e4   : > { %v3902_v21 = vadd.f32 %v3901_v18, %v3824_v7 }
 0x6e5   : > { %v4151_v27 = vpop.f32.mrf.mxu1 }
 0x71d   : > { %v4066_v48 = vpop.f32.mrf.mxu0 }
 0x71e   : > { %v4144_v15 = vadd.f32 %v4143_v4, %v4066_v48 }
 0x71f   : > { %v4068_v59 = vpop.f32.mrf.mxu0 }
 0x720   : > { %v4154_v24 = vmax.f32 %v3894_v31, %v4144_v15  ;;  %v4146_v22 = vadd.f32 %v4145_v5, %v4068_v59 }
 0x721   : > { %v4072_v17 = vpop.f32.mrf.mxu0 }
 0x722   : > { %4158 = vst [vmem:[%s440_s22] sm:$0xff] %v4154_v24  ;;  %v4155_v56 = vmax.f32 %v3896_v60, %v4146_v22  ;;  %v4150_v26 = vadd.f32 %v4149_v49, %v4072_v17 }
 0x723   : > { %v4074_v28 = vpop.f32.mrf.mxu0 }
 0x724   : > { %4160 = vst.msk [vmem:[%s440_s22 + $0x8] sm:$0xff] %vm4159_vm0, %v4155_v56  ;;  %v4156_v57 = vmax.f32 %v3900_v37, %v4150_v26  ;;  %v4152_v29 = vadd.f32 %v4151_v27, %v4074_v28 }
 0x726   : > { %4161 = vst [vmem:[%s440_s22 + $0x10] sm:$0xf] %v4156_v57  ;;  %v4157_v30 = vmax.f32 %v3902_v21, %v4152_v29 }
 0x728   : > { %4163 = vst.msk [vmem:[%s440_s22 + $0x18] sm:$0xf] %vm4162_vm1, %v4157_v30 }
 0x729 PF: > { %s23_s25 = sadd.s32 1, %s4731_s25  }
 0x72a   : > { %p20_p4 = scmp.ge.s32.totalorder %s23_s25, 4  }
 0x72c   :  { %22 = sbr.rel (!%p20_p4) target bundleno = 1 (0x1), region = 102 }

</bundles_post_ra>
